<compile_context>
chip_gen: v7x
topology: tpu7x:2x2x1
jax: 0.10.0
libtpu: 0.0.40
codegen_flags: <defaults>
</compile_context>

<pallas_src>
import functools

import jax
import jax.numpy as jnp
import numpy as np
from jax import lax
from jax.experimental import pallas as pl
from jax.experimental.pallas import tpu as pltpu


def _round_up(x, m):
    return ((x + m - 1) // m) * m


def _gru_fc_kernel(z_ref, h0_ref, w_ih_ref, w_hh_ref, b_hn_ref, w_fc_ref, b_fc_ref,
                   dec_ref, hT_ref, gi_scr, *,
                   seq_len, padded_seq_len, matmul_dtype, unroll):
    """One grid step = one (batch block, time chunk) of the GRU + decode FC.

    z_ref    : (TC, BB, Dp)    input chunk, time-major, padded; column D is 1.0
    h0_ref   : (BB, Hp)        initial hidden state for this batch block
    w_ih_ref : (Dp, 3*Hp)      fused input-to-hidden weights [r|z|n]; row D = folded biases
    w_hh_ref : (Hp, 3*Hp)      fused hidden-to-hidden weights [r|z|n]
    b_hn_ref : (1, Hp)         b_hh_n (stays inside the r* term, as in PyTorch)
    w_fc_ref : (Hp, Op)        decode Linear weight (pre-transposed, padded)
    b_fc_ref : (1, Op)         decode Linear bias
    dec_ref  : (TC, BB, Op)    decoded output chunk
    hT_ref   : (BB, Hp)        resident output block: carries h across time chunks
    gi_scr   : (TC, BB, 3*Hp)  hoisted input-projection results for this chunk
    """
    t_idx = pl.program_id(1)
    TC, BB, Dp = z_ref.shape
    Hp = hT_ref.shape[1]
    Op = dec_ref.shape[2]
    cdt = matmul_dtype

    # Initialise the resident recurrent-state block once per batch block.
    @pl.when(t_idx == 0)
    def _():
        hT_ref[...] = h0_ref[...]

    # Hoisted input projection: one big MXU matmul per chunk. The folded gate
    # biases ride along in the "ones" input column (row D of w_ih), so no
    # broadcast-add over the (TC*BB, 3Hp) intermediate is needed.
    x2 = z_ref[...].reshape(TC * BB, Dp).astype(cdt)
    gi2 = jnp.dot(x2, w_ih_ref[...].astype(cdt), preferred_element_type=jnp.float32)
    gi_scr[...] = gi2.reshape(TC, BB, 3 * Hp)

    # Loop-invariant operands hoisted out of the unrolled recurrence.
    w_hh = w_hh_ref[...]                                  # recurrent path stays f32
    w_fc = w_fc_ref[...].astype(cdt)
    b_hn_b = jnp.broadcast_to(b_hn_ref[...], (BB, Hp))
    b_fc_b = jnp.broadcast_to(b_fc_ref[...], (BB, Op))

    def make_step(masked):
        def step(t, h):
            gh = jnp.dot(h, w_hh, preferred_element_type=jnp.float32)   # (BB, 3Hp)
            gi_t = gi_scr[t]                                            # (BB, 3Hp)
            r = jax.nn.sigmoid(gi_t[:, :Hp] + gh[:, :Hp])
            zg = jax.nn.sigmoid(gi_t[:, Hp:2 * Hp] + gh[:, Hp:2 * Hp])
            n = jnp.tanh(gi_t[:, 2 * Hp:] + r * (gh[:, 2 * Hp:] + b_hn_b))
            h_new = (1.0 - zg) * n + zg * h                 # PyTorch GRU update
            # Decode FC for this timestep: independent of the *next* recurrence
            # matmul, so it fills MXU slack in the latency-bound dependency chain.
            d = jnp.dot(h_new.astype(cdt), w_fc,
                        preferred_element_type=jnp.float32) + b_fc_b
            dec_ref[t] = d.astype(dec_ref.dtype)
            if masked:   # only traced for the last (padded) time chunk
                valid = (t_idx * TC + t) < seq_len
                h_new = jnp.where(valid, h_new, h)
            return h_new
        return step

    def run(masked):
        hT_ref[...] = lax.fori_loop(0, TC, make_step(masked), hT_ref[...],
                                    unroll=unroll)

    if padded_seq_len == seq_len:           # t_chunk divides T: never any padding
        run(False)
    else:
        last = pl.num_programs(1) - 1
        @pl.when(t_idx < last)
        def _():
            run(False)
        @pl.when(t_idx == last)
        def _():
            run(True)


def init_params(key, input_dim, output_dim, hidden_dim):
    """Deterministic parameter init with PyTorch-native GRU/Linear shapes."""
    k = float(1.0 / np.sqrt(hidden_dim))
    ks = jax.random.split(key, 6)
    return {
        "w_ih": jax.random.uniform(ks[0], (3 * hidden_dim, input_dim), jnp.float32, -k, k),
        "w_hh": jax.random.uniform(ks[1], (3 * hidden_dim, hidden_dim), jnp.float32, -k, k),
        "b_ih": jax.random.uniform(ks[2], (3 * hidden_dim,), jnp.float32, -k, k),
        "b_hh": jax.random.uniform(ks[3], (3 * hidden_dim,), jnp.float32, -k, k),
        "w_fc": jax.random.uniform(ks[4], (output_dim, hidden_dim), jnp.float32, -k, k),
        "b_fc": jax.random.uniform(ks[5], (output_dim,), jnp.float32, -k, k),
    }


def large_feature_decoder_forward(z, hidden, params, *, t_chunk=None, batch_block=None,
                                  matmul_dtype=jnp.float32):
    """z: (B, T, input_dim), hidden: (1, B, H) -> (decoded (B,T,O), hidden (1,B,H))."""
    B, T, D = z.shape
    H = params["w_hh"].shape[1]
    O = params["w_fc"].shape[0]
    f32 = jnp.float32

    # Lane-dense padded kernel layout; the +1 input column carries the folded biases.
    Bp = _round_up(max(B, 8), 8)
    Dp = _round_up(D + 1, 128)
    Hp = _round_up(H, 128)
    Op = _round_up(O, 128)

    # Batch-block ("parallel") grid axis: lets v7x's two TensorCores split the
    # batch. Keep a single block for small batches (splitting a serial loop
    # buys nothing on single-TC v5e/v6e).
    if batch_block is None:
        batch_block = Bp // 2 if (Bp >= 128 and (Bp // 2) % 8 == 0) else Bp
    BB = int(batch_block)
    assert Bp % BB == 0 and BB % 8 == 0
    n_bb = Bp // BB

    # ---- VMEM budget -> t_chunk and vmem_limit_bytes -------------------------
    try:
        vmem_phys = int(pltpu.get_tpu_info().vmem_capacity_bytes)
    except Exception:
        vmem_phys = 64 * 1024 * 1024            # v7x-safe fallback
    budget = int(vmem_phys * 0.7)

    w_bytes = (Dp * 3 * Hp + Hp * 3 * Hp + Hp * Op + Hp + Op) * 4
    fixed_bytes = 2 * w_bytes + 4 * BB * Hp * 4            # weights (worst-case 2x) + h0/hT
    per_t_bytes = BB * (3 * Hp + 2 * Dp + 2 * Op) * 4      # gi_scr + double-buffered z/dec
    if t_chunk is None:
        t_chunk = int(max(1, min(128, T, (budget - fixed_bytes) // per_t_bytes)))
    t_chunk = int(max(1, min(T, t_chunk)))
    n_tc = pl.cdiv(T, t_chunk)
    Tp = n_tc * t_chunk

    used_bytes = fixed_bytes + per_t_bytes * t_chunk
    vmem_limit = int(min(vmem_phys - (2 << 20),
                         max(int(used_bytes * 1.3) + (2 << 20), 32 << 20)))

    # ---- inputs: time-major + zero pad + "ones" bias column (one fused copy) --
    z_tbd = jnp.transpose(z, (1, 0, 2)).astype(f32)
    z_pad = (jnp.zeros((Tp, Bp, Dp), f32)
             .at[:T, :B, :D].set(z_tbd)
             .at[:, :, D].set(1.0))
    h0_pad = jnp.zeros((Bp, Hp), f32).at[:B, :H].set(hidden[0].astype(f32))

    # ---- pack & pad weights (PyTorch gate order r, z, n) ----------------------
    def pad2(m, r, c):
        return jnp.zeros((r, c), f32).at[:m.shape[0], :m.shape[1]].set(m.astype(f32))

    def pad1(v, n):
        return jnp.zeros((n,), f32).at[:v.shape[0]].set(v.astype(f32))

    w_ih_g = [params["w_ih"][g * H:(g + 1) * H] for g in range(3)]   # (H, D) each
    w_hh_g = [params["w_hh"][g * H:(g + 1) * H] for g in range(3)]   # (H, H) each
    b_ih_g = [params["b_ih"][g * H:(g + 1) * H] for g in range(3)]
    b_hh_g = [params["b_hh"][g * H:(g + 1) * H] for g in range(3)]

    w_ih_cat = jnp.concatenate([pad2(w.T, Dp, Hp) for w in w_ih_g], axis=1)   # (Dp, 3Hp)
    b_gi = jnp.concatenate([pad1(b_ih_g[0] + b_hh_g[0], Hp),
                            pad1(b_ih_g[1] + b_hh_g[1], Hp),
                            pad1(b_ih_g[2], Hp)])                              # (3Hp,)
    w_ih_cat = w_ih_cat.at[D, :].set(b_gi)        # folded biases ride the ones column
    w_hh_cat = jnp.concatenate([pad2(w.T, Hp, Hp) for w in w_hh_g], axis=1)   # (Hp, 3Hp)
    b_hn = pad1(b_hh_g[2], Hp).reshape(1, Hp)     # stays inside the r* term
    w_fc = pad2(params["w_fc"].T, Hp, Op)
    b_fc = pad1(params["b_fc"], Op).reshape(1, Op)

    kernel = functools.partial(_gru_fc_kernel, seq_len=T, padded_seq_len=Tp,
                               matmul_dtype=matmul_dtype,
                               unroll=int(max(1, min(8, t_chunk))))

    def call_kernel(single_buffer_weights):
        def inv_spec(shape):
            nd = len(shape)

            def idx(b, t):
                return (0,) * nd

            if single_buffer_weights:
                # Invariant operands: one VMEM copy instead of a double buffer.
                return pl.BlockSpec(shape, idx, pipeline_mode=pl.Buffered(buffer_count=1))
            return pl.BlockSpec(shape, idx)

        grid_spec = pltpu.PrefetchScalarGridSpec(
            num_scalar_prefetch=0,
            grid=(n_bb, n_tc),
            in_specs=[
                pl.BlockSpec((t_chunk, BB, Dp), lambda b, t: (t, b, 0)),   # z (streamed)
                pl.BlockSpec((BB, Hp), lambda b, t: (b, 0)),               # h0
                inv_spec((Dp, 3 * Hp)),                                    # w_ih (+ bias row)
                inv_spec((Hp, 3 * Hp)),                                    # w_hh
                inv_spec((1, Hp)),                                         # b_hh_n
                inv_spec((Hp, Op)),                                        # w_fc
                inv_spec((1, Op)),                                         # b_fc
            ],
            out_specs=(
                pl.BlockSpec((t_chunk, BB, Op), lambda b, t: (t, b, 0)),   # decoded chunk
                pl.BlockSpec((BB, Hp), lambda b, t: (b, 0)),               # h_T (resident carry)
            ),
            scratch_shapes=[pltpu.VMEM((t_chunk, BB, 3 * Hp), f32)],       # hoisted projection
        )
        return pl.pallas_call(
            kernel,
            out_shape=(jax.ShapeDtypeStruct((Tp, Bp, Op), f32),
                       jax.ShapeDtypeStruct((Bp, Hp), f32)),
            grid_spec=grid_spec,
            compiler_params=pltpu.CompilerParams(
                dimension_semantics=("parallel", "arbitrary"),
                vmem_limit_bytes=vmem_limit),
        )(z_pad, h0_pad, w_ih_cat, w_hh_cat, b_hn, w_fc, b_fc)

    try:
        dec_pad, hT_pad = call_kernel(True)
    except Exception:
        # pipeline_mode=Buffered(1) unavailable on this jax build: fall back to
        # default (double-buffered) weight windows; everything else unchanged.
        dec_pad, hT_pad = call_kernel(False)

    decoded = jnp.transpose(dec_pad[:T, :B, :O], (1, 0, 2))    # (B, T, O)
    hT = hT_pad[:B, :H]
    return decoded, hT[None, :, :]                             # (1, B, H)


def _reference_forward(z, hidden, params):
    """Pure-JAX reference (same math as torch.nn.GRU + Linear), PyTorch layout."""
    h0 = hidden[0]
    z_tbd = jnp.transpose(z, (1, 0, 2))
    w_ih, w_hh = params["w_ih"], params["w_hh"]
    b_ih, b_hh = params["b_ih"], params["b_hh"]

    def step(h, x_t):
        gi = x_t @ w_ih.T + b_ih
        gh = h @ w_hh.T + b_hh
        i_r, i_z, i_n = jnp.split(gi, 3, axis=-1)
        h_r, h_z, h_n = jnp.split(gh, 3, axis=-1)
        r = jax.nn.sigmoid(i_r + h_r)
        zg = jax.nn.sigmoid(i_z + h_z)
        n = jnp.tanh(i_n + r * h_n)
        h_new = (1.0 - zg) * n + zg * h
        return h_new, h_new @ params["w_fc"].T + params["b_fc"]

    hT, dec_tbo = lax.scan(step, h0, z_tbd)
    return jnp.transpose(dec_tbo, (1, 0, 2)), hT[None, :, :]


if __name__ == "__main__":
    B, T = 2, 8
    INPUT_DIM, HIDDEN_DIM, OUTPUT_DIM = 16, 32, 16

    key = jax.random.PRNGKey(0)
    k_param, k_z = jax.random.split(key)
    params = init_params(k_param, INPUT_DIM, OUTPUT_DIM, HIDDEN_DIM)

    z = jax.random.normal(k_z, (B, T, INPUT_DIM), dtype=jnp.float32)
    hidden = jnp.zeros((1, B, HIDDEN_DIM), dtype=jnp.float32)   # init_hidden()

    decoded, h_out = large_feature_decoder_forward(z, hidden, params)
    decoded = jax.block_until_ready(decoded)
    h_out = jax.block_until_ready(h_out)

    ref_dec, ref_h = _reference_forward(z, hidden, params)
    np.testing.assert_allclose(np.asarray(decoded), np.asarray(ref_dec), rtol=3e-5, atol=3e-5)
    np.testing.assert_allclose(np.asarray(h_out), np.asarray(ref_h), rtol=3e-5, atol=3e-5)
    assert decoded.shape == (B, T, OUTPUT_DIM) and h_out.shape == (1, B, HIDDEN_DIM)

    print("KERNEL_OK")
</pallas_src>

<mosaic_0001>
module attributes {stable_mosaic.version = 11 : i64} {
  func.func @_gru_fc_kernel(%arg0: i32, %arg1: i32, %arg2: memref<8x8x128xf32, #tpu.memory_space<vmem>>, %arg3: memref<8x128xf32, #tpu.memory_space<vmem>>, %arg4: memref<128x384xf32, #tpu.memory_space<vmem>>, %arg5: memref<128x384xf32, #tpu.memory_space<vmem>>, %arg6: memref<1x128xf32, #tpu.memory_space<vmem>>, %arg7: memref<128x128xf32, #tpu.memory_space<vmem>>, %arg8: memref<1x128xf32, #tpu.memory_space<vmem>>, %arg9: memref<8x8x128xf32, #tpu.memory_space<vmem>>, %arg10: memref<8x128xf32, #tpu.memory_space<vmem>>, %arg11: memref<8x8x384xf32, #tpu.memory_space<vmem>>) attributes {dimension_semantics = [#tpu.dimension_semantics<parallel>, #tpu.dimension_semantics<arbitrary>], iteration_bounds = array<i64: 1, 1>, scalar_prefetch = 0 : i64, scratch_operands = 1 : i64, tpu.core_type = #tpu.core_type<tc>, window_params = [{transform_indices = @transform_0, window_bounds = array<i64: 8, 8, 128>}, {transform_indices = @transform_1, window_bounds = array<i64: 8, 128>}, {pipeline_mode = #tpu.pipeline_mode<synchronous>, transform_indices = @transform_2, window_bounds = array<i64: 128, 384>}, {pipeline_mode = #tpu.pipeline_mode<synchronous>, transform_indices = @transform_3, window_bounds = array<i64: 128, 384>}, {pipeline_mode = #tpu.pipeline_mode<synchronous>, transform_indices = @transform_4, window_bounds = array<i64: 1, 128>}, {pipeline_mode = #tpu.pipeline_mode<synchronous>, transform_indices = @transform_5, window_bounds = array<i64: 128, 128>}, {pipeline_mode = #tpu.pipeline_mode<synchronous>, transform_indices = @transform_6, window_bounds = array<i64: 1, 128>}, {transform_indices = @transform_7, window_bounds = array<i64: 8, 8, 128>}, {transform_indices = @transform_8, window_bounds = array<i64: 8, 128>}]} {
    %c0_i32 = arith.constant 0 : i32
    %0 = arith.cmpi eq, %arg1, %c0_i32 : i32
    %1 = arith.extui %0 : i1 to i32
    %c0_i32_0 = arith.constant 0 : i32
    %2 = arith.cmpi ne, %1, %c0_i32_0 : i32
    scf.if %2 {
      %c0_93 = arith.constant 0 : index
      %c0_94 = arith.constant 0 : index
      %315 = vector.load %arg3[%c0_93, %c0_94] : memref<8x128xf32, #tpu.memory_space<vmem>>, vector<8x128xf32>
      %c0_95 = arith.constant 0 : index
      %c0_96 = arith.constant 0 : index
      %316 = vector.load %arg10[%c0_95, %c0_96] : memref<8x128xf32, #tpu.memory_space<vmem>>, vector<8x128xf32>
      tpu.vector_store %arg10[%c0_95, %c0_96], %315 {strides = array<i32>} : memref<8x128xf32, #tpu.memory_space<vmem>>, vector<8x128xf32>,
    } else {
    }
    %c0 = arith.constant 0 : index
    %c0_1 = arith.constant 0 : index
    %c0_2 = arith.constant 0 : index
    %3 = vector.load %arg2[%c0, %c0_1, %c0_2] : memref<8x8x128xf32, #tpu.memory_space<vmem>>, vector<8x8x128xf32>
    %4 = vector.shape_cast %3 : vector<8x8x128xf32> to vector<64x128xf32>
    %c0_3 = arith.constant 0 : index
    %c0_4 = arith.constant 0 : index
    %5 = vector.load %arg4[%c0_3, %c0_4] : memref<128x384xf32, #tpu.memory_space<vmem>>, vector<128x384xf32>
    %cst = arith.constant dense<0.000000e+00> : vector<64x384xf32>
    %6 = tpu.matmul %4, %5, %cst {dimension_numbers = #tpu.dot_dimension_numbers<[1], [0], [0], [1], [0, 0, 1, 1], [], []>} : vector<64x128xf32>, vector<128x384xf32>, vector<64x384xf32> -> vector<64x384xf32>
    %7 = vector.shape_cast %6 : vector<64x384xf32> to vector<8x8x384xf32>
    %c0_5 = arith.constant 0 : index
    %c0_6 = arith.constant 0 : index
    %c0_7 = arith.constant 0 : index
    %8 = vector.load %arg11[%c0_5, %c0_6, %c0_7] : memref<8x8x384xf32, #tpu.memory_space<vmem>>, vector<8x8x384xf32>
    tpu.vector_store %arg11[%c0_5, %c0_6, %c0_7], %7 {strides = array<i32>} : memref<8x8x384xf32, #tpu.memory_space<vmem>>, vector<8x8x384xf32>,
    %c0_8 = arith.constant 0 : index
    %c0_9 = arith.constant 0 : index
    %9 = vector.load %arg5[%c0_8, %c0_9] : memref<128x384xf32, #tpu.memory_space<vmem>>, vector<128x384xf32>
    %c0_10 = arith.constant 0 : index
    %c0_11 = arith.constant 0 : index
    %10 = vector.load %arg7[%c0_10, %c0_11] : memref<128x128xf32, #tpu.memory_space<vmem>>, vector<128x128xf32>
    %c0_12 = arith.constant 0 : index
    %c0_13 = arith.constant 0 : index
    %11 = vector.load %arg6[%c0_12, %c0_13] : memref<1x128xf32, #tpu.memory_space<vmem>>, vector<1x128xf32>
    %12 = vector.shape_cast %11 : vector<1x128xf32> to vector<1x128xf32>
    %13 = vector.broadcast %12 : vector<1x128xf32> to vector<8x128xf32>
    %c0_14 = arith.constant 0 : index
    %c0_15 = arith.constant 0 : index
    %14 = vector.load %arg8[%c0_14, %c0_15] : memref<1x128xf32, #tpu.memory_space<vmem>>, vector<1x128xf32>
    %15 = vector.shape_cast %14 : vector<1x128xf32> to vector<1x128xf32>
    %16 = vector.broadcast %15 : vector<1x128xf32> to vector<8x128xf32>
    %c0_16 = arith.constant 0 : index
    %c0_17 = arith.constant 0 : index
    %17 = vector.load %arg10[%c0_16, %c0_17] : memref<8x128xf32, #tpu.memory_space<vmem>>, vector<8x128xf32>
    %c0_i32_18 = arith.constant 0 : i32
    %cst_19 = arith.constant dense<0.000000e+00> : vector<8x384xf32>
    %18 = tpu.matmul %17, %9, %cst_19 {dimension_numbers = #tpu.dot_dimension_numbers<[1], [0], [0], [1], [0, 0, 1, 1], [], []>} : vector<8x128xf32>, vector<128x384xf32>, vector<8x384xf32> -> vector<8x384xf32>
    %19 = arith.index_cast %c0_i32_18 : i32 to index
    %c0_20 = arith.constant 0 : index
    %c0_21 = arith.constant 0 : index
    %20 = vector.load %arg11[%19, %c0_20, %c0_21] : memref<8x8x384xf32, #tpu.memory_space<vmem>>, vector<1x8x384xf32>
    %21 = vector.shape_cast %20 : vector<1x8x384xf32> to vector<8x384xf32>
    %22 = vector.extract_strided_slice %21 {offsets = [0, 0], sizes = [8, 128], strides = [1, 1]} : vector<8x384xf32> to vector<8x128xf32>
    %23 = vector.extract_strided_slice %18 {offsets = [0, 0], sizes = [8, 128], strides = [1, 1]} : vector<8x384xf32> to vector<8x128xf32>
    %24 = arith.addf %22, %23 : vector<8x128xf32>
    %25 = arith.negf %24 : vector<8x128xf32>
    %26 = math.exp %25 : vector<8x128xf32>
    %cst_22 = arith.constant 1.000000e+00 : f32
    %27 = vector.broadcast %cst_22 : f32 to vector<8x128xf32>
    %28 = arith.addf %27, %26 : vector<8x128xf32>
    %29 = arith.divf %27, %28 : vector<8x128xf32>
    %30 = vector.extract_strided_slice %21 {offsets = [0, 128], sizes = [8, 128], strides = [1, 1]} : vector<8x384xf32> to vector<8x128xf32>
    %31 = vector.extract_strided_slice %18 {offsets = [0, 128], sizes = [8, 128], strides = [1, 1]} : vector<8x384xf32> to vector<8x128xf32>
    %32 = arith.addf %30, %31 : vector<8x128xf32>
    %33 = arith.negf %32 : vector<8x128xf32>
    %34 = math.exp %33 : vector<8x128xf32>
    %cst_23 = arith.constant 1.000000e+00 : f32
    %35 = vector.broadcast %cst_23 : f32 to vector<8x128xf32>
    %36 = arith.addf %35, %34 : vector<8x128xf32>
    %37 = arith.divf %35, %36 : vector<8x128xf32>
    %38 = vector.extract_strided_slice %21 {offsets = [0, 256], sizes = [8, 128], strides = [1, 1]} : vector<8x384xf32> to vector<8x128xf32>
    %39 = vector.extract_strided_slice %18 {offsets = [0, 256], sizes = [8, 128], strides = [1, 1]} : vector<8x384xf32> to vector<8x128xf32>
    %40 = arith.addf %39, %13 : vector<8x128xf32>
    %41 = arith.mulf %29, %40 : vector<8x128xf32>
    %42 = arith.addf %38, %41 : vector<8x128xf32>
    %43 = math.tanh %42 : vector<8x128xf32>
    %cst_24 = arith.constant 1.000000e+00 : f32
    %44 = vector.broadcast %cst_24 : f32 to vector<8x128xf32>
    %45 = arith.subf %44, %37 : vector<8x128xf32>
    %46 = arith.mulf %45, %43 : vector<8x128xf32>
    %47 = arith.mulf %37, %17 : vector<8x128xf32>
    %48 = arith.addf %46, %47 : vector<8x128xf32>
    %cst_25 = arith.constant dense<0.000000e+00> : vector<8x128xf32>
    %49 = tpu.matmul %48, %10, %cst_25 {dimension_numbers = #tpu.dot_dimension_numbers<[1], [0], [0], [1], [0, 0, 1, 1], [], []>} : vector<8x128xf32>, vector<128x128xf32>, vector<8x128xf32> -> vector<8x128xf32>
    %50 = arith.addf %49, %16 : vector<8x128xf32>
    %51 = arith.index_cast %c0_i32_18 : i32 to index
    %c0_26 = arith.constant 0 : index
    %c0_27 = arith.constant 0 : index
    %52 = vector.load %arg9[%51, %c0_26, %c0_27] : memref<8x8x128xf32, #tpu.memory_space<vmem>>, vector<1x8x128xf32>
    %53 = vector.shape_cast %52 : vector<1x8x128xf32> to vector<8x128xf32>
    %54 = vector.shape_cast %50 : vector<8x128xf32> to vector<1x8x128xf32>
    tpu.vector_store %arg9[%51, %c0_26, %c0_27], %54 {strides = array<i32>} : memref<8x8x128xf32, #tpu.memory_space<vmem>>, vector<1x8x128xf32>,
    %c1_i32 = arith.constant 1 : i32
    %cst_28 = arith.constant dense<0.000000e+00> : vector<8x384xf32>
    %55 = tpu.matmul %48, %9, %cst_28 {dimension_numbers = #tpu.dot_dimension_numbers<[1], [0], [0], [1], [0, 0, 1, 1], [], []>} : vector<8x128xf32>, vector<128x384xf32>, vector<8x384xf32> -> vector<8x384xf32>
    %56 = arith.index_cast %c1_i32 : i32 to index
    %c0_29 = arith.constant 0 : index
    %c0_30 = arith.constant 0 : index
    %57 = vector.load %arg11[%56, %c0_29, %c0_30] : memref<8x8x384xf32, #tpu.memory_space<vmem>>, vector<1x8x384xf32>
    %58 = vector.shape_cast %57 : vector<1x8x384xf32> to vector<8x384xf32>
    %59 = vector.extract_strided_slice %58 {offsets = [0, 0], sizes = [8, 128], strides = [1, 1]} : vector<8x384xf32> to vector<8x128xf32>
    %60 = vector.extract_strided_slice %55 {offsets = [0, 0], sizes = [8, 128], strides = [1, 1]} : vector<8x384xf32> to vector<8x128xf32>
    %61 = arith.addf %59, %60 : vector<8x128xf32>
    %62 = arith.negf %61 : vector<8x128xf32>
    %63 = math.exp %62 : vector<8x128xf32>
    %cst_31 = arith.constant 1.000000e+00 : f32
    %64 = vector.broadcast %cst_31 : f32 to vector<8x128xf32>
    %65 = arith.addf %64, %63 : vector<8x128xf32>
    %66 = arith.divf %64, %65 : vector<8x128xf32>
    %67 = vector.extract_strided_slice %58 {offsets = [0, 128], sizes = [8, 128], strides = [1, 1]} : vector<8x384xf32> to vector<8x128xf32>
    %68 = vector.extract_strided_slice %55 {offsets = [0, 128], sizes = [8, 128], strides = [1, 1]} : vector<8x384xf32> to vector<8x128xf32>
    %69 = arith.addf %67, %68 : vector<8x128xf32>
    %70 = arith.negf %69 : vector<8x128xf32>
    %71 = math.exp %70 : vector<8x128xf32>
    %cst_32 = arith.constant 1.000000e+00 : f32
    %72 = vector.broadcast %cst_32 : f32 to vector<8x128xf32>
    %73 = arith.addf %72, %71 : vector<8x128xf32>
    %74 = arith.divf %72, %73 : vector<8x128xf32>
    %75 = vector.extract_strided_slice %58 {offsets = [0, 256], sizes = [8, 128], strides = [1, 1]} : vector<8x384xf32> to vector<8x128xf32>
    %76 = vector.extract_strided_slice %55 {offsets = [0, 256], sizes = [8, 128], strides = [1, 1]} : vector<8x384xf32> to vector<8x128xf32>
    %77 = arith.addf %76, %13 : vector<8x128xf32>
    %78 = arith.mulf %66, %77 : vector<8x128xf32>
    %79 = arith.addf %75, %78 : vector<8x128xf32>
    %80 = math.tanh %79 : vector<8x128xf32>
    %cst_33 = arith.constant 1.000000e+00 : f32
    %81 = vector.broadcast %cst_33 : f32 to vector<8x128xf32>
    %82 = arith.subf %81, %74 : vector<8x128xf32>
    %83 = arith.mulf %82, %80 : vector<8x128xf32>
    %84 = arith.mulf %74, %48 : vector<8x128xf32>
    %85 = arith.addf %83, %84 : vector<8x128xf32>
    %cst_34 = arith.constant dense<0.000000e+00> : vector<8x128xf32>
    %86 = tpu.matmul %85, %10, %cst_34 {dimension_numbers = #tpu.dot_dimension_numbers<[1], [0], [0], [1], [0, 0, 1, 1], [], []>} : vector<8x128xf32>, vector<128x128xf32>, vector<8x128xf32> -> vector<8x128xf32>
    %87 = arith.addf %86, %16 : vector<8x128xf32>
    %88 = arith.index_cast %c1_i32 : i32 to index
    %c0_35 = arith.constant 0 : index
    %c0_36 = arith.constant 0 : index
    %89 = vector.load %arg9[%88, %c0_35, %c0_36] : memref<8x8x128xf32, #tpu.memory_space<vmem>>, vector<1x8x128xf32>
    %90 = vector.shape_cast %89 : vector<1x8x128xf32> to vector<8x128xf32>
    %91 = vector.shape_cast %87 : vector<8x128xf32> to vector<1x8x128xf32>
    tpu.vector_store %arg9[%88, %c0_35, %c0_36], %91 {strides = array<i32>} : memref<8x8x128xf32, #tpu.memory_space<vmem>>, vector<1x8x128xf32>,
    %c2_i32 = arith.constant 2 : i32
    %cst_37 = arith.constant dense<0.000000e+00> : vector<8x384xf32>
    %92 = tpu.matmul %85, %9, %cst_37 {dimension_numbers = #tpu.dot_dimension_numbers<[1], [0], [0], [1], [0, 0, 1, 1], [], []>} : vector<8x128xf32>, vector<128x384xf32>, vector<8x384xf32> -> vector<8x384xf32>
    %93 = arith.index_cast %c2_i32 : i32 to index
    %c0_38 = arith.constant 0 : index
    %c0_39 = arith.constant 0 : index
    %94 = vector.load %arg11[%93, %c0_38, %c0_39] : memref<8x8x384xf32, #tpu.memory_space<vmem>>, vector<1x8x384xf32>
    %95 = vector.shape_cast %94 : vector<1x8x384xf32> to vector<8x384xf32>
    %96 = vector.extract_strided_slice %95 {offsets = [0, 0], sizes = [8, 128], strides = [1, 1]} : vector<8x384xf32> to vector<8x128xf32>
    %97 = vector.extract_strided_slice %92 {offsets = [0, 0], sizes = [8, 128], strides = [1, 1]} : vector<8x384xf32> to vector<8x128xf32>
    %98 = arith.addf %96, %97 : vector<8x128xf32>
    %99 = arith.negf %98 : vector<8x128xf32>
    %100 = math.exp %99 : vector<8x128xf32>
    %cst_40 = arith.constant 1.000000e+00 : f32
    %101 = vector.broadcast %cst_40 : f32 to vector<8x128xf32>
    %102 = arith.addf %101, %100 : vector<8x128xf32>
    %103 = arith.divf %101, %102 : vector<8x128xf32>
    %104 = vector.extract_strided_slice %95 {offsets = [0, 128], sizes = [8, 128], strides = [1, 1]} : vector<8x384xf32> to vector<8x128xf32>
    %105 = vector.extract_strided_slice %92 {offsets = [0, 128], sizes = [8, 128], strides = [1, 1]} : vector<8x384xf32> to vector<8x128xf32>
    %106 = arith.addf %104, %105 : vector<8x128xf32>
    %107 = arith.negf %106 : vector<8x128xf32>
    %108 = math.exp %107 : vector<8x128xf32>
    %cst_41 = arith.constant 1.000000e+00 : f32
    %109 = vector.broadcast %cst_41 : f32 to vector<8x128xf32>
    %110 = arith.addf %109, %108 : vector<8x128xf32>
    %111 = arith.divf %109, %110 : vector<8x128xf32>
    %112 = vector.extract_strided_slice %95 {offsets = [0, 256], sizes = [8, 128], strides = [1, 1]} : vector<8x384xf32> to vector<8x128xf32>
    %113 = vector.extract_strided_slice %92 {offsets = [0, 256], sizes = [8, 128], strides = [1, 1]} : vector<8x384xf32> to vector<8x128xf32>
    %114 = arith.addf %113, %13 : vector<8x128xf32>
    %115 = arith.mulf %103, %114 : vector<8x128xf32>
    %116 = arith.addf %112, %115 : vector<8x128xf32>
    %117 = math.tanh %116 : vector<8x128xf32>
    %cst_42 = arith.constant 1.000000e+00 : f32
    %118 = vector.broadcast %cst_42 : f32 to vector<8x128xf32>
    %119 = arith.subf %118, %111 : vector<8x128xf32>
    %120 = arith.mulf %119, %117 : vector<8x128xf32>
    %121 = arith.mulf %111, %85 : vector<8x128xf32>
    %122 = arith.addf %120, %121 : vector<8x128xf32>
    %cst_43 = arith.constant dense<0.000000e+00> : vector<8x128xf32>
    %123 = tpu.matmul %122, %10, %cst_43 {dimension_numbers = #tpu.dot_dimension_numbers<[1], [0], [0], [1], [0, 0, 1, 1], [], []>} : vector<8x128xf32>, vector<128x128xf32>, vector<8x128xf32> -> vector<8x128xf32>
    %124 = arith.addf %123, %16 : vector<8x128xf32>
    %125 = arith.index_cast %c2_i32 : i32 to index
    %c0_44 = arith.constant 0 : index
    %c0_45 = arith.constant 0 : index
    %126 = vector.load %arg9[%125, %c0_44, %c0_45] : memref<8x8x128xf32, #tpu.memory_space<vmem>>, vector<1x8x128xf32>
    %127 = vector.shape_cast %126 : vector<1x8x128xf32> to vector<8x128xf32>
    %128 = vector.shape_cast %124 : vector<8x128xf32> to vector<1x8x128xf32>
    tpu.vector_store %arg9[%125, %c0_44, %c0_45], %128 {strides = array<i32>} : memref<8x8x128xf32, #tpu.memory_space<vmem>>, vector<1x8x128xf32>,
    %c3_i32 = arith.constant 3 : i32
    %cst_46 = arith.constant dense<0.000000e+00> : vector<8x384xf32>
    %129 = tpu.matmul %122, %9, %cst_46 {dimension_numbers = #tpu.dot_dimension_numbers<[1], [0], [0], [1], [0, 0, 1, 1], [], []>} : vector<8x128xf32>, vector<128x384xf32>, vector<8x384xf32> -> vector<8x384xf32>
    %130 = arith.index_cast %c3_i32 : i32 to index
    %c0_47 = arith.constant 0 : index
    %c0_48 = arith.constant 0 : index
    %131 = vector.load %arg11[%130, %c0_47, %c0_48] : memref<8x8x384xf32, #tpu.memory_space<vmem>>, vector<1x8x384xf32>
    %132 = vector.shape_cast %131 : vector<1x8x384xf32> to vector<8x384xf32>
    %133 = vector.extract_strided_slice %132 {offsets = [0, 0], sizes = [8, 128], strides = [1, 1]} : vector<8x384xf32> to vector<8x128xf32>
    %134 = vector.extract_strided_slice %129 {offsets = [0, 0], sizes = [8, 128], strides = [1, 1]} : vector<8x384xf32> to vector<8x128xf32>
    %135 = arith.addf %133, %134 : vector<8x128xf32>
    %136 = arith.negf %135 : vector<8x128xf32>
    %137 = math.exp %136 : vector<8x128xf32>
    %cst_49 = arith.constant 1.000000e+00 : f32
    %138 = vector.broadcast %cst_49 : f32 to vector<8x128xf32>
    %139 = arith.addf %138, %137 : vector<8x128xf32>
    %140 = arith.divf %138, %139 : vector<8x128xf32>
    %141 = vector.extract_strided_slice %132 {offsets = [0, 128], sizes = [8, 128], strides = [1, 1]} : vector<8x384xf32> to vector<8x128xf32>
    %142 = vector.extract_strided_slice %129 {offsets = [0, 128], sizes = [8, 128], strides = [1, 1]} : vector<8x384xf32> to vector<8x128xf32>
    %143 = arith.addf %141, %142 : vector<8x128xf32>
    %144 = arith.negf %143 : vector<8x128xf32>
    %145 = math.exp %144 : vector<8x128xf32>
    %cst_50 = arith.constant 1.000000e+00 : f32
    %146 = vector.broadcast %cst_50 : f32 to vector<8x128xf32>
    %147 = arith.addf %146, %145 : vector<8x128xf32>
    %148 = arith.divf %146, %147 : vector<8x128xf32>
    %149 = vector.extract_strided_slice %132 {offsets = [0, 256], sizes = [8, 128], strides = [1, 1]} : vector<8x384xf32> to vector<8x128xf32>
    %150 = vector.extract_strided_slice %129 {offsets = [0, 256], sizes = [8, 128], strides = [1, 1]} : vector<8x384xf32> to vector<8x128xf32>
    %151 = arith.addf %150, %13 : vector<8x128xf32>
    %152 = arith.mulf %140, %151 : vector<8x128xf32>
    %153 = arith.addf %149, %152 : vector<8x128xf32>
    %154 = math.tanh %153 : vector<8x128xf32>
    %cst_51 = arith.constant 1.000000e+00 : f32
    %155 = vector.broadcast %cst_51 : f32 to vector<8x128xf32>
    %156 = arith.subf %155, %148 : vector<8x128xf32>
    %157 = arith.mulf %156, %154 : vector<8x128xf32>
    %158 = arith.mulf %148, %122 : vector<8x128xf32>
    %159 = arith.addf %157, %158 : vector<8x128xf32>
    %cst_52 = arith.constant dense<0.000000e+00> : vector<8x128xf32>
    %160 = tpu.matmul %159, %10, %cst_52 {dimension_numbers = #tpu.dot_dimension_numbers<[1], [0], [0], [1], [0, 0, 1, 1], [], []>} : vector<8x128xf32>, vector<128x128xf32>, vector<8x128xf32> -> vector<8x128xf32>
    %161 = arith.addf %160, %16 : vector<8x128xf32>
    %162 = arith.index_cast %c3_i32 : i32 to index
    %c0_53 = arith.constant 0 : index
    %c0_54 = arith.constant 0 : index
    %163 = vector.load %arg9[%162, %c0_53, %c0_54] : memref<8x8x128xf32, #tpu.memory_space<vmem>>, vector<1x8x128xf32>
    %164 = vector.shape_cast %163 : vector<1x8x128xf32> to vector<8x128xf32>
    %165 = vector.shape_cast %161 : vector<8x128xf32> to vector<1x8x128xf32>
    tpu.vector_store %arg9[%162, %c0_53, %c0_54], %165 {strides = array<i32>} : memref<8x8x128xf32, #tpu.memory_space<vmem>>, vector<1x8x128xf32>,
    %c4_i32 = arith.constant 4 : i32
    %cst_55 = arith.constant dense<0.000000e+00> : vector<8x384xf32>
    %166 = tpu.matmul %159, %9, %cst_55 {dimension_numbers = #tpu.dot_dimension_numbers<[1], [0], [0], [1], [0, 0, 1, 1], [], []>} : vector<8x128xf32>, vector<128x384xf32>, vector<8x384xf32> -> vector<8x384xf32>
    %167 = arith.index_cast %c4_i32 : i32 to index
    %c0_56 = arith.constant 0 : index
    %c0_57 = arith.constant 0 : index
    %168 = vector.load %arg11[%167, %c0_56, %c0_57] : memref<8x8x384xf32, #tpu.memory_space<vmem>>, vector<1x8x384xf32>
    %169 = vector.shape_cast %168 : vector<1x8x384xf32> to vector<8x384xf32>
    %170 = vector.extract_strided_slice %169 {offsets = [0, 0], sizes = [8, 128], strides = [1, 1]} : vector<8x384xf32> to vector<8x128xf32>
    %171 = vector.extract_strided_slice %166 {offsets = [0, 0], sizes = [8, 128], strides = [1, 1]} : vector<8x384xf32> to vector<8x128xf32>
    %172 = arith.addf %170, %171 : vector<8x128xf32>
    %173 = arith.negf %172 : vector<8x128xf32>
    %174 = math.exp %173 : vector<8x128xf32>
    %cst_58 = arith.constant 1.000000e+00 : f32
    %175 = vector.broadcast %cst_58 : f32 to vector<8x128xf32>
    %176 = arith.addf %175, %174 : vector<8x128xf32>
    %177 = arith.divf %175, %176 : vector<8x128xf32>
    %178 = vector.extract_strided_slice %169 {offsets = [0, 128], sizes = [8, 128], strides = [1, 1]} : vector<8x384xf32> to vector<8x128xf32>
    %179 = vector.extract_strided_slice %166 {offsets = [0, 128], sizes = [8, 128], strides = [1, 1]} : vector<8x384xf32> to vector<8x128xf32>
    %180 = arith.addf %178, %179 : vector<8x128xf32>
    %181 = arith.negf %180 : vector<8x128xf32>
    %182 = math.exp %181 : vector<8x128xf32>
    %cst_59 = arith.constant 1.000000e+00 : f32
    %183 = vector.broadcast %cst_59 : f32 to vector<8x128xf32>
    %184 = arith.addf %183, %182 : vector<8x128xf32>
    %185 = arith.divf %183, %184 : vector<8x128xf32>
    %186 = vector.extract_strided_slice %169 {offsets = [0, 256], sizes = [8, 128], strides = [1, 1]} : vector<8x384xf32> to vector<8x128xf32>
    %187 = vector.extract_strided_slice %166 {offsets = [0, 256], sizes = [8, 128], strides = [1, 1]} : vector<8x384xf32> to vector<8x128xf32>
    %188 = arith.addf %187, %13 : vector<8x128xf32>
    %189 = arith.mulf %177, %188 : vector<8x128xf32>
    %190 = arith.addf %186, %189 : vector<8x128xf32>
    %191 = math.tanh %190 : vector<8x128xf32>
    %cst_60 = arith.constant 1.000000e+00 : f32
    %192 = vector.broadcast %cst_60 : f32 to vector<8x128xf32>
    %193 = arith.subf %192, %185 : vector<8x128xf32>
    %194 = arith.mulf %193, %191 : vector<8x128xf32>
    %195 = arith.mulf %185, %159 : vector<8x128xf32>
    %196 = arith.addf %194, %195 : vector<8x128xf32>
    %cst_61 = arith.constant dense<0.000000e+00> : vector<8x128xf32>
    %197 = tpu.matmul %196, %10, %cst_61 {dimension_numbers = #tpu.dot_dimension_numbers<[1], [0], [0], [1], [0, 0, 1, 1], [], []>} : vector<8x128xf32>, vector<128x128xf32>, vector<8x128xf32> -> vector<8x128xf32>
    %198 = arith.addf %197, %16 : vector<8x128xf32>
    %199 = arith.index_cast %c4_i32 : i32 to index
    %c0_62 = arith.constant 0 : index
    %c0_63 = arith.constant 0 : index
    %200 = vector.load %arg9[%199, %c0_62, %c0_63] : memref<8x8x128xf32, #tpu.memory_space<vmem>>, vector<1x8x128xf32>
    %201 = vector.shape_cast %200 : vector<1x8x128xf32> to vector<8x128xf32>
    %202 = vector.shape_cast %198 : vector<8x128xf32> to vector<1x8x128xf32>
    tpu.vector_store %arg9[%199, %c0_62, %c0_63], %202 {strides = array<i32>} : memref<8x8x128xf32, #tpu.memory_space<vmem>>, vector<1x8x128xf32>,
    %c5_i32 = arith.constant 5 : i32
    %cst_64 = arith.constant dense<0.000000e+00> : vector<8x384xf32>
    %203 = tpu.matmul %196, %9, %cst_64 {dimension_numbers = #tpu.dot_dimension_numbers<[1], [0], [0], [1], [0, 0, 1, 1], [], []>} : vector<8x128xf32>, vector<128x384xf32>, vector<8x384xf32> -> vector<8x384xf32>
    %204 = arith.index_cast %c5_i32 : i32 to index
    %c0_65 = arith.constant 0 : index
    %c0_66 = arith.constant 0 : index
    %205 = vector.load %arg11[%204, %c0_65, %c0_66] : memref<8x8x384xf32, #tpu.memory_space<vmem>>, vector<1x8x384xf32>
    %206 = vector.shape_cast %205 : vector<1x8x384xf32> to vector<8x384xf32>
    %207 = vector.extract_strided_slice %206 {offsets = [0, 0], sizes = [8, 128], strides = [1, 1]} : vector<8x384xf32> to vector<8x128xf32>
    %208 = vector.extract_strided_slice %203 {offsets = [0, 0], sizes = [8, 128], strides = [1, 1]} : vector<8x384xf32> to vector<8x128xf32>
    %209 = arith.addf %207, %208 : vector<8x128xf32>
    %210 = arith.negf %209 : vector<8x128xf32>
    %211 = math.exp %210 : vector<8x128xf32>
    %cst_67 = arith.constant 1.000000e+00 : f32
    %212 = vector.broadcast %cst_67 : f32 to vector<8x128xf32>
    %213 = arith.addf %212, %211 : vector<8x128xf32>
    %214 = arith.divf %212, %213 : vector<8x128xf32>
    %215 = vector.extract_strided_slice %206 {offsets = [0, 128], sizes = [8, 128], strides = [1, 1]} : vector<8x384xf32> to vector<8x128xf32>
    %216 = vector.extract_strided_slice %203 {offsets = [0, 128], sizes = [8, 128], strides = [1, 1]} : vector<8x384xf32> to vector<8x128xf32>
    %217 = arith.addf %215, %216 : vector<8x128xf32>
    %218 = arith.negf %217 : vector<8x128xf32>
    %219 = math.exp %218 : vector<8x128xf32>
    %cst_68 = arith.constant 1.000000e+00 : f32
    %220 = vector.broadcast %cst_68 : f32 to vector<8x128xf32>
    %221 = arith.addf %220, %219 : vector<8x128xf32>
    %222 = arith.divf %220, %221 : vector<8x128xf32>
    %223 = vector.extract_strided_slice %206 {offsets = [0, 256], sizes = [8, 128], strides = [1, 1]} : vector<8x384xf32> to vector<8x128xf32>
    %224 = vector.extract_strided_slice %203 {offsets = [0, 256], sizes = [8, 128], strides = [1, 1]} : vector<8x384xf32> to vector<8x128xf32>
    %225 = arith.addf %224, %13 : vector<8x128xf32>
    %226 = arith.mulf %214, %225 : vector<8x128xf32>
    %227 = arith.addf %223, %226 : vector<8x128xf32>
    %228 = math.tanh %227 : vector<8x128xf32>
    %cst_69 = arith.constant 1.000000e+00 : f32
    %229 = vector.broadcast %cst_69 : f32 to vector<8x128xf32>
    %230 = arith.subf %229, %222 : vector<8x128xf32>
    %231 = arith.mulf %230, %228 : vector<8x128xf32>
    %232 = arith.mulf %222, %196 : vector<8x128xf32>
    %233 = arith.addf %231, %232 : vector<8x128xf32>
    %cst_70 = arith.constant dense<0.000000e+00> : vector<8x128xf32>
    %234 = tpu.matmul %233, %10, %cst_70 {dimension_numbers = #tpu.dot_dimension_numbers<[1], [0], [0], [1], [0, 0, 1, 1], [], []>} : vector<8x128xf32>, vector<128x128xf32>, vector<8x128xf32> -> vector<8x128xf32>
    %235 = arith.addf %234, %16 : vector<8x128xf32>
    %236 = arith.index_cast %c5_i32 : i32 to index
    %c0_71 = arith.constant 0 : index
    %c0_72 = arith.constant 0 : index
    %237 = vector.load %arg9[%236, %c0_71, %c0_72] : memref<8x8x128xf32, #tpu.memory_space<vmem>>, vector<1x8x128xf32>
    %238 = vector.shape_cast %237 : vector<1x8x128xf32> to vector<8x128xf32>
    %239 = vector.shape_cast %235 : vector<8x128xf32> to vector<1x8x128xf32>
    tpu.vector_store %arg9[%236, %c0_71, %c0_72], %239 {strides = array<i32>} : memref<8x8x128xf32, #tpu.memory_space<vmem>>, vector<1x8x128xf32>,
    %c6_i32 = arith.constant 6 : i32
    %cst_73 = arith.constant dense<0.000000e+00> : vector<8x384xf32>
    %240 = tpu.matmul %233, %9, %cst_73 {dimension_numbers = #tpu.dot_dimension_numbers<[1], [0], [0], [1], [0, 0, 1, 1], [], []>} : vector<8x128xf32>, vector<128x384xf32>, vector<8x384xf32> -> vector<8x384xf32>
    %241 = arith.index_cast %c6_i32 : i32 to index
    %c0_74 = arith.constant 0 : index
    %c0_75 = arith.constant 0 : index
    %242 = vector.load %arg11[%241, %c0_74, %c0_75] : memref<8x8x384xf32, #tpu.memory_space<vmem>>, vector<1x8x384xf32>
    %243 = vector.shape_cast %242 : vector<1x8x384xf32> to vector<8x384xf32>
    %244 = vector.extract_strided_slice %243 {offsets = [0, 0], sizes = [8, 128], strides = [1, 1]} : vector<8x384xf32> to vector<8x128xf32>
    %245 = vector.extract_strided_slice %240 {offsets = [0, 0], sizes = [8, 128], strides = [1, 1]} : vector<8x384xf32> to vector<8x128xf32>
    %246 = arith.addf %244, %245 : vector<8x128xf32>
    %247 = arith.negf %246 : vector<8x128xf32>
    %248 = math.exp %247 : vector<8x128xf32>
    %cst_76 = arith.constant 1.000000e+00 : f32
    %249 = vector.broadcast %cst_76 : f32 to vector<8x128xf32>
    %250 = arith.addf %249, %248 : vector<8x128xf32>
    %251 = arith.divf %249, %250 : vector<8x128xf32>
    %252 = vector.extract_strided_slice %243 {offsets = [0, 128], sizes = [8, 128], strides = [1, 1]} : vector<8x384xf32> to vector<8x128xf32>
    %253 = vector.extract_strided_slice %240 {offsets = [0, 128], sizes = [8, 128], strides = [1, 1]} : vector<8x384xf32> to vector<8x128xf32>
    %254 = arith.addf %252, %253 : vector<8x128xf32>
    %255 = arith.negf %254 : vector<8x128xf32>
    %256 = math.exp %255 : vector<8x128xf32>
    %cst_77 = arith.constant 1.000000e+00 : f32
    %257 = vector.broadcast %cst_77 : f32 to vector<8x128xf32>
    %258 = arith.addf %257, %256 : vector<8x128xf32>
    %259 = arith.divf %257, %258 : vector<8x128xf32>
    %260 = vector.extract_strided_slice %243 {offsets = [0, 256], sizes = [8, 128], strides = [1, 1]} : vector<8x384xf32> to vector<8x128xf32>
    %261 = vector.extract_strided_slice %240 {offsets = [0, 256], sizes = [8, 128], strides = [1, 1]} : vector<8x384xf32> to vector<8x128xf32>
    %262 = arith.addf %261, %13 : vector<8x128xf32>
    %263 = arith.mulf %251, %262 : vector<8x128xf32>
    %264 = arith.addf %260, %263 : vector<8x128xf32>
    %265 = math.tanh %264 : vector<8x128xf32>
    %cst_78 = arith.constant 1.000000e+00 : f32
    %266 = vector.broadcast %cst_78 : f32 to vector<8x128xf32>
    %267 = arith.subf %266, %259 : vector<8x128xf32>
    %268 = arith.mulf %267, %265 : vector<8x128xf32>
    %269 = arith.mulf %259, %233 : vector<8x128xf32>
    %270 = arith.addf %268, %269 : vector<8x128xf32>
    %cst_79 = arith.constant dense<0.000000e+00> : vector<8x128xf32>
    %271 = tpu.matmul %270, %10, %cst_79 {dimension_numbers = #tpu.dot_dimension_numbers<[1], [0], [0], [1], [0, 0, 1, 1], [], []>} : vector<8x128xf32>, vector<128x128xf32>, vector<8x128xf32> -> vector<8x128xf32>
    %272 = arith.addf %271, %16 : vector<8x128xf32>
    %273 = arith.index_cast %c6_i32 : i32 to index
    %c0_80 = arith.constant 0 : index
    %c0_81 = arith.constant 0 : index
    %274 = vector.load %arg9[%273, %c0_80, %c0_81] : memref<8x8x128xf32, #tpu.memory_space<vmem>>, vector<1x8x128xf32>
    %275 = vector.shape_cast %274 : vector<1x8x128xf32> to vector<8x128xf32>
    %276 = vector.shape_cast %272 : vector<8x128xf32> to vector<1x8x128xf32>
    tpu.vector_store %arg9[%273, %c0_80, %c0_81], %276 {strides = array<i32>} : memref<8x8x128xf32, #tpu.memory_space<vmem>>, vector<1x8x128xf32>,
    %c7_i32 = arith.constant 7 : i32
    %cst_82 = arith.constant dense<0.000000e+00> : vector<8x384xf32>
    %277 = tpu.matmul %270, %9, %cst_82 {dimension_numbers = #tpu.dot_dimension_numbers<[1], [0], [0], [1], [0, 0, 1, 1], [], []>} : vector<8x128xf32>, vector<128x384xf32>, vector<8x384xf32> -> vector<8x384xf32>
    %278 = arith.index_cast %c7_i32 : i32 to index
    %c0_83 = arith.constant 0 : index
    %c0_84 = arith.constant 0 : index
    %279 = vector.load %arg11[%278, %c0_83, %c0_84] : memref<8x8x384xf32, #tpu.memory_space<vmem>>, vector<1x8x384xf32>
    %280 = vector.shape_cast %279 : vector<1x8x384xf32> to vector<8x384xf32>
    %281 = vector.extract_strided_slice %280 {offsets = [0, 0], sizes = [8, 128], strides = [1, 1]} : vector<8x384xf32> to vector<8x128xf32>
    %282 = vector.extract_strided_slice %277 {offsets = [0, 0], sizes = [8, 128], strides = [1, 1]} : vector<8x384xf32> to vector<8x128xf32>
    %283 = arith.addf %281, %282 : vector<8x128xf32>
    %284 = arith.negf %283 : vector<8x128xf32>
    %285 = math.exp %284 : vector<8x128xf32>
    %cst_85 = arith.constant 1.000000e+00 : f32
    %286 = vector.broadcast %cst_85 : f32 to vector<8x128xf32>
    %287 = arith.addf %286, %285 : vector<8x128xf32>
    %288 = arith.divf %286, %287 : vector<8x128xf32>
    %289 = vector.extract_strided_slice %280 {offsets = [0, 128], sizes = [8, 128], strides = [1, 1]} : vector<8x384xf32> to vector<8x128xf32>
    %290 = vector.extract_strided_slice %277 {offsets = [0, 128], sizes = [8, 128], strides = [1, 1]} : vector<8x384xf32> to vector<8x128xf32>
    %291 = arith.addf %289, %290 : vector<8x128xf32>
    %292 = arith.negf %291 : vector<8x128xf32>
    %293 = math.exp %292 : vector<8x128xf32>
    %cst_86 = arith.constant 1.000000e+00 : f32
    %294 = vector.broadcast %cst_86 : f32 to vector<8x128xf32>
    %295 = arith.addf %294, %293 : vector<8x128xf32>
    %296 = arith.divf %294, %295 : vector<8x128xf32>
    %297 = vector.extract_strided_slice %280 {offsets = [0, 256], sizes = [8, 128], strides = [1, 1]} : vector<8x384xf32> to vector<8x128xf32>
    %298 = vector.extract_strided_slice %277 {offsets = [0, 256], sizes = [8, 128], strides = [1, 1]} : vector<8x384xf32> to vector<8x128xf32>
    %299 = arith.addf %298, %13 : vector<8x128xf32>
    %300 = arith.mulf %288, %299 : vector<8x128xf32>
    %301 = arith.addf %297, %300 : vector<8x128xf32>
    %302 = math.tanh %301 : vector<8x128xf32>
    %cst_87 = arith.constant 1.000000e+00 : f32
    %303 = vector.broadcast %cst_87 : f32 to vector<8x128xf32>
    %304 = arith.subf %303, %296 : vector<8x128xf32>
    %305 = arith.mulf %304, %302 : vector<8x128xf32>
    %306 = arith.mulf %296, %270 : vector<8x128xf32>
    %307 = arith.addf %305, %306 : vector<8x128xf32>
    %cst_88 = arith.constant dense<0.000000e+00> : vector<8x128xf32>
    %308 = tpu.matmul %307, %10, %cst_88 {dimension_numbers = #tpu.dot_dimension_numbers<[1], [0], [0], [1], [0, 0, 1, 1], [], []>} : vector<8x128xf32>, vector<128x128xf32>, vector<8x128xf32> -> vector<8x128xf32>
    %309 = arith.addf %308, %16 : vector<8x128xf32>
    %310 = arith.index_cast %c7_i32 : i32 to index
    %c0_89 = arith.constant 0 : index
    %c0_90 = arith.constant 0 : index
    %311 = vector.load %arg9[%310, %c0_89, %c0_90] : memref<8x8x128xf32, #tpu.memory_space<vmem>>, vector<1x8x128xf32>
    %312 = vector.shape_cast %311 : vector<1x8x128xf32> to vector<8x128xf32>
    %313 = vector.shape_cast %309 : vector<8x128xf32> to vector<1x8x128xf32>
    tpu.vector_store %arg9[%310, %c0_89, %c0_90], %313 {strides = array<i32>} : memref<8x8x128xf32, #tpu.memory_space<vmem>>, vector<1x8x128xf32>,
    %c8_i32 = arith.constant 8 : i32
    %c0_91 = arith.constant 0 : index
    %c0_92 = arith.constant 0 : index
    %314 = vector.load %arg10[%c0_91, %c0_92] : memref<8x128xf32, #tpu.memory_space<vmem>>, vector<8x128xf32>
    tpu.vector_store %arg10[%c0_91, %c0_92], %307 {strides = array<i32>} : memref<8x128xf32, #tpu.memory_space<vmem>>, vector<8x128xf32>,
    return
  }
  func.func @transform_0(%arg0: i32, %arg1: i32) -> (i32, i32, i32) {
    %c0_i32 = arith.constant 0 : i32
    %c0_i32_0 = arith.constant 0 : i32
    return %arg1, %arg0, %c0_i32 : i32, i32, i32
  }
  func.func @transform_1(%arg0: i32, %arg1: i32) -> (i32, i32) {
    %c0_i32 = arith.constant 0 : i32
    %c0_i32_0 = arith.constant 0 : i32
    return %arg0, %c0_i32 : i32, i32
  }
  func.func @transform_2(%arg0: i32, %arg1: i32) -> (i32, i32) {
    %c0_i32 = arith.constant 0 : i32
    %c0_i32_0 = arith.constant 0 : i32
    %c0_i32_1 = arith.constant 0 : i32
    return %c0_i32, %c0_i32_0 : i32, i32
  }
  func.func @transform_3(%arg0: i32, %arg1: i32) -> (i32, i32) {
    %c0_i32 = arith.constant 0 : i32
    %c0_i32_0 = arith.constant 0 : i32
    %c0_i32_1 = arith.constant 0 : i32
    return %c0_i32, %c0_i32_0 : i32, i32
  }
  func.func @transform_4(%arg0: i32, %arg1: i32) -> (i32, i32) {
    %c0_i32 = arith.constant 0 : i32
    %c0_i32_0 = arith.constant 0 : i32
    %c0_i32_1 = arith.constant 0 : i32
    return %c0_i32, %c0_i32_0 : i32, i32
  }
  func.func @transform_5(%arg0: i32, %arg1: i32) -> (i32, i32) {
    %c0_i32 = arith.constant 0 : i32
    %c0_i32_0 = arith.constant 0 : i32
    %c0_i32_1 = arith.constant 0 : i32
    return %c0_i32, %c0_i32_0 : i32, i32
  }
  func.func @transform_6(%arg0: i32, %arg1: i32) -> (i32, i32) {
    %c0_i32 = arith.constant 0 : i32
    %c0_i32_0 = arith.constant 0 : i32
    %c0_i32_1 = arith.constant 0 : i32
    return %c0_i32, %c0_i32_0 : i32, i32
  }
  func.func @transform_7(%arg0: i32, %arg1: i32) -> (i32, i32, i32) {
    %c0_i32 = arith.constant 0 : i32
    %c0_i32_0 = arith.constant 0 : i32
    return %arg1, %arg0, %c0_i32 : i32, i32, i32
  }
  func.func @transform_8(%arg0: i32, %arg1: i32) -> (i32, i32) {
    %c0_i32 = arith.constant 0 : i32
    %c0_i32_0 = arith.constant 0 : i32
    return %arg0, %c0_i32 : i32, i32
  }
}

module attributes {stable_mosaic.version = 11 : i64} {
  func.func @_gru_fc_kernel(%arg0: i32, %arg1: i32, %arg2: memref<8x8x128xf32, #tpu.memory_space<vmem>>, %arg3: memref<8x128xf32, #tpu.memory_space<vmem>>, %arg4: memref<128x384xf32, #tpu.memory_space<vmem>>, %arg5: memref<128x384xf32, #tpu.memory_space<vmem>>, %arg6: memref<1x128xf32, #tpu.memory_space<vmem>>, %arg7: memref<128x128xf32, #tpu.memory_space<vmem>>, %arg8: memref<1x128xf32, #tpu.memory_space<vmem>>, %arg9: memref<8x8x128xf32, #tpu.memory_space<vmem>>, %arg10: memref<8x128xf32, #tpu.memory_space<vmem>>, %arg11: memref<8x8x384xf32, #tpu.memory_space<vmem>>) attributes {dimension_semantics = [#tpu.dimension_semantics<parallel>, #tpu.dimension_semantics<arbitrary>], iteration_bounds = array<i64: 1, 1>, scalar_prefetch = 0 : i64, scratch_operands = 1 : i64, tpu.core_type = #tpu.core_type<tc>, window_params = [{transform_indices = @transform_0, window_bounds = array<i64: 8, 8, 128>}, {transform_indices = @transform_1, window_bounds = array<i64: 8, 128>}, {pipeline_mode = #tpu.pipeline_mode<synchronous>, transform_indices = @transform_2, window_bounds = array<i64: 128, 384>}, {pipeline_mode = #tpu.pipeline_mode<synchronous>, transform_indices = @transform_3, window_bounds = array<i64: 128, 384>}, {pipeline_mode = #tpu.pipeline_mode<synchronous>, transform_indices = @transform_4, window_bounds = array<i64: 1, 128>}, {pipeline_mode = #tpu.pipeline_mode<synchronous>, transform_indices = @transform_5, window_bounds = array<i64: 128, 128>}, {pipeline_mode = #tpu.pipeline_mode<synchronous>, transform_indices = @transform_6, window_bounds = array<i64: 1, 128>}, {transform_indices = @transform_7, window_bounds = array<i64: 8, 8, 128>}, {transform_indices = @transform_8, window_bounds = array<i64: 8, 128>}]} {
    %c0_i32 = arith.constant 0 : i32
    %0 = arith.cmpi eq, %arg1, %c0_i32 : i32
    %1 = arith.extui %0 : i1 to i32
    %c0_i32_0 = arith.constant 0 : i32
    %2 = arith.cmpi ne, %1, %c0_i32_0 : i32
    scf.if %2 {
      %c0_93 = arith.constant 0 : index
      %c0_94 = arith.constant 0 : index
      %315 = vector.load %arg3[%c0_93, %c0_94] : memref<8x128xf32, #tpu.memory_space<vmem>>, vector<8x128xf32>
      %c0_95 = arith.constant 0 : index
      %c0_96 = arith.constant 0 : index
      %316 = vector.load %arg10[%c0_95, %c0_96] : memref<8x128xf32, #tpu.memory_space<vmem>>, vector<8x128xf32>
      tpu.vector_store %arg10[%c0_95, %c0_96], %315 {strides = array<i32>} : memref<8x128xf32, #tpu.memory_space<vmem>>, vector<8x128xf32>,
    } else {
    }
    %c0 = arith.constant 0 : index
    %c0_1 = arith.constant 0 : index
    %c0_2 = arith.constant 0 : index
    %3 = vector.load %arg2[%c0, %c0_1, %c0_2] : memref<8x8x128xf32, #tpu.memory_space<vmem>>, vector<8x8x128xf32>
    %4 = vector.shape_cast %3 : vector<8x8x128xf32> to vector<64x128xf32>
    %c0_3 = arith.constant 0 : index
    %c0_4 = arith.constant 0 : index
    %5 = vector.load %arg4[%c0_3, %c0_4] : memref<128x384xf32, #tpu.memory_space<vmem>>, vector<128x384xf32>
    %cst = arith.constant dense<0.000000e+00> : vector<64x384xf32>
    %6 = tpu.matmul %4, %5, %cst {dimension_numbers = #tpu.dot_dimension_numbers<[1], [0], [0], [1], [0, 0, 1, 1], [], []>} : vector<64x128xf32>, vector<128x384xf32>, vector<64x384xf32> -> vector<64x384xf32>
    %7 = vector.shape_cast %6 : vector<64x384xf32> to vector<8x8x384xf32>
    %c0_5 = arith.constant 0 : index
    %c0_6 = arith.constant 0 : index
    %c0_7 = arith.constant 0 : index
    %8 = vector.load %arg11[%c0_5, %c0_6, %c0_7] : memref<8x8x384xf32, #tpu.memory_space<vmem>>, vector<8x8x384xf32>
    tpu.vector_store %arg11[%c0_5, %c0_6, %c0_7], %7 {strides = array<i32>} : memref<8x8x384xf32, #tpu.memory_space<vmem>>, vector<8x8x384xf32>,
    %c0_8 = arith.constant 0 : index
    %c0_9 = arith.constant 0 : index
    %9 = vector.load %arg5[%c0_8, %c0_9] : memref<128x384xf32, #tpu.memory_space<vmem>>, vector<128x384xf32>
    %c0_10 = arith.constant 0 : index
    %c0_11 = arith.constant 0 : index
    %10 = vector.load %arg7[%c0_10, %c0_11] : memref<128x128xf32, #tpu.memory_space<vmem>>, vector<128x128xf32>
    %c0_12 = arith.constant 0 : index
    %c0_13 = arith.constant 0 : index
    %11 = vector.load %arg6[%c0_12, %c0_13] : memref<1x128xf32, #tpu.memory_space<vmem>>, vector<1x128xf32>
    %12 = vector.shape_cast %11 : vector<1x128xf32> to vector<1x128xf32>
    %13 = vector.broadcast %12 : vector<1x128xf32> to vector<8x128xf32>
    %c0_14 = arith.constant 0 : index
    %c0_15 = arith.constant 0 : index
    %14 = vector.load %arg8[%c0_14, %c0_15] : memref<1x128xf32, #tpu.memory_space<vmem>>, vector<1x128xf32>
    %15 = vector.shape_cast %14 : vector<1x128xf32> to vector<1x128xf32>
    %16 = vector.broadcast %15 : vector<1x128xf32> to vector<8x128xf32>
    %c0_16 = arith.constant 0 : index
    %c0_17 = arith.constant 0 : index
    %17 = vector.load %arg10[%c0_16, %c0_17] : memref<8x128xf32, #tpu.memory_space<vmem>>, vector<8x128xf32>
    %c0_i32_18 = arith.constant 0 : i32
    %cst_19 = arith.constant dense<0.000000e+00> : vector<8x384xf32>
    %18 = tpu.matmul %17, %9, %cst_19 {dimension_numbers = #tpu.dot_dimension_numbers<[1], [0], [0], [1], [0, 0, 1, 1], [], []>} : vector<8x128xf32>, vector<128x384xf32>, vector<8x384xf32> -> vector<8x384xf32>
    %19 = arith.index_cast %c0_i32_18 : i32 to index
    %c0_20 = arith.constant 0 : index
    %c0_21 = arith.constant 0 : index
    %20 = vector.load %arg11[%19, %c0_20, %c0_21] : memref<8x8x384xf32, #tpu.memory_space<vmem>>, vector<1x8x384xf32>
    %21 = vector.shape_cast %20 : vector<1x8x384xf32> to vector<8x384xf32>
    %22 = vector.extract_strided_slice %21 {offsets = [0, 0], sizes = [8, 128], strides = [1, 1]} : vector<8x384xf32> to vector<8x128xf32>
    %23 = vector.extract_strided_slice %18 {offsets = [0, 0], sizes = [8, 128], strides = [1, 1]} : vector<8x384xf32> to vector<8x128xf32>
    %24 = arith.addf %22, %23 : vector<8x128xf32>
    %25 = arith.negf %24 : vector<8x128xf32>
    %26 = math.exp %25 : vector<8x128xf32>
    %cst_22 = arith.constant 1.000000e+00 : f32
    %27 = vector.broadcast %cst_22 : f32 to vector<8x128xf32>
    %28 = arith.addf %27, %26 : vector<8x128xf32>
    %29 = arith.divf %27, %28 : vector<8x128xf32>
    %30 = vector.extract_strided_slice %21 {offsets = [0, 128], sizes = [8, 128], strides = [1, 1]} : vector<8x384xf32> to vector<8x128xf32>
    %31 = vector.extract_strided_slice %18 {offsets = [0, 128], sizes = [8, 128], strides = [1, 1]} : vector<8x384xf32> to vector<8x128xf32>
    %32 = arith.addf %30, %31 : vector<8x128xf32>
    %33 = arith.negf %32 : vector<8x128xf32>
    %34 = math.exp %33 : vector<8x128xf32>
    %cst_23 = arith.constant 1.000000e+00 : f32
    %35 = vector.broadcast %cst_23 : f32 to vector<8x128xf32>
    %36 = arith.addf %35, %34 : vector<8x128xf32>
    %37 = arith.divf %35, %36 : vector<8x128xf32>
    %38 = vector.extract_strided_slice %21 {offsets = [0, 256], sizes = [8, 128], strides = [1, 1]} : vector<8x384xf32> to vector<8x128xf32>
    %39 = vector.extract_strided_slice %18 {offsets = [0, 256], sizes = [8, 128], strides = [1, 1]} : vector<8x384xf32> to vector<8x128xf32>
    %40 = arith.addf %39, %13 : vector<8x128xf32>
    %41 = arith.mulf %29, %40 : vector<8x128xf32>
    %42 = arith.addf %38, %41 : vector<8x128xf32>
    %43 = math.tanh %42 : vector<8x128xf32>
    %cst_24 = arith.constant 1.000000e+00 : f32
    %44 = vector.broadcast %cst_24 : f32 to vector<8x128xf32>
    %45 = arith.subf %44, %37 : vector<8x128xf32>
    %46 = arith.mulf %45, %43 : vector<8x128xf32>
    %47 = arith.mulf %37, %17 : vector<8x128xf32>
    %48 = arith.addf %46, %47 : vector<8x128xf32>
    %cst_25 = arith.constant dense<0.000000e+00> : vector<8x128xf32>
    %49 = tpu.matmul %48, %10, %cst_25 {dimension_numbers = #tpu.dot_dimension_numbers<[1], [0], [0], [1], [0, 0, 1, 1], [], []>} : vector<8x128xf32>, vector<128x128xf32>, vector<8x128xf32> -> vector<8x128xf32>
    %50 = arith.addf %49, %16 : vector<8x128xf32>
    %51 = arith.index_cast %c0_i32_18 : i32 to index
    %c0_26 = arith.constant 0 : index
    %c0_27 = arith.constant 0 : index
    %52 = vector.load %arg9[%51, %c0_26, %c0_27] : memref<8x8x128xf32, #tpu.memory_space<vmem>>, vector<1x8x128xf32>
    %53 = vector.shape_cast %52 : vector<1x8x128xf32> to vector<8x128xf32>
    %54 = vector.shape_cast %50 : vector<8x128xf32> to vector<1x8x128xf32>
    tpu.vector_store %arg9[%51, %c0_26, %c0_27], %54 {strides = array<i32>} : memref<8x8x128xf32, #tpu.memory_space<vmem>>, vector<1x8x128xf32>,
    %c1_i32 = arith.constant 1 : i32
    %cst_28 = arith.constant dense<0.000000e+00> : vector<8x384xf32>
    %55 = tpu.matmul %48, %9, %cst_28 {dimension_numbers = #tpu.dot_dimension_numbers<[1], [0], [0], [1], [0, 0, 1, 1], [], []>} : vector<8x128xf32>, vector<128x384xf32>, vector<8x384xf32> -> vector<8x384xf32>
    %56 = arith.index_cast %c1_i32 : i32 to index
    %c0_29 = arith.constant 0 : index
    %c0_30 = arith.constant 0 : index
    %57 = vector.load %arg11[%56, %c0_29, %c0_30] : memref<8x8x384xf32, #tpu.memory_space<vmem>>, vector<1x8x384xf32>
    %58 = vector.shape_cast %57 : vector<1x8x384xf32> to vector<8x384xf32>
    %59 = vector.extract_strided_slice %58 {offsets = [0, 0], sizes = [8, 128], strides = [1, 1]} : vector<8x384xf32> to vector<8x128xf32>
    %60 = vector.extract_strided_slice %55 {offsets = [0, 0], sizes = [8, 128], strides = [1, 1]} : vector<8x384xf32> to vector<8x128xf32>
    %61 = arith.addf %59, %60 : vector<8x128xf32>
    %62 = arith.negf %61 : vector<8x128xf32>
    %63 = math.exp %62 : vector<8x128xf32>
    %cst_31 = arith.constant 1.000000e+00 : f32
    %64 = vector.broadcast %cst_31 : f32 to vector<8x128xf32>
    %65 = arith.addf %64, %63 : vector<8x128xf32>
    %66 = arith.divf %64, %65 : vector<8x128xf32>
    %67 = vector.extract_strided_slice %58 {offsets = [0, 128], sizes = [8, 128], strides = [1, 1]} : vector<8x384xf32> to vector<8x128xf32>
    %68 = vector.extract_strided_slice %55 {offsets = [0, 128], sizes = [8, 128], strides = [1, 1]} : vector<8x384xf32> to vector<8x128xf32>
    %69 = arith.addf %67, %68 : vector<8x128xf32>
    %70 = arith.negf %69 : vector<8x128xf32>
    %71 = math.exp %70 : vector<8x128xf32>
    %cst_32 = arith.constant 1.000000e+00 : f32
    %72 = vector.broadcast %cst_32 : f32 to vector<8x128xf32>
    %73 = arith.addf %72, %71 : vector<8x128xf32>
    %74 = arith.divf %72, %73 : vector<8x128xf32>
    %75 = vector.extract_strided_slice %58 {offsets = [0, 256], sizes = [8, 128], strides = [1, 1]} : vector<8x384xf32> to vector<8x128xf32>
    %76 = vector.extract_strided_slice %55 {offsets = [0, 256], sizes = [8, 128], strides = [1, 1]} : vector<8x384xf32> to vector<8x128xf32>
    %77 = arith.addf %76, %13 : vector<8x128xf32>
    %78 = arith.mulf %66, %77 : vector<8x128xf32>
    %79 = arith.addf %75, %78 : vector<8x128xf32>
    %80 = math.tanh %79 : vector<8x128xf32>
    %cst_33 = arith.constant 1.000000e+00 : f32
    %81 = vector.broadcast %cst_33 : f32 to vector<8x128xf32>
    %82 = arith.subf %81, %74 : vector<8x128xf32>
    %83 = arith.mulf %82, %80 : vector<8x128xf32>
    %84 = arith.mulf %74, %48 : vector<8x128xf32>
    %85 = arith.addf %83, %84 : vector<8x128xf32>
    %cst_34 = arith.constant dense<0.000000e+00> : vector<8x128xf32>
    %86 = tpu.matmul %85, %10, %cst_34 {dimension_numbers = #tpu.dot_dimension_numbers<[1], [0], [0], [1], [0, 0, 1, 1], [], []>} : vector<8x128xf32>, vector<128x128xf32>, vector<8x128xf32> -> vector<8x128xf32>
    %87 = arith.addf %86, %16 : vector<8x128xf32>
    %88 = arith.index_cast %c1_i32 : i32 to index
    %c0_35 = arith.constant 0 : index
    %c0_36 = arith.constant 0 : index
    %89 = vector.load %arg9[%88, %c0_35, %c0_36] : memref<8x8x128xf32, #tpu.memory_space<vmem>>, vector<1x8x128xf32>
    %90 = vector.shape_cast %89 : vector<1x8x128xf32> to vector<8x128xf32>
    %91 = vector.shape_cast %87 : vector<8x128xf32> to vector<1x8x128xf32>
    tpu.vector_store %arg9[%88, %c0_35, %c0_36], %91 {strides = array<i32>} : memref<8x8x128xf32, #tpu.memory_space<vmem>>, vector<1x8x128xf32>,
    %c2_i32 = arith.constant 2 : i32
    %cst_37 = arith.constant dense<0.000000e+00> : vector<8x384xf32>
    %92 = tpu.matmul %85, %9, %cst_37 {dimension_numbers = #tpu.dot_dimension_numbers<[1], [0], [0], [1], [0, 0, 1, 1], [], []>} : vector<8x128xf32>, vector<128x384xf32>, vector<8x384xf32> -> vector<8x384xf32>
    %93 = arith.index_cast %c2_i32 : i32 to index
    %c0_38 = arith.constant 0 : index
    %c0_39 = arith.constant 0 : index
    %94 = vector.load %arg11[%93, %c0_38, %c0_39] : memref<8x8x384xf32, #tpu.memory_space<vmem>>, vector<1x8x384xf32>
    %95 = vector.shape_cast %94 : vector<1x8x384xf32> to vector<8x384xf32>
    %96 = vector.extract_strided_slice %95 {offsets = [0, 0], sizes = [8, 128], strides = [1, 1]} : vector<8x384xf32> to vector<8x128xf32>
    %97 = vector.extract_strided_slice %92 {offsets = [0, 0], sizes = [8, 128], strides = [1, 1]} : vector<8x384xf32> to vector<8x128xf32>
    %98 = arith.addf %96, %97 : vector<8x128xf32>
    %99 = arith.negf %98 : vector<8x128xf32>
    %100 = math.exp %99 : vector<8x128xf32>
    %cst_40 = arith.constant 1.000000e+00 : f32
    %101 = vector.broadcast %cst_40 : f32 to vector<8x128xf32>
    %102 = arith.addf %101, %100 : vector<8x128xf32>
    %103 = arith.divf %101, %102 : vector<8x128xf32>
    %104 = vector.extract_strided_slice %95 {offsets = [0, 128], sizes = [8, 128], strides = [1, 1]} : vector<8x384xf32> to vector<8x128xf32>
    %105 = vector.extract_strided_slice %92 {offsets = [0, 128], sizes = [8, 128], strides = [1, 1]} : vector<8x384xf32> to vector<8x128xf32>
    %106 = arith.addf %104, %105 : vector<8x128xf32>
    %107 = arith.negf %106 : vector<8x128xf32>
    %108 = math.exp %107 : vector<8x128xf32>
    %cst_41 = arith.constant 1.000000e+00 : f32
    %109 = vector.broadcast %cst_41 : f32 to vector<8x128xf32>
    %110 = arith.addf %109, %108 : vector<8x128xf32>
    %111 = arith.divf %109, %110 : vector<8x128xf32>
    %112 = vector.extract_strided_slice %95 {offsets = [0, 256], sizes = [8, 128], strides = [1, 1]} : vector<8x384xf32> to vector<8x128xf32>
    %113 = vector.extract_strided_slice %92 {offsets = [0, 256], sizes = [8, 128], strides = [1, 1]} : vector<8x384xf32> to vector<8x128xf32>
    %114 = arith.addf %113, %13 : vector<8x128xf32>
    %115 = arith.mulf %103, %114 : vector<8x128xf32>
    %116 = arith.addf %112, %115 : vector<8x128xf32>
    %117 = math.tanh %116 : vector<8x128xf32>
    %cst_42 = arith.constant 1.000000e+00 : f32
    %118 = vector.broadcast %cst_42 : f32 to vector<8x128xf32>
    %119 = arith.subf %118, %111 : vector<8x128xf32>
    %120 = arith.mulf %119, %117 : vector<8x128xf32>
    %121 = arith.mulf %111, %85 : vector<8x128xf32>
    %122 = arith.addf %120, %121 : vector<8x128xf32>
    %cst_43 = arith.constant dense<0.000000e+00> : vector<8x128xf32>
    %123 = tpu.matmul %122, %10, %cst_43 {dimension_numbers = #tpu.dot_dimension_numbers<[1], [0], [0], [1], [0, 0, 1, 1], [], []>} : vector<8x128xf32>, vector<128x128xf32>, vector<8x128xf32> -> vector<8x128xf32>
    %124 = arith.addf %123, %16 : vector<8x128xf32>
    %125 = arith.index_cast %c2_i32 : i32 to index
    %c0_44 = arith.constant 0 : index
    %c0_45 = arith.constant 0 : index
    %126 = vector.load %arg9[%125, %c0_44, %c0_45] : memref<8x8x128xf32, #tpu.memory_space<vmem>>, vector<1x8x128xf32>
    %127 = vector.shape_cast %126 : vector<1x8x128xf32> to vector<8x128xf32>
    %128 = vector.shape_cast %124 : vector<8x128xf32> to vector<1x8x128xf32>
    tpu.vector_store %arg9[%125, %c0_44, %c0_45], %128 {strides = array<i32>} : memref<8x8x128xf32, #tpu.memory_space<vmem>>, vector<1x8x128xf32>,
    %c3_i32 = arith.constant 3 : i32
    %cst_46 = arith.constant dense<0.000000e+00> : vector<8x384xf32>
    %129 = tpu.matmul %122, %9, %cst_46 {dimension_numbers = #tpu.dot_dimension_numbers<[1], [0], [0], [1], [0, 0, 1, 1], [], []>} : vector<8x128xf32>, vector<128x384xf32>, vector<8x384xf32> -> vector<8x384xf32>
    %130 = arith.index_cast %c3_i32 : i32 to index
    %c0_47 = arith.constant 0 : index
    %c0_48 = arith.constant 0 : index
    %131 = vector.load %arg11[%130, %c0_47, %c0_48] : memref<8x8x384xf32, #tpu.memory_space<vmem>>, vector<1x8x384xf32>
    %132 = vector.shape_cast %131 : vector<1x8x384xf32> to vector<8x384xf32>
    %133 = vector.extract_strided_slice %132 {offsets = [0, 0], sizes = [8, 128], strides = [1, 1]} : vector<8x384xf32> to vector<8x128xf32>
    %134 = vector.extract_strided_slice %129 {offsets = [0, 0], sizes = [8, 128], strides = [1, 1]} : vector<8x384xf32> to vector<8x128xf32>
    %135 = arith.addf %133, %134 : vector<8x128xf32>
    %136 = arith.negf %135 : vector<8x128xf32>
    %137 = math.exp %136 : vector<8x128xf32>
    %cst_49 = arith.constant 1.000000e+00 : f32
    %138 = vector.broadcast %cst_49 : f32 to vector<8x128xf32>
    %139 = arith.addf %138, %137 : vector<8x128xf32>
    %140 = arith.divf %138, %139 : vector<8x128xf32>
    %141 = vector.extract_strided_slice %132 {offsets = [0, 128], sizes = [8, 128], strides = [1, 1]} : vector<8x384xf32> to vector<8x128xf32>
    %142 = vector.extract_strided_slice %129 {offsets = [0, 128], sizes = [8, 128], strides = [1, 1]} : vector<8x384xf32> to vector<8x128xf32>
    %143 = arith.addf %141, %142 : vector<8x128xf32>
    %144 = arith.negf %143 : vector<8x128xf32>
    %145 = math.exp %144 : vector<8x128xf32>
    %cst_50 = arith.constant 1.000000e+00 : f32
    %146 = vector.broadcast %cst_50 : f32 to vector<8x128xf32>
    %147 = arith.addf %146, %145 : vector<8x128xf32>
    %148 = arith.divf %146, %147 : vector<8x128xf32>
    %149 = vector.extract_strided_slice %132 {offsets = [0, 256], sizes = [8, 128], strides = [1, 1]} : vector<8x384xf32> to vector<8x128xf32>
    %150 = vector.extract_strided_slice %129 {offsets = [0, 256], sizes = [8, 128], strides = [1, 1]} : vector<8x384xf32> to vector<8x128xf32>
    %151 = arith.addf %150, %13 : vector<8x128xf32>
    %152 = arith.mulf %140, %151 : vector<8x128xf32>
    %153 = arith.addf %149, %152 : vector<8x128xf32>
    %154 = math.tanh %153 : vector<8x128xf32>
    %cst_51 = arith.constant 1.000000e+00 : f32
    %155 = vector.broadcast %cst_51 : f32 to vector<8x128xf32>
    %156 = arith.subf %155, %148 : vector<8x128xf32>
    %157 = arith.mulf %156, %154 : vector<8x128xf32>
    %158 = arith.mulf %148, %122 : vector<8x128xf32>
    %159 = arith.addf %157, %158 : vector<8x128xf32>
    %cst_52 = arith.constant dense<0.000000e+00> : vector<8x128xf32>
    %160 = tpu.matmul %159, %10, %cst_52 {dimension_numbers = #tpu.dot_dimension_numbers<[1], [0], [0], [1], [0, 0, 1, 1], [], []>} : vector<8x128xf32>, vector<128x128xf32>, vector<8x128xf32> -> vector<8x128xf32>
    %161 = arith.addf %160, %16 : vector<8x128xf32>
    %162 = arith.index_cast %c3_i32 : i32 to index
    %c0_53 = arith.constant 0 : index
    %c0_54 = arith.constant 0 : index
    %163 = vector.load %arg9[%162, %c0_53, %c0_54] : memref<8x8x128xf32, #tpu.memory_space<vmem>>, vector<1x8x128xf32>
    %164 = vector.shape_cast %163 : vector<1x8x128xf32> to vector<8x128xf32>
    %165 = vector.shape_cast %161 : vector<8x128xf32> to vector<1x8x128xf32>
    tpu.vector_store %arg9[%162, %c0_53, %c0_54], %165 {strides = array<i32>} : memref<8x8x128xf32, #tpu.memory_space<vmem>>, vector<1x8x128xf32>,
    %c4_i32 = arith.constant 4 : i32
    %cst_55 = arith.constant dense<0.000000e+00> : vector<8x384xf32>
    %166 = tpu.matmul %159, %9, %cst_55 {dimension_numbers = #tpu.dot_dimension_numbers<[1], [0], [0], [1], [0, 0, 1, 1], [], []>} : vector<8x128xf32>, vector<128x384xf32>, vector<8x384xf32> -> vector<8x384xf32>
    %167 = arith.index_cast %c4_i32 : i32 to index
    %c0_56 = arith.constant 0 : index
    %c0_57 = arith.constant 0 : index
    %168 = vector.load %arg11[%167, %c0_56, %c0_57] : memref<8x8x384xf32, #tpu.memory_space<vmem>>, vector<1x8x384xf32>
    %169 = vector.shape_cast %168 : vector<1x8x384xf32> to vector<8x384xf32>
    %170 = vector.extract_strided_slice %169 {offsets = [0, 0], sizes = [8, 128], strides = [1, 1]} : vector<8x384xf32> to vector<8x128xf32>
    %171 = vector.extract_strided_slice %166 {offsets = [0, 0], sizes = [8, 128], strides = [1, 1]} : vector<8x384xf32> to vector<8x128xf32>
    %172 = arith.addf %170, %171 : vector<8x128xf32>
    %173 = arith.negf %172 : vector<8x128xf32>
    %174 = math.exp %173 : vector<8x128xf32>
    %cst_58 = arith.constant 1.000000e+00 : f32
    %175 = vector.broadcast %cst_58 : f32 to vector<8x128xf32>
    %176 = arith.addf %175, %174 : vector<8x128xf32>
    %177 = arith.divf %175, %176 : vector<8x128xf32>
    %178 = vector.extract_strided_slice %169 {offsets = [0, 128], sizes = [8, 128], strides = [1, 1]} : vector<8x384xf32> to vector<8x128xf32>
    %179 = vector.extract_strided_slice %166 {offsets = [0, 128], sizes = [8, 128], strides = [1, 1]} : vector<8x384xf32> to vector<8x128xf32>
    %180 = arith.addf %178, %179 : vector<8x128xf32>
    %181 = arith.negf %180 : vector<8x128xf32>
    %182 = math.exp %181 : vector<8x128xf32>
    %cst_59 = arith.constant 1.000000e+00 : f32
    %183 = vector.broadcast %cst_59 : f32 to vector<8x128xf32>
    %184 = arith.addf %183, %182 : vector<8x128xf32>
    %185 = arith.divf %183, %184 : vector<8x128xf32>
    %186 = vector.extract_strided_slice %169 {offsets = [0, 256], sizes = [8, 128], strides = [1, 1]} : vector<8x384xf32> to vector<8x128xf32>
    %187 = vector.extract_strided_slice %166 {offsets = [0, 256], sizes = [8, 128], strides = [1, 1]} : vector<8x384xf32> to vector<8x128xf32>
    %188 = arith.addf %187, %13 : vector<8x128xf32>
    %189 = arith.mulf %177, %188 : vector<8x128xf32>
    %190 = arith.addf %186, %189 : vector<8x128xf32>
    %191 = math.tanh %190 : vector<8x128xf32>
    %cst_60 = arith.constant 1.000000e+00 : f32
    %192 = vector.broadcast %cst_60 : f32 to vector<8x128xf32>
    %193 = arith.subf %192, %185 : vector<8x128xf32>
    %194 = arith.mulf %193, %191 : vector<8x128xf32>
    %195 = arith.mulf %185, %159 : vector<8x128xf32>
    %196 = arith.addf %194, %195 : vector<8x128xf32>
    %cst_61 = arith.constant dense<0.000000e+00> : vector<8x128xf32>
    %197 = tpu.matmul %196, %10, %cst_61 {dimension_numbers = #tpu.dot_dimension_numbers<[1], [0], [0], [1], [0, 0, 1, 1], [], []>} : vector<8x128xf32>, vector<128x128xf32>, vector<8x128xf32> -> vector<8x128xf32>
    %198 = arith.addf %197, %16 : vector<8x128xf32>
    %199 = arith.index_cast %c4_i32 : i32 to index
    %c0_62 = arith.constant 0 : index
    %c0_63 = arith.constant 0 : index
    %200 = vector.load %arg9[%199, %c0_62, %c0_63] : memref<8x8x128xf32, #tpu.memory_space<vmem>>, vector<1x8x128xf32>
    %201 = vector.shape_cast %200 : vector<1x8x128xf32> to vector<8x128xf32>
    %202 = vector.shape_cast %198 : vector<8x128xf32> to vector<1x8x128xf32>
    tpu.vector_store %arg9[%199, %c0_62, %c0_63], %202 {strides = array<i32>} : memref<8x8x128xf32, #tpu.memory_space<vmem>>, vector<1x8x128xf32>,
    %c5_i32 = arith.constant 5 : i32
    %cst_64 = arith.constant dense<0.000000e+00> : vector<8x384xf32>
    %203 = tpu.matmul %196, %9, %cst_64 {dimension_numbers = #tpu.dot_dimension_numbers<[1], [0], [0], [1], [0, 0, 1, 1], [], []>} : vector<8x128xf32>, vector<128x384xf32>, vector<8x384xf32> -> vector<8x384xf32>
    %204 = arith.index_cast %c5_i32 : i32 to index
    %c0_65 = arith.constant 0 : index
    %c0_66 = arith.constant 0 : index
    %205 = vector.load %arg11[%204, %c0_65, %c0_66] : memref<8x8x384xf32, #tpu.memory_space<vmem>>, vector<1x8x384xf32>
    %206 = vector.shape_cast %205 : vector<1x8x384xf32> to vector<8x384xf32>
    %207 = vector.extract_strided_slice %206 {offsets = [0, 0], sizes = [8, 128], strides = [1, 1]} : vector<8x384xf32> to vector<8x128xf32>
    %208 = vector.extract_strided_slice %203 {offsets = [0, 0], sizes = [8, 128], strides = [1, 1]} : vector<8x384xf32> to vector<8x128xf32>
    %209 = arith.addf %207, %208 : vector<8x128xf32>
    %210 = arith.negf %209 : vector<8x128xf32>
    %211 = math.exp %210 : vector<8x128xf32>
    %cst_67 = arith.constant 1.000000e+00 : f32
    %212 = vector.broadcast %cst_67 : f32 to vector<8x128xf32>
    %213 = arith.addf %212, %211 : vector<8x128xf32>
    %214 = arith.divf %212, %213 : vector<8x128xf32>
    %215 = vector.extract_strided_slice %206 {offsets = [0, 128], sizes = [8, 128], strides = [1, 1]} : vector<8x384xf32> to vector<8x128xf32>
    %216 = vector.extract_strided_slice %203 {offsets = [0, 128], sizes = [8, 128], strides = [1, 1]} : vector<8x384xf32> to vector<8x128xf32>
    %217 = arith.addf %215, %216 : vector<8x128xf32>
    %218 = arith.negf %217 : vector<8x128xf32>
    %219 = math.exp %218 : vector<8x128xf32>
    %cst_68 = arith.constant 1.000000e+00 : f32
    %220 = vector.broadcast %cst_68 : f32 to vector<8x128xf32>
    %221 = arith.addf %220, %219 : vector<8x128xf32>
    %222 = arith.divf %220, %221 : vector<8x128xf32>
    %223 = vector.extract_strided_slice %206 {offsets = [0, 256], sizes = [8, 128], strides = [1, 1]} : vector<8x384xf32> to vector<8x128xf32>
    %224 = vector.extract_strided_slice %203 {offsets = [0, 256], sizes = [8, 128], strides = [1, 1]} : vector<8x384xf32> to vector<8x128xf32>
    %225 = arith.addf %224, %13 : vector<8x128xf32>
    %226 = arith.mulf %214, %225 : vector<8x128xf32>
    %227 = arith.addf %223, %226 : vector<8x128xf32>
    %228 = math.tanh %227 : vector<8x128xf32>
    %cst_69 = arith.constant 1.000000e+00 : f32
    %229 = vector.broadcast %cst_69 : f32 to vector<8x128xf32>
    %230 = arith.subf %229, %222 : vector<8x128xf32>
    %231 = arith.mulf %230, %228 : vector<8x128xf32>
    %232 = arith.mulf %222, %196 : vector<8x128xf32>
    %233 = arith.addf %231, %232 : vector<8x128xf32>
    %cst_70 = arith.constant dense<0.000000e+00> : vector<8x128xf32>
    %234 = tpu.matmul %233, %10, %cst_70 {dimension_numbers = #tpu.dot_dimension_numbers<[1], [0], [0], [1], [0, 0, 1, 1], [], []>} : vector<8x128xf32>, vector<128x128xf32>, vector<8x128xf32> -> vector<8x128xf32>
    %235 = arith.addf %234, %16 : vector<8x128xf32>
    %236 = arith.index_cast %c5_i32 : i32 to index
    %c0_71 = arith.constant 0 : index
    %c0_72 = arith.constant 0 : index
    %237 = vector.load %arg9[%236, %c0_71, %c0_72] : memref<8x8x128xf32, #tpu.memory_space<vmem>>, vector<1x8x128xf32>
    %238 = vector.shape_cast %237 : vector<1x8x128xf32> to vector<8x128xf32>
    %239 = vector.shape_cast %235 : vector<8x128xf32> to vector<1x8x128xf32>
    tpu.vector_store %arg9[%236, %c0_71, %c0_72], %239 {strides = array<i32>} : memref<8x8x128xf32, #tpu.memory_space<vmem>>, vector<1x8x128xf32>,
    %c6_i32 = arith.constant 6 : i32
    %cst_73 = arith.constant dense<0.000000e+00> : vector<8x384xf32>
    %240 = tpu.matmul %233, %9, %cst_73 {dimension_numbers = #tpu.dot_dimension_numbers<[1], [0], [0], [1], [0, 0, 1, 1], [], []>} : vector<8x128xf32>, vector<128x384xf32>, vector<8x384xf32> -> vector<8x384xf32>
    %241 = arith.index_cast %c6_i32 : i32 to index
    %c0_74 = arith.constant 0 : index
    %c0_75 = arith.constant 0 : index
    %242 = vector.load %arg11[%241, %c0_74, %c0_75] : memref<8x8x384xf32, #tpu.memory_space<vmem>>, vector<1x8x384xf32>
    %243 = vector.shape_cast %242 : vector<1x8x384xf32> to vector<8x384xf32>
    %244 = vector.extract_strided_slice %243 {offsets = [0, 0], sizes = [8, 128], strides = [1, 1]} : vector<8x384xf32> to vector<8x128xf32>
    %245 = vector.extract_strided_slice %240 {offsets = [0, 0], sizes = [8, 128], strides = [1, 1]} : vector<8x384xf32> to vector<8x128xf32>
    %246 = arith.addf %244, %245 : vector<8x128xf32>
    %247 = arith.negf %246 : vector<8x128xf32>
    %248 = math.exp %247 : vector<8x128xf32>
    %cst_76 = arith.constant 1.000000e+00 : f32
    %249 = vector.broadcast %cst_76 : f32 to vector<8x128xf32>
    %250 = arith.addf %249, %248 : vector<8x128xf32>
    %251 = arith.divf %249, %250 : vector<8x128xf32>
    %252 = vector.extract_strided_slice %243 {offsets = [0, 128], sizes = [8, 128], strides = [1, 1]} : vector<8x384xf32> to vector<8x128xf32>
    %253 = vector.extract_strided_slice %240 {offsets = [0, 128], sizes = [8, 128], strides = [1, 1]} : vector<8x384xf32> to vector<8x128xf32>
    %254 = arith.addf %252, %253 : vector<8x128xf32>
    %255 = arith.negf %254 : vector<8x128xf32>
    %256 = math.exp %255 : vector<8x128xf32>
    %cst_77 = arith.constant 1.000000e+00 : f32
    %257 = vector.broadcast %cst_77 : f32 to vector<8x128xf32>
    %258 = arith.addf %257, %256 : vector<8x128xf32>
    %259 = arith.divf %257, %258 : vector<8x128xf32>
    %260 = vector.extract_strided_slice %243 {offsets = [0, 256], sizes = [8, 128], strides = [1, 1]} : vector<8x384xf32> to vector<8x128xf32>
    %261 = vector.extract_strided_slice %240 {offsets = [0, 256], sizes = [8, 128], strides = [1, 1]} : vector<8x384xf32> to vector<8x128xf32>
    %262 = arith.addf %261, %13 : vector<8x128xf32>
    %263 = arith.mulf %251, %262 : vector<8x128xf32>
    %264 = arith.addf %260, %263 : vector<8x128xf32>
    %265 = math.tanh %264 : vector<8x128xf32>
    %cst_78 = arith.constant 1.000000e+00 : f32
    %266 = vector.broadcast %cst_78 : f32 to vector<8x128xf32>
    %267 = arith.subf %266, %259 : vector<8x128xf32>
    %268 = arith.mulf %267, %265 : vector<8x128xf32>
    %269 = arith.mulf %259, %233 : vector<8x128xf32>
    %270 = arith.addf %268, %269 : vector<8x128xf32>
    %cst_79 = arith.constant dense<0.000000e+00> : vector<8x128xf32>
    %271 = tpu.matmul %270, %10, %cst_79 {dimension_numbers = #tpu.dot_dimension_numbers<[1], [0], [0], [1], [0, 0, 1, 1], [], []>} : vector<8x128xf32>, vector<128x128xf32>, vector<8x128xf32> -> vector<8x128xf32>
    %272 = arith.addf %271, %16 : vector<8x128xf32>
    %273 = arith.index_cast %c6_i32 : i32 to index
    %c0_80 = arith.constant 0 : index
    %c0_81 = arith.constant 0 : index
    %274 = vector.load %arg9[%273, %c0_80, %c0_81] : memref<8x8x128xf32, #tpu.memory_space<vmem>>, vector<1x8x128xf32>
    %275 = vector.shape_cast %274 : vector<1x8x128xf32> to vector<8x128xf32>
    %276 = vector.shape_cast %272 : vector<8x128xf32> to vector<1x8x128xf32>
    tpu.vector_store %arg9[%273, %c0_80, %c0_81], %276 {strides = array<i32>} : memref<8x8x128xf32, #tpu.memory_space<vmem>>, vector<1x8x128xf32>,
    %c7_i32 = arith.constant 7 : i32
    %cst_82 = arith.constant dense<0.000000e+00> : vector<8x384xf32>
    %277 = tpu.matmul %270, %9, %cst_82 {dimension_numbers = #tpu.dot_dimension_numbers<[1], [0], [0], [1], [0, 0, 1, 1], [], []>} : vector<8x128xf32>, vector<128x384xf32>, vector<8x384xf32> -> vector<8x384xf32>
    %278 = arith.index_cast %c7_i32 : i32 to index
    %c0_83 = arith.constant 0 : index
    %c0_84 = arith.constant 0 : index
    %279 = vector.load %arg11[%278, %c0_83, %c0_84] : memref<8x8x384xf32, #tpu.memory_space<vmem>>, vector<1x8x384xf32>
    %280 = vector.shape_cast %279 : vector<1x8x384xf32> to vector<8x384xf32>
    %281 = vector.extract_strided_slice %280 {offsets = [0, 0], sizes = [8, 128], strides = [1, 1]} : vector<8x384xf32> to vector<8x128xf32>
    %282 = vector.extract_strided_slice %277 {offsets = [0, 0], sizes = [8, 128], strides = [1, 1]} : vector<8x384xf32> to vector<8x128xf32>
    %283 = arith.addf %281, %282 : vector<8x128xf32>
    %284 = arith.negf %283 : vector<8x128xf32>
    %285 = math.exp %284 : vector<8x128xf32>
    %cst_85 = arith.constant 1.000000e+00 : f32
    %286 = vector.broadcast %cst_85 : f32 to vector<8x128xf32>
    %287 = arith.addf %286, %285 : vector<8x128xf32>
    %288 = arith.divf %286, %287 : vector<8x128xf32>
    %289 = vector.extract_strided_slice %280 {offsets = [0, 128], sizes = [8, 128], strides = [1, 1]} : vector<8x384xf32> to vector<8x128xf32>
    %290 = vector.extract_strided_slice %277 {offsets = [0, 128], sizes = [8, 128], strides = [1, 1]} : vector<8x384xf32> to vector<8x128xf32>
    %291 = arith.addf %289, %290 : vector<8x128xf32>
    %292 = arith.negf %291 : vector<8x128xf32>
    %293 = math.exp %292 : vector<8x128xf32>
    %cst_86 = arith.constant 1.000000e+00 : f32
    %294 = vector.broadcast %cst_86 : f32 to vector<8x128xf32>
    %295 = arith.addf %294, %293 : vector<8x128xf32>
    %296 = arith.divf %294, %295 : vector<8x128xf32>
    %297 = vector.extract_strided_slice %280 {offsets = [0, 256], sizes = [8, 128], strides = [1, 1]} : vector<8x384xf32> to vector<8x128xf32>
    %298 = vector.extract_strided_slice %277 {offsets = [0, 256], sizes = [8, 128], strides = [1, 1]} : vector<8x384xf32> to vector<8x128xf32>
    %299 = arith.addf %298, %13 : vector<8x128xf32>
    %300 = arith.mulf %288, %299 : vector<8x128xf32>
    %301 = arith.addf %297, %300 : vector<8x128xf32>
    %302 = math.tanh %301 : vector<8x128xf32>
    %cst_87 = arith.constant 1.000000e+00 : f32
    %303 = vector.broadcast %cst_87 : f32 to vector<8x128xf32>
    %304 = arith.subf %303, %296 : vector<8x128xf32>
    %305 = arith.mulf %304, %302 : vector<8x128xf32>
    %306 = arith.mulf %296, %270 : vector<8x128xf32>
    %307 = arith.addf %305, %306 : vector<8x128xf32>
    %cst_88 = arith.constant dense<0.000000e+00> : vector<8x128xf32>
    %308 = tpu.matmul %307, %10, %cst_88 {dimension_numbers = #tpu.dot_dimension_numbers<[1], [0], [0], [1], [0, 0, 1, 1], [], []>} : vector<8x128xf32>, vector<128x128xf32>, vector<8x128xf32> -> vector<8x128xf32>
    %309 = arith.addf %308, %16 : vector<8x128xf32>
    %310 = arith.index_cast %c7_i32 : i32 to index
    %c0_89 = arith.constant 0 : index
    %c0_90 = arith.constant 0 : index
    %311 = vector.load %arg9[%310, %c0_89, %c0_90] : memref<8x8x128xf32, #tpu.memory_space<vmem>>, vector<1x8x128xf32>
    %312 = vector.shape_cast %311 : vector<1x8x128xf32> to vector<8x128xf32>
    %313 = vector.shape_cast %309 : vector<8x128xf32> to vector<1x8x128xf32>
    tpu.vector_store %arg9[%310, %c0_89, %c0_90], %313 {strides = array<i32>} : memref<8x8x128xf32, #tpu.memory_space<vmem>>, vector<1x8x128xf32>,
    %c8_i32 = arith.constant 8 : i32
    %c0_91 = arith.constant 0 : index
    %c0_92 = arith.constant 0 : index
    %314 = vector.load %arg10[%c0_91, %c0_92] : memref<8x128xf32, #tpu.memory_space<vmem>>, vector<8x128xf32>
    tpu.vector_store %arg10[%c0_91, %c0_92], %307 {strides = array<i32>} : memref<8x128xf32, #tpu.memory_space<vmem>>, vector<8x128xf32>,
    return
  }
  func.func @transform_0(%arg0: i32, %arg1: i32) -> (i32, i32, i32) {
    %c0_i32 = arith.constant 0 : i32
    %c0_i32_0 = arith.constant 0 : i32
    return %arg1, %arg0, %c0_i32 : i32, i32, i32
  }
  func.func @transform_1(%arg0: i32, %arg1: i32) -> (i32, i32) {
    %c0_i32 = arith.constant 0 : i32
    %c0_i32_0 = arith.constant 0 : i32
    return %arg0, %c0_i32 : i32, i32
  }
  func.func @transform_2(%arg0: i32, %arg1: i32) -> (i32, i32) {
    %c0_i32 = arith.constant 0 : i32
    %c0_i32_0 = arith.constant 0 : i32
    %c0_i32_1 = arith.constant 0 : i32
    return %c0_i32, %c0_i32_0 : i32, i32
  }
  func.func @transform_3(%arg0: i32, %arg1: i32) -> (i32, i32) {
    %c0_i32 = arith.constant 0 : i32
    %c0_i32_0 = arith.constant 0 : i32
    %c0_i32_1 = arith.constant 0 : i32
    return %c0_i32, %c0_i32_0 : i32, i32
  }
  func.func @transform_4(%arg0: i32, %arg1: i32) -> (i32, i32) {
    %c0_i32 = arith.constant 0 : i32
    %c0_i32_0 = arith.constant 0 : i32
    %c0_i32_1 = arith.constant 0 : i32
    return %c0_i32, %c0_i32_0 : i32, i32
  }
  func.func @transform_5(%arg0: i32, %arg1: i32) -> (i32, i32) {
    %c0_i32 = arith.constant 0 : i32
    %c0_i32_0 = arith.constant 0 : i32
    %c0_i32_1 = arith.constant 0 : i32
    return %c0_i32, %c0_i32_0 : i32, i32
  }
  func.func @transform_6(%arg0: i32, %arg1: i32) -> (i32, i32) {
    %c0_i32 = arith.constant 0 : i32
    %c0_i32_0 = arith.constant 0 : i32
    %c0_i32_1 = arith.constant 0 : i32
    return %c0_i32, %c0_i32_0 : i32, i32
  }
  func.func @transform_7(%arg0: i32, %arg1: i32) -> (i32, i32, i32) {
    %c0_i32 = arith.constant 0 : i32
    %c0_i32_0 = arith.constant 0 : i32
    return %arg1, %arg0, %c0_i32 : i32, i32, i32
  }
  func.func @transform_8(%arg0: i32, %arg1: i32) -> (i32, i32) {
    %c0_i32 = arith.constant 0 : i32
    %c0_i32_0 = arith.constant 0 : i32
    return %arg0, %c0_i32 : i32, i32
  }
}

</mosaic_0001>

<bundles_post_ra>
// kernel: tpu_custom_call.1
= control target key start
LH: loop header
LB: loop body
LE: loop exit
PB: predicated region body
PF: predicated region fallthrough
CT: control target
= control target key end

     0   :  { %14 = vsyncpa [#allocation4], 0  ;;  %s5077_s0 = inlined_call_operand.hbm [shape: f32[8,8,128], index: 0, kind: input, shape index: {}]   ;;  %s5078_s1 = inlined_call_operand.hbm [shape: f32[8,128], index: 1, kind: input, shape index: {}]   ;;  %s5079_s2 = inlined_call_operand.hbm [shape: f32[128,384], index: 2, kind: input, shape index: {}]   ;;  %s5080_s3 = inlined_call_operand.hbm [shape: f32[128,384], index: 3, kind: input, shape index: {}]   ;;  %s5081_s4 = inlined_call_operand.vmem [shape: f32[1,128], index: 4, kind: input, shape index: {}]   ;;  %s5082_s5 = inlined_call_operand.hbm [shape: f32[128,128], index: 5, kind: input, shape index: {}]   ;;  %s5083_s6 = inlined_call_operand.vmem [shape: f32[1,128], index: 6, kind: input, shape index: {}]   ;;  %s5084_s7 = inlined_call_operand.hbm [shape: f32[8,8,128], index: 7, kind: output, shape index: {0}]   ;;  %s5085_s8 = inlined_call_operand.hbm [shape: f32[8,128], index: 8, kind: output, shape index: {1}]  }
   0x1   :  { %15 = vsyncpa [#allocation7], 0 }
   0x2   :  { %16 = vsyncpa [#allocation10], 0 }
   0x3   :  { %17 = vsyncpa [#allocation5], 0 }
   0x4   :  { %18 = vsyncpa [#allocation14], 0  ;;  %s4321_s27 = smov [#allocation6]   ;;  %s4157_s9 = scalar_lea.hbm %s5078_s1, 128 }
   0x5   :  { %s37_s28 = sshll.u32 %s4321_s27, 4  ;;  %p4158_p0 = scmp.ne.s32.totalorder %s5078_s1, %s4157_s9  ;;  %s38_s28 = int_to_ptr.vmem [resolvable:$true] %s37_s28 }
   0x6   :  { %p4161_p1 = scmp.lt.u32.totalorder %s4157_s9, %s5078_s1 }
   0x8   :  { %p4163_p2 = pnand %p4161_p1, %p4158_p0 }
   0xa   :  { %4166 = shalt.err (!%p4163_p2)
}
   0xb   :  { %s4167_s14 = scalar_lea.vmem %s38_s28, 128  ;;  %p4172_p4 = scmp.lt.s32.totalorder %s38_s28, %s38_s28 }
   0xc   :  { %p4168_p3 = scmp.ne.s32.totalorder %s38_s28, %s4167_s14  ;;  %p4173_p5 = scmp.lt.s32.totalorder %s4167_s14, %s4167_s14 }
   0xe   :  { %p4174_p6 = por %p4173_p5, %p4172_p4 }
  0x10   :  { %p4175_p7 = pnand %p4174_p6, %p4168_p3 }
  0x12   :  { %4178 = shalt.err (!%p4175_p7)
}
  0x13   :  { %40 = dma.hbm_to_vmem [thread:$0]  %s5078_s1, 128, %s38_s28, [#allocation7]  }
  0x14   :  { %s4322_s17 = smov [#allocation9]   ;;  %s4323_s19 = smov [#allocation3]  }
  0x15   :  { %s58_s18 = sshll.u32 %s4322_s17, 4  ;;  %s24_s20 = sshll.u32 %s4323_s19, 4  ;;  %s59_s18 = int_to_ptr.vmem [resolvable:$true] %s58_s18  ;;  %s25_s20 = int_to_ptr.vmem [resolvable:$true] %s24_s20 }
  0x16   :  { %s4179_s23 = scalar_lea.hbm %s5080_s3, 6144 }
  0x17   :  { %p4180_p8 = scmp.ne.s32.totalorder %s5080_s3, %s4179_s23  ;;  %p4183_p9 = scmp.lt.u32.totalorder %s4179_s23, %s5080_s3 }
  0x19   :  { %p4185_p10 = pnand %p4183_p9, %p4180_p8 }
  0x1b   :  { %4188 = shalt.err (!%p4185_p10)
}
  0x1c   :  { %s4189_s1 = scalar_lea.vmem %s59_s18, 6144  ;;  %p4194_p12 = scmp.lt.s32.totalorder %s59_s18, %s59_s18 }
  0x1d   :  { %p4190_p11 = scmp.ne.s32.totalorder %s59_s18, %s4189_s1  ;;  %p4195_p13 = scmp.lt.s32.totalorder %s4189_s1, %s4189_s1 }
  0x1f   :  { %p4196_p0 = por %p4195_p13, %p4194_p12 }
  0x21   :  { %p4197_p1 = pnand %p4196_p0, %p4190_p11 }
  0x23   :  { %4200 = shalt.err (!%p4197_p1)
}
  0x24   :  { %s4324_s28 = smov 384   ;;  %s4325_s29 = smov 24  }
  0x25   :  { %64 = dma.hbm_to_vmem [thread:$0]  %s5080_s3, 6144, %s59_s18, [#allocation10], %s4324_s28, %s4324_s28, %s4325_s29  }
  0x26   :  { %s4201_s12 = scalar_lea.hbm %s5077_s0, 1024 }
  0x27   :  { %p4202_p2 = scmp.ne.s32.totalorder %s5077_s0, %s4201_s12  ;;  %p4205_p3 = scmp.lt.u32.totalorder %s4201_s12, %s5077_s0 }
  0x29   :  { %p4207_p4 = pnand %p4205_p3, %p4202_p2 }
  0x2b   :  { %4210 = shalt.err (!%p4207_p4)
}
  0x2c   :  { %s4211_s17 = scalar_lea.vmem %s25_s20, 1024  ;;  %p4216_p6 = scmp.lt.s32.totalorder %s25_s20, %s25_s20 }
  0x2d   :  { %p4212_p5 = scmp.ne.s32.totalorder %s25_s20, %s4211_s17  ;;  %p4217_p7 = scmp.lt.s32.totalorder %s4211_s17, %s4211_s17 }
  0x2f   :  { %p4218_p8 = por %p4217_p7, %p4216_p6 }
  0x31   :  { %p4219_p9 = pnand %p4218_p8, %p4212_p5 }
  0x33   :  { %4222 = shalt.err (!%p4219_p9)
}
  0x34   :  { %s4326_s3 = smov 128   ;;  %s4327_s18 = smov 8  }
  0x35   :  { %30 = dma.hbm_to_vmem [thread:$0]  %s5077_s0, 1024, %s25_s20, [#allocation4], %s4326_s3, %s4326_s3, %s4327_s18  }
  0x36   :  { %s4328_s22 = smov [#allocation8]   ;;  %s4329_s24 = smov [#allocation11]  }
  0x37   :  { %s46_s23 = sshll.u32 %s4328_s22, 4  ;;  %s72_s25 = sshll.u32 %s4329_s24, 4  ;;  %s47_s23 = int_to_ptr.vmem [resolvable:$true] %s46_s23  ;;  %s73_s25 = int_to_ptr.vmem [resolvable:$true] %s72_s25 }
  0x38   :  { %s4223_s1 = scalar_lea.hbm %s5079_s2, 6144 }
  0x39   :  { %p4224_p10 = scmp.ne.s32.totalorder %s5079_s2, %s4223_s1  ;;  %p4227_p11 = scmp.lt.u32.totalorder %s4223_s1, %s5079_s2 }
  0x3b   :  { %p4229_p12 = pnand %p4227_p11, %p4224_p10 }
  0x3d   :  { %4232 = shalt.err (!%p4229_p12)
}
  0x3e   :  { %s4233_s0 = scalar_lea.vmem %s47_s23, 6144  ;;  %p4238_p0 = scmp.lt.s32.totalorder %s47_s23, %s47_s23 }
  0x3f   :  { %p4234_p13 = scmp.ne.s32.totalorder %s47_s23, %s4233_s0  ;;  %p4239_p1 = scmp.lt.s32.totalorder %s4233_s0, %s4233_s0 }
  0x41   :  { %p4240_p2 = por %p4239_p1, %p4238_p0 }
  0x43   :  { %p4241_p3 = pnand %p4240_p2, %p4234_p13 }
  0x45   :  { %4244 = shalt.err (!%p4241_p3)
}
  0x46   :  { %52 = dma.hbm_to_vmem [thread:$0]  %s5079_s2, 6144, %s47_s23, [#allocation7], %s4324_s28, %s4324_s28, %s4325_s29  }
  0x47   :  { %s4245_s15 = scalar_lea.hbm %s5082_s5, 2048 }
  0x48   :  { %p4246_p4 = scmp.ne.s32.totalorder %s5082_s5, %s4245_s15  ;;  %p4249_p5 = scmp.lt.u32.totalorder %s4245_s15, %s5082_s5 }
  0x4a   :  { %p4251_p6 = pnand %p4249_p5, %p4246_p4 }
  0x4c   :  { %4254 = shalt.err (!%p4251_p6)
}
  0x4d   :  { %s4255_s22 = scalar_lea.vmem %s73_s25, 2048  ;;  %p4260_p8 = scmp.lt.s32.totalorder %s73_s25, %s73_s25 }
  0x4e   :  { %p4256_p7 = scmp.ne.s32.totalorder %s73_s25, %s4255_s22  ;;  %p4261_p9 = scmp.lt.s32.totalorder %s4255_s22, %s4255_s22 }
  0x50   :  { %p4262_p10 = por %p4261_p9, %p4260_p8 }
  0x52   :  { %p4263_p11 = pnand %p4262_p10, %p4256_p7 }
  0x54   :  { %4266 = shalt.err (!%p4263_p11)
}
  0x55   :  { %78 = dma.hbm_to_vmem [thread:$0]  %s5082_s5, 2048, %s73_s25, [#allocation10], %s4326_s3, %s4326_s3, %s4327_s18  }
  0x56   :  { %4311 = dma.done.wait [#allocation4], 1024  }
  0x57   :  { %4312 = vsyncadd [#allocation4], 4294966272 }
  0x58   :  { %4313 = dma.done.wait [#allocation7], 6272  }
  0x59   :  { %4314 = vsyncadd [#allocation7], 4294961024 }
  0x5a   :  { %4315 = dma.done.wait [#allocation10], 8192  }
  0x5b   :  { %4316 = vsyncadd [#allocation10], 4294959104  ;;  %v4330_v0 = vmov 0.0   ;;  %v111_v1 = vld [vmem:[#allocation8 + $0x8] sm:$0xff]  ;;  %v114_v2 = vld [vmem:[#allocation8 + $0x20] sm:$0xff]  ;;  %vm4332_vm0 = vmmov 0  }
  0x5c   :  { %222 = vmatprep.mubr.f32.mxu0 %v4330_v0  ;;  %v110_v3 = vld [vmem:[#allocation8] sm:$0xff]  ;;  %v3341_v4 = vpack.c.bf16 %v114_v2, %v111_v1  ;;  %v113_v5 = vld [vmem:[#allocation8 + $0x18] sm:$0xff]  ;;  %v120_v7 = vld [vmem:[#allocation8 + $0x50] sm:$0xff]  ;;  %s4333_s27 = smov [#allocation13]  }
  0x5d   :  { %v117_v6 = vld [vmem:[#allocation8 + $0x38] sm:$0xff]  ;;  %v3343_v8 = vpack.c.bf16 %v113_v5, %v110_v3  ;;  %v116_v10 = vld [vmem:[#allocation8 + $0x30] sm:$0xff]  ;;  %v119_v11 = vld [vmem:[#allocation8 + $0x48] sm:$0xff]  ;;  %s2408_s1 = sshll.u32 %s4333_s27, 4  ;;  %s2409_s1 = int_to_ptr.vmem [resolvable:$true] %s2408_s1 }
  0x5e   :  { %v3345_v9 = vpack.c.bf16 %v120_v7, %v117_v6  ;;  %v123_v12 = vld [vmem:[#allocation8 + $0x68] sm:$0xff]  ;;  %3342 = vmatprep.subr.bf16.mxu0 %v3341_v4  ;;  %v126_v13 = vld [vmem:[#allocation8 + $0x80] sm:$0xff]  ;;  %v3347_v14 = vpack.c.bf16 %v119_v11, %v116_v10  ;;  %v125_v17 = vld [vmem:[#allocation8 + $0x78] sm:$0xff]  ;;  %p4272_p13 = scmp.lt.s32.totalorder %s2409_s1, %s2409_s1 }
  0x5f   :  { %3344 = vmatpush1.bf16.msra.mxu0 %v3343_v8  ;;  %v3349_v15 = vpack.c.bf16 %v126_v13, %v123_v12  ;;  %v122_v16 = vld [vmem:[#allocation8 + $0x60] sm:$0xff]  ;;  %v129_v18 = vld [vmem:[#allocation8 + $0x98] sm:$0xff]  ;;  %v132_v19 = vld [vmem:[#allocation8 + $0xb0] sm:$0xff] }
  0x60   :  { %3346 = vmatprep.subr.bf16.mxu0 %v3345_v9  ;;  %v3351_v20 = vpack.c.bf16 %v125_v17, %v122_v16  ;;  %v112_v21 = vld [vmem:[#allocation8 + $0x10] sm:$0xff]  ;;  %v3353_v22 = vpack.c.bf16 %v132_v19, %v129_v18  ;;  %v131_v24 = vld [vmem:[#allocation8 + $0xa8] sm:$0xff]  ;;  %v138_v27 = vld [vmem:[#allocation8 + $0xe0] sm:$0xff] }
  0x61   :  { %v128_v23 = vld [vmem:[#allocation8 + $0x90] sm:$0xff]  ;;  %v115_v25 = vld [vmem:[#allocation8 + $0x28] sm:$0xff]  ;;  %v118_v29 = vld [vmem:[#allocation8 + $0x40] sm:$0xff] }
  0x62   :  { %v135_v26 = vld [vmem:[#allocation8 + $0xc8] sm:$0xff]  ;;  %v3373_v28 = vpack.c.bf16 %v115_v25, %v112_v21  ;;  %v121_v30 = vld [vmem:[#allocation8 + $0x58] sm:$0xff]  ;;  %v3355_v31 = vpack.c.bf16 %v131_v24, %v128_v23  ;;  %v124_v33 = vld [vmem:[#allocation8 + $0x70] sm:$0xff] }
  0x63   :  { %3348 = vmatpush1.bf16.msra.mxu0 %v3347_v14  ;;  %v3377_v32 = vpack.c.bf16 %v121_v30, %v118_v29  ;;  %v127_v34 = vld [vmem:[#allocation8 + $0x88] sm:$0xff]  ;;  %v3357_v35 = vpack.c.bf16 %v138_v27, %v135_v26  ;;  %v134_v36 = vld [vmem:[#allocation8 + $0xc0] sm:$0xff]  ;;  %v137_v37 = vld [vmem:[#allocation8 + $0xd8] sm:$0xff] }
  0x64   :  { %3350 = vmatprep.subr.bf16.mxu0 %v3349_v15  ;;  %3374 = vmatprep.subr.bf16.mxu1 %v3373_v28  ;;  %v4453_v38 = vld [vmem:[#allocation3] sm:$0xff]  ;;  %v144_v40 = vld [vmem:[#allocation8 + $0x110] sm:$0xff]  ;;  %v3381_v41 = vpack.c.bf16 %v127_v34, %v124_v33  ;;  %v130_v42 = vld [vmem:[#allocation8 + $0xa0] sm:$0xff]  ;;  %v3359_v44 = vpack.c.bf16 %v137_v37, %v134_v36 }
  0x65   :  { %3376 = vmatpush3.bf16.msra.mxu1 %v3373_v28  ;;  %v141_v39 = vld [vmem:[#allocation8 + $0xf8] sm:$0xff]  ;;  %2769 = vmatprep.mubr.f32.mxu1 %v4453_v38  ;;  %v140_v46 = vld [vmem:[#allocation8 + $0xf0] sm:$0xff]  ;;  %v143_v47 = vld [vmem:[#allocation8 + $0x108] sm:$0xff] }
  0x66   :  { %3378 = vmatprep.subr.bf16.mxu1 %v3377_v32  ;;  %v133_v43 = vld [vmem:[#allocation8 + $0xb8] sm:$0xff]  ;;  %v3361_v45 = vpack.c.bf16 %v144_v40, %v141_v39  ;;  %v147_v48 = vld [vmem:[#allocation8 + $0x128] sm:$0xff]  ;;  %v150_v49 = vld [vmem:[#allocation8 + $0x140] sm:$0xff]  ;;  %v3363_v53 = vpack.c.bf16 %v143_v47, %v140_v46  ;;  %v4331_v40 = vmov 0.0|0.0  }
  0x67   :  { %3352 = vmatpush1.bf16.msra.mxu0 %v3351_v20  ;;  %v3385_v50 = vpack.c.bf16 %v133_v43, %v130_v42  ;;  %v136_v51 = vld [vmem:[#allocation8 + $0xd0] sm:$0xff]  ;;  %v139_v52 = vld [vmem:[#allocation8 + $0xe8] sm:$0xff]  ;;  %v3365_v54 = vpack.c.bf16 %v150_v49, %v147_v48  ;;  %v146_v55 = vld [vmem:[#allocation8 + $0x120] sm:$0xff] }
  0x68   :  { %3354 = vmatprep.subr.bf16.mxu0 %v3353_v22  ;;  %v149_v56 = vld [vmem:[#allocation8 + $0x138] sm:$0xff]  ;;  %v156_v58 = vld [vmem:[#allocation8 + $0x170] sm:$0xff]  ;;  %v3389_v59 = vpack.c.bf16 %v139_v52, %v136_v51  ;;  %v142_v60 = vld [vmem:[#allocation8 + $0x100] sm:$0xff] }
  0x69   :  { %3380 = vmatpush3.bf16.msra.mxu1 %v3377_v32  ;;  %v153_v57 = vld [vmem:[#allocation8 + $0x158] sm:$0xff]  ;;  %v3367_v62 = vpack.c.bf16 %v149_v56, %v146_v55  ;;  %v152_v1 = vld [vmem:[#allocation8 + $0x150] sm:$0xff]  ;;  %v155_v2 = vld [vmem:[#allocation8 + $0x168] sm:$0xff] }
  0x6a   :  { %3382 = vmatprep.subr.bf16.mxu1 %v3381_v41  ;;  %v145_v61 = vld [vmem:[#allocation8 + $0x118] sm:$0xff]  ;;  %v3369_v63 = vpack.c.bf16 %v156_v58, %v153_v57  ;;  %v401_v3 = vld [vmem:[#allocation9 + $0x8] sm:$0xff]  ;;  %v404_v4 = vld [vmem:[#allocation9 + $0x20] sm:$0xff]  ;;  %v3371_v8 = vpack.c.bf16 %v155_v2, %v152_v1 }
  0x6b   :  { %3356 = vmatpush1.bf16.msra.mxu0 %v3355_v31  ;;  %v3393_v5 = vpack.c.bf16 %v145_v61, %v142_v60  ;;  %v148_v6 = vld [vmem:[#allocation8 + $0x130] sm:$0xff]  ;;  %v151_v7 = vld [vmem:[#allocation8 + $0x148] sm:$0xff]  ;;  %v4456_v9 = vpack.c.bf16 %v404_v4, %v401_v3  ;;  %v400_v10 = vld [vmem:[#allocation9] sm:$0xff] }
  0x6c   :  { %3358 = vmatprep.subr.bf16.mxu0 %v3357_v35  ;;  %v403_v11 = vld [vmem:[#allocation9 + $0x18] sm:$0xff]  ;;  %v410_v13 = vld [vmem:[#allocation9 + $0x50] sm:$0xff]  ;;  %v3397_v14 = vpack.c.bf16 %v151_v7, %v148_v6  ;;  %v154_v15 = vld [vmem:[#allocation8 + $0x160] sm:$0xff] }
  0x6d   :  { %3384 = vmatpush3.bf16.msra.mxu1 %v3381_v41  ;;  %v407_v12 = vld [vmem:[#allocation9 + $0x38] sm:$0xff]  ;;  %v4458_v17 = vpack.c.bf16 %v403_v11, %v400_v10  ;;  %v406_v19 = vld [vmem:[#allocation9 + $0x30] sm:$0xff]  ;;  %v409_v20 = vld [vmem:[#allocation9 + $0x48] sm:$0xff] }
  0x6e   :  { %3386 = vmatprep.subr.bf16.mxu1 %v3385_v50  ;;  %v157_v16 = vld [vmem:[#allocation8 + $0x178] sm:$0xff]  ;;  %v4461_v18 = vpack.c.bf16 %v410_v13, %v407_v12  ;;  %v413_v21 = vld [vmem:[#allocation9 + $0x68] sm:$0xff]  ;;  %v416_v22 = vld [vmem:[#allocation9 + $0x80] sm:$0xff]  ;;  %v4466_v25 = vpack.c.bf16 %v409_v20, %v406_v19 }
  0x6f   :  { %3360 = vmatpush1.bf16.msra.mxu0 %v3359_v44  ;;  %v3401_v23 = vpack.c.bf16 %v157_v16, %v154_v15  ;;  %v103_v24 = vld [vmem:[#allocation3 + $0x8] sm:$0xff]  ;;  %v4469_v26 = vpack.c.bf16 %v416_v22, %v413_v21  ;;  %v415_v28 = vld [vmem:[#allocation9 + $0x78] sm:$0xff]  ;;  %v422_v30 = vld [vmem:[#allocation9 + $0xb0] sm:$0xff] }
  0x70   :  { %3362 = vmatprep.subr.bf16.mxu0 %v3361_v45  ;;  %v412_v27 = vld [vmem:[#allocation9 + $0x60] sm:$0xff]  ;;  %v419_v29 = vld [vmem:[#allocation9 + $0x98] sm:$0xff]  ;;  %v402_v31 = vld [vmem:[#allocation9 + $0x10] sm:$0xff] }
  0x71   :  { %3388 = vmatpush3.bf16.msra.mxu1 %v3385_v50  ;;  %v405_v32 = vld [vmem:[#allocation9 + $0x28] sm:$0xff]  ;;  %v4473_v34 = vpack.c.bf16 %v415_v28, %v412_v27  ;;  %v4476_v35 = vpack.c.bf16 %v422_v30, %v419_v29  ;;  %v418_v36 = vld [vmem:[#allocation9 + $0x90] sm:$0xff]  ;;  %v428_v39 = vld [vmem:[#allocation9 + $0xe0] sm:$0xff] }
  0x72   :  { %3390 = vmatprep.subr.bf16.mxu1 %v3389_v59  ;;  %v104_v33 = vld [vmem:[#allocation3 + $0x10] sm:$0xff]  ;;  %v4479_v41 = vpack.c.bf16 %v405_v32, %v402_v31  ;;  %v408_v42 = vld [vmem:[#allocation9 + $0x40] sm:$0xff]  ;;  %v411_v43 = vld [vmem:[#allocation9 + $0x58] sm:$0xff] }
  0x73   :  { %3364 = vmatpush1.bf16.msra.mxu0 %v3363_v53  ;;  %v421_v37 = vld [vmem:[#allocation9 + $0xa8] sm:$0xff]  ;;  %v105_v44 = vld [vmem:[#allocation3 + $0x18] sm:$0xff]  ;;  %v424_v47 = vld [vmem:[#allocation9 + $0xc0] sm:$0xff]  ;;  %v4489_v51 = vpack.c.bf16 %v411_v43, %v408_v42 }
  0x74   :  { %3366 = vmatprep.subr.bf16.mxu0 %v3365_v54  ;;  %v4483_v45 = vpack.c.bf16 %v421_v37, %v418_v36  ;;  %v427_v48 = vld [vmem:[#allocation9 + $0xd8] sm:$0xff]  ;;  %v434_v50 = vld [vmem:[#allocation9 + $0x110] sm:$0xff]  ;;  %v417_v53 = vld [vmem:[#allocation9 + $0x88] sm:$0xff] }
  0x75   :  { %3392 = vmatpush3.bf16.msra.mxu1 %v3389_v59  ;;  %v431_v49 = vld [vmem:[#allocation9 + $0xf8] sm:$0xff]  ;;  %v414_v52 = vld [vmem:[#allocation9 + $0x70] sm:$0xff]  ;;  %v4494_v55 = vpack.c.bf16 %v427_v48, %v424_v47  ;;  %v433_v58 = vld [vmem:[#allocation9 + $0x108] sm:$0xff] }
  0x76   :  { %3394 = vmatprep.subr.bf16.mxu1 %v3393_v5  ;;  %v106_v54 = vld [vmem:[#allocation3 + $0x20] sm:$0xff]  ;;  %v4497_v56 = vpack.c.bf16 %v434_v50, %v431_v49  ;;  %v430_v57 = vld [vmem:[#allocation9 + $0xf0] sm:$0xff]  ;;  %v437_v59 = vld [vmem:[#allocation9 + $0x128] sm:$0xff]  ;;  %v4500_v61 = vpack.c.bf16 %v417_v53, %v414_v52 }
  0x77   :  { %3368 = vmatpush1.bf16.msra.mxu0 %v3367_v62  ;;  %v440_v60 = vld [vmem:[#allocation9 + $0x140] sm:$0xff]  ;;  %v4505_v2 = vpack.c.bf16 %v433_v58, %v430_v57  ;;  %v108_v3 = vld [vmem:[#allocation3 + $0x30] sm:$0xff]  ;;  %v439_v6 = vld [vmem:[#allocation9 + $0x138] sm:$0xff] }
  0x78   :  { %3370 = vmatprep.subr.bf16.mxu0 %v3369_v63  ;;  %v420_v62 = vld [vmem:[#allocation9 + $0xa0] sm:$0xff]  ;;  %v423_v63 = vld [vmem:[#allocation9 + $0xb8] sm:$0xff]  ;;  %v4508_v4 = vpack.c.bf16 %v440_v60, %v437_v59  ;;  %v426_v11 = vld [vmem:[#allocation9 + $0xd0] sm:$0xff] }
  0x79   :  { %3396 = vmatpush3.bf16.msra.mxu1 %v3393_v5  ;;  %v107_v1 = vld [vmem:[#allocation3 + $0x28] sm:$0xff]  ;;  %v443_v7 = vld [vmem:[#allocation9 + $0x158] sm:$0xff]  ;;  %v4511_v10 = vpack.c.bf16 %v423_v63, %v420_v62  ;;  %v429_v12 = vld [vmem:[#allocation9 + $0xe8] sm:$0xff] }
  0x7a   :  { %3398 = vmatprep.subr.bf16.mxu1 %v3397_v14  ;;  %v436_v5 = vld [vmem:[#allocation9 + $0x120] sm:$0xff]  ;;  %v442_v16 = vld [vmem:[#allocation9 + $0x150] sm:$0xff]  ;;  %v445_v19 = vld [vmem:[#allocation9 + $0x168] sm:$0xff]  ;;  %v4522_v20 = vpack.c.bf16 %v429_v12, %v426_v11 }
  0x7b   :  { %3372 = vmatpush1.bf16.msra.mxu0 %v3371_v8  ;;  %v446_v8 = vld [vmem:[#allocation9 + $0x170] sm:$0xff]  ;;  %v4516_v13 = vpack.c.bf16 %v439_v6, %v436_v5  ;;  %v432_v21 = vld [vmem:[#allocation9 + $0x100] sm:$0xff]  ;;  %v435_v22 = vld [vmem:[#allocation9 + $0x118] sm:$0xff] }
  0x7c   :  { %3406 = vmatprep.subr.bf16.mxu0 %v4456_v9  ;;  %v4519_v15 = vpack.c.bf16 %v446_v8, %v443_v7  ;;  %v438_v27 = vld [vmem:[#allocation9 + $0x130] sm:$0xff]  ;;  %v441_v28 = vld [vmem:[#allocation9 + $0x148] sm:$0xff]  ;;  %v4538_v29 = vld [vmem:[#allocation6] sm:$0xff] }
  0x7d   :  { %3400 = vmatpush3.bf16.msra.mxu1 %v3397_v14  ;;  %v109_v14 = vld [vmem:[#allocation3 + $0x38] sm:$0xff]  ;;  %v4542_v30 = vpack.c.bf16 %v441_v28, %v438_v27  ;;  %v444_v31 = vld [vmem:[#allocation9 + $0x160] sm:$0xff]  ;;  %v447_v32 = vld [vmem:[#allocation9 + $0x178] sm:$0xff] }
  0x7e   :  { %223 = vmatmul.mubr.f32.vlgmr.msra.gmra.mrb[0].mxu0 %v4453_v38  ;;  %3402 = vmatprep.subr.bf16.mxu1 %v3401_v23  ;;  %v425_v38 = vld [vmem:[#allocation9 + $0xc8] sm:$0xff]  ;;  %v448_v36 = vld [vmem:[#allocation11] sm:$0xff]  ;;  %v451_v42 = vld [vmem:[#allocation11 + $0x18] sm:$0xff] }
  0x7f   :  { %3408 = vmatpush1.bf16.msra.mxu0 %v4458_v17  ;;  %228 = vmatprep.mubr.f32.mxu0 %v4330_v0  ;;  %v4486_v46 = vpack.c.bf16 %v428_v39, %v425_v38  ;;  %v449_v37 = vld [vmem:[#allocation11 + $0x8] sm:$0xff]  ;;  %v450_v39 = vld [vmem:[#allocation11 + $0x10] sm:$0xff]  ;;  %v455_v50 = vld [vmem:[#allocation11 + $0x38] sm:$0xff] }
  0x80   :  { %3410 = vmatprep.subr.bf16.mxu0 %v4461_v18  ;;  %v4573_v38 = vpack.c.bf16 %v449_v37, %v448_v36  ;;  %v4577_v43 = vpack.c.bf16 %v451_v42, %v450_v39  ;;  %v453_v47 = vld [vmem:[#allocation11 + $0x28] sm:$0xff]  ;;  %v454_v49 = vld [vmem:[#allocation11 + $0x30] sm:$0xff]  ;;  %v456_v53 = vld [vmem:[#allocation11 + $0x40] sm:$0xff] }
  0x81   :  { %3404 = vmatpush3.bf16.msra.mxu1 %v3401_v23  ;;  %v4529_v23 = vpack.c.bf16 %v445_v19, %v442_v16  ;;  %v4585_v52 = vpack.c.bf16 %v455_v50, %v454_v49  ;;  %v458_v58 = vld [vmem:[#allocation11 + $0x50] sm:$0xff]  ;;  %v459_v59 = vld [vmem:[#allocation11 + $0x58] sm:$0xff]  ;;  %v460_v60 = vld [vmem:[#allocation11 + $0x60] sm:$0xff] }
  0x82   :  { %229 = vmatmul.mubr.f32.gmra.mrb[2].mxu0 %v103_v24  ;;  %3437 = vmatprep.subr.bf16.mxu1 %v4331_v40  ;;  %v4593_v62 = vpack.c.bf16 %v459_v59, %v458_v58  ;;  %v461_v63 = vld [vmem:[#allocation11 + $0x68] sm:$0xff]  ;;  %v463_v5 = vld [vmem:[#allocation11 + $0x78] sm:$0xff] }
  0x83   :  { %3412 = vmatpush1.bf16.msra.mxu0 %v4466_v25  ;;  %234 = vmatprep.mubr.f32.mxu0 %v4330_v0 }
  0x84   :  { %3414 = vmatprep.subr.bf16.mxu0 %v4469_v26  ;;  %2770 = vmatmul.mubr.f32.vlgmr.msra.gmra.mrb[0].mxu1 %v103_v24  ;;  %v4533_v24 = vpack.c.bf16 %v435_v22, %v432_v21 }
  0x85   :  { %3439 = vmatpush3.bf16.msra.mxu1 %v4479_v41  ;;  %2772 = vmatprep.mubr.f32.mxu1 %v104_v33 }
  0x86   :  { %235 = vmatmul.mubr.f32.gmra.mrb[4].mxu0 %v104_v33  ;;  %3440 = vmatprep.subr.bf16.mxu1 %v4331_v40  ;;  %v4549_v33 = vpack.c.bf16 %v447_v32, %v444_v31 }
  0x87   :  { %3416 = vmatpush1.bf16.msra.mxu0 %v4473_v34  ;;  %240 = vmatprep.mubr.f32.mxu0 %v4330_v0 }
  0x88   :  { %3418 = vmatprep.subr.bf16.mxu0 %v4476_v35  ;;  %2773 = vmatmul.mubr.f32.gmra.mrb[2].mxu1 %v105_v44 }
  0x89   :  { %3442 = vmatpush3.bf16.msra.mxu1 %v4489_v51  ;;  %2775 = vmatprep.mubr.f32.mxu1 %v106_v54 }
  0x8a   :  { %241 = vmatmul.mubr.f32.gmra.mrb[6].mxu0 %v105_v44  ;;  %3443 = vmatprep.subr.bf16.mxu1 %v4331_v40  ;;  %v452_v44 = vld [vmem:[#allocation11 + $0x20] sm:$0xff] }
  0x8b   :  { %3420 = vmatpush1.bf16.msra.mxu0 %v4483_v45  ;;  %246 = vmatprep.mubr.f32.mxu0 %v4330_v0  ;;  %v4580_v48 = vpack.c.bf16 %v453_v47, %v452_v44  ;;  %v4622_v44 = vld [vmem:[%s5081_s4] ss:$0 sm:$0xff] }
  0x8c   :  { %3422 = vmatprep.subr.bf16.mxu0 %v4486_v46  ;;  %2776 = vmatmul.mubr.f32.gmra.mrb[4].mxu1 %v107_v1 }
  0x8d   :  { %3445 = vmatpush3.bf16.msra.mxu1 %v4500_v61  ;;  %2778 = vmatprep.mubr.f32.mxu1 %v108_v3 }
  0x8e   :  { %247 = vmatmul.mubr.f32.gmra.mrb[8].mxu0 %v106_v54  ;;  %3446 = vmatprep.subr.bf16.mxu1 %v4331_v40  ;;  %v457_v54 = vld [vmem:[#allocation11 + $0x48] sm:$0xff] }
  0x8f   :  { %3424 = vmatpush1.bf16.msra.mxu0 %v4494_v55  ;;  %252 = vmatprep.mubr.f32.mxu0 %v4330_v0  ;;  %v4589_v57 = vpack.c.bf16 %v457_v54, %v456_v53 }
  0x90   :  { %3426 = vmatprep.subr.bf16.mxu0 %v4497_v56  ;;  %2779 = vmatmul.mubr.f32.gmra.mrb[6].mxu1 %v109_v14 }
  0x91   :  { %3448 = vmatpush3.bf16.msra.mxu1 %v4511_v10  ;;  %2813 = vmatprep.mubr.msk.f32.mxu1 %vm4332_vm0, %v4330_v0 }
  0x92   :  { %253 = vmatmul.mubr.f32.gmra.mrb[10].mxu0 %v107_v1  ;;  %3449 = vmatprep.subr.bf16.mxu1 %v4331_v40  ;;  %v4596_v1 = vpack.c.bf16 %v461_v63, %v460_v60 }
  0x93   :  { %3428 = vmatpush1.bf16.msra.mxu0 %v4505_v2  ;;  %258 = vmatprep.mubr.f32.mxu0 %v4330_v0 }
  0x94   :  { %3430 = vmatprep.subr.bf16.mxu0 %v4508_v4 }
  0x95   :  { %3451 = vmatpush3.bf16.msra.mxu1 %v4522_v20 }
  0x96   :  { %259 = vmatmul.mubr.f32.gmra.mrb[12].mxu0 %v108_v3  ;;  %3452 = vmatprep.subr.bf16.mxu1 %v4331_v40  ;;  %v462_v3 = vld [vmem:[#allocation11 + $0x70] sm:$0xff] }
  0x97   :  { %3432 = vmatpush1.bf16.msra.mxu0 %v4516_v13  ;;  %264 = vmatprep.mubr.f32.mxu0 %v4330_v0  ;;  %v4600_v6 = vpack.c.bf16 %v463_v5, %v462_v3 }
  0x98   :  { %3434 = vmatprep.subr.bf16.mxu0 %v4519_v15 }
  0x99   :  { %3454 = vmatpush3.bf16.msra.mxu1 %v4533_v24 }
  0x9a   :  { %265 = vmatmul.mubr.f32.gmra.mrb[14].mxu0 %v109_v14  ;;  %3455 = vmatprep.subr.bf16.mxu1 %v4331_v40 }
  0x9b   :  { %3436 = vmatpush1.bf16.msra.mxu0 %v4529_v23  ;;  %543 = vmatprep.mubr.f32.mxu0 %v4330_v0 }
  0x9c   :  { %3461 = vmatprep.subr.bf16.mxu0 %v4331_v40 }
  0x9d   :  { %3457 = vmatpush3.bf16.msra.mxu1 %v4542_v30 }
  0x9e   :  { %544 = vmatmul.mubr.f32.vlgmr.msra.gmra.mrb[0].mxu0 %v4538_v29  ;;  %3458 = vmatprep.subr.bf16.mxu1 %v4331_v40 }
  0x9f   :  { %2848 = vmatprep.mubr.msk.f32.mxu0 %vm4332_vm0, %v4330_v0  ;;  %3463 = vmatpush3.bf16.msra.mxu0 %v4573_v38 }
  0xa0   :  { %3464 = vmatprep.subr.bf16.mxu0 %v4331_v40 }
  0xa1   :  { %3460 = vmatpush3.bf16.msra.mxu1 %v4549_v33 }
  0xa2   :  { %3517 = vmatprep.subr.bf16.mxu1 %v4331_v40 }
  0xa3   :  { %3466 = vmatpush3.bf16.msra.mxu0 %v4577_v43 }
  0xa4   :  { %2814 = vmatmul.mubr.f32.vlgmr.msra.gmra.mrb[8].mxu1 %v4538_v29  ;;  %3467 = vmatprep.subr.bf16.mxu0 %v4331_v40 }
  0xa5   :  { %3519 = vmatpush3.bf16.msra.mxu1 %v4479_v41  ;;  %2883 = vmatprep.mubr.msk.f32.mxu1 %vm4332_vm0, %v4330_v0 }
  0xa6   :  { %3520 = vmatprep.subr.bf16.mxu1 %v4331_v40 }
  0xa7   :  { %3469 = vmatpush3.bf16.msra.mxu0 %v4580_v48 }
  0xa8   :  { %3470 = vmatprep.subr.bf16.mxu0 %v4331_v40 }
  0xa9   :  { %3522 = vmatpush3.bf16.msra.mxu1 %v4489_v51 }
  0xaa   :  { %3523 = vmatprep.subr.bf16.mxu1 %v4331_v40 }
  0xab   :  { %3472 = vmatpush3.bf16.msra.mxu0 %v4585_v52 }
  0xac   :  { %3473 = vmatprep.subr.bf16.mxu0 %v4331_v40 }
  0xad   :  { %3525 = vmatpush3.bf16.msra.mxu1 %v4500_v61 }
  0xae   :  { %3526 = vmatprep.subr.bf16.mxu1 %v4331_v40 }
  0xaf   :  { %3475 = vmatpush3.bf16.msra.mxu0 %v4589_v57 }
  0xb0   :  { %3476 = vmatprep.subr.bf16.mxu0 %v4331_v40 }
  0xb1   :  { %3528 = vmatpush3.bf16.msra.mxu1 %v4511_v10 }
  0xb2   :  { %3529 = vmatprep.subr.bf16.mxu1 %v4331_v40 }
  0xb3   :  { %3478 = vmatpush3.bf16.msra.mxu0 %v4593_v62 }
  0xb4   :  { %3479 = vmatprep.subr.bf16.mxu0 %v4331_v40 }
  0xb5   :  { %3531 = vmatpush3.bf16.msra.mxu1 %v4522_v20 }
  0xb6   :  { %3532 = vmatprep.subr.bf16.mxu1 %v4331_v40 }
  0xb7   :  { %3481 = vmatpush3.bf16.msra.mxu0 %v4596_v1 }
  0xb8   :  { %3482 = vmatprep.subr.bf16.mxu0 %v4331_v40 }
  0xb9   :  { %3534 = vmatpush3.bf16.msra.mxu1 %v4533_v24 }
  0xba   :  { %3535 = vmatprep.subr.bf16.mxu1 %v4331_v40 }
  0xbb   :  { %3484 = vmatpush3.bf16.msra.mxu0 %v4600_v6 }
  0xbc   :  { %3486 = vmatprep.subr.bf16.mxu0 %v4456_v9 }
  0xbd   :  { %3537 = vmatpush3.bf16.msra.mxu1 %v4542_v30 }
  0xbe   :  { %3538 = vmatprep.subr.bf16.mxu1 %v4331_v40 }
  0xc1   :  { %3540 = vmatpush3.bf16.msra.mxu1 %v4549_v33 }
  0xc2   :  { %3541 = vmatprep.subr.bf16.mxu1 %v4331_v40 }
 0x157   :  { %v4605_v7 = vpop.f32.mrb[0].mxu1 }
 0x158   :  { %v337_v8 = vpop.f32.mrb[1].mxu1 }
 0x15b   :  { %v4607_v11 = vpop.f32.mrb[2].mxu1 }
 0x15c   :  { %v4609_v12 = vpop.f32.mrb[3].mxu1 }
 0x15f   :  { %v4611_v14 = vpop.f32.mrb[4].mxu1 }
 0x160   :  { %v4613_v16 = vpop.f32.mrb[5].mxu1 }
 0x163   :  { %v4615_v19 = vpop.f32.mrb[6].mxu1 }
 0x164   :  { %v4617_v21 = vpop.f32.mrb[7].mxu1 }
 0x171   :  { %v545_v22 = vpop.f32.mrb[0].mxu0 }
 0x172   :  { %v2425_v27 = vmul.f32 -1.442695, %v545_v22  ;;  %v547_v28 = vpop.f32.mrb[1].mxu0 }
 0x173   :  { %v2426_v31 = vmul.f32 -1.442695, %v547_v28 }
 0x174   :  { %4075 = vpow2.f32 %v2425_v27 }
 0x175   :  { %4077 = vpow2.f32 %v2426_v31 }
 0x177   :  { %v616_v32 = vpop.f32.mrb[8].mxu1 }
 0x178   :  { %v2815_v36 = vpop.f32.mrb[9].mxu1  ;;  %v637_v49 = vadd.f32 %v4622_v44, %v616_v32 }
 0x17e   :  { %v4076_v37 = vpop.eup %4075 }
 0x17f   :  { %v627_v39 = vadd.f32 1.0, %v4076_v37  ;;  %v4078_v42 = vpop.eup %4077 }
 0x180   :  { %v634_v47 = vadd.f32 1.0, %v4078_v42 }
 0x181   :  { %4079 = vrcp.f32 %v627_v39 }
 0x182   :  { %4081 = vrcp.f32 %v634_v47 }
 0x18b   :  { %v4080_v50 = vpop.eup %4079 }
 0x18c   :  { %v638_v53 = vmul.f32 %v4080_v50, %v637_v49  ;;  %v4082_v58 = vpop.eup %4081 }
 0x18d   :  { %v641_v59 = vsub.f32 1.0, %v4082_v58  ;;  %v643_v3 = vmul.f32 %v4082_v58, %v4538_v29  ;;  %v4686_v29 = vld [vmem:[%s5083_s6] ss:$0 sm:$0xff] }
 0x18e   :  { %v639_v54 = vadd.f32 %v638_v53, %v337_v8 }
 0x190   :  { %4083 = vtanh.f32 %v639_v54 }
 0x19a   :  { %v4084_v60 = vpop.eup %4083 }
 0x19b   :  { %v642_v63 = vmul.f32 %v4084_v60, %v641_v59 }
 0x19d   :  { %v4626_v5 = vadd.f32 %v643_v3, %v642_v63 }
 0x19f   :  { %2849 = vmatmul.mubr.f32.vlgmr.msra.gmra.mrb[16].mxu0 %v4626_v5  ;;  %2884 = vmatmul.mubr.f32.vlgmr.msra.gmra.mrb[10].mxu1 %v4626_v5 }
 0x1a0   :  { %3488 = vmatpush1.bf16.msra.mxu0 %v4458_v17  ;;  %780 = vmatprep.mubr.f32.mxu0 %v4330_v0 }
 0x1a1   :  { %3490 = vmatprep.subr.bf16.mxu0 %v4461_v18  ;;  %3543 = vmatpush3.bf16.msra.mxu1 %v4573_v38 }
 0x1a2   :  { %3544 = vmatprep.subr.bf16.mxu1 %v4331_v40  ;;  %2918 = vmatprep.mubr.msk.f32.mxu1 %vm4332_vm0, %v4330_v0 }
 0x1a4   :  { %3492 = vmatpush1.bf16.msra.mxu0 %v4466_v25 }
 0x1a5   :  { %3494 = vmatprep.subr.bf16.mxu0 %v4469_v26  ;;  %3546 = vmatpush3.bf16.msra.mxu1 %v4577_v43 }
 0x1a6   :  { %3547 = vmatprep.subr.bf16.mxu1 %v4331_v40 }
 0x1a8   :  { %3496 = vmatpush1.bf16.msra.mxu0 %v4473_v34 }
 0x1a9   :  { %3498 = vmatprep.subr.bf16.mxu0 %v4476_v35  ;;  %3549 = vmatpush3.bf16.msra.mxu1 %v4580_v48 }
 0x1aa   :  { %3550 = vmatprep.subr.bf16.mxu1 %v4331_v40 }
 0x1ac   :  { %3500 = vmatpush1.bf16.msra.mxu0 %v4483_v45 }
 0x1ad   :  { %3502 = vmatprep.subr.bf16.mxu0 %v4486_v46  ;;  %3552 = vmatpush3.bf16.msra.mxu1 %v4585_v52 }
 0x1ae   :  { %3553 = vmatprep.subr.bf16.mxu1 %v4331_v40 }
 0x1b0   :  { %3504 = vmatpush1.bf16.msra.mxu0 %v4494_v55 }
 0x1b1   :  { %3506 = vmatprep.subr.bf16.mxu0 %v4497_v56  ;;  %3555 = vmatpush3.bf16.msra.mxu1 %v4589_v57 }
 0x1b2   :  { %3556 = vmatprep.subr.bf16.mxu1 %v4331_v40 }
 0x1b4   :  { %3508 = vmatpush1.bf16.msra.mxu0 %v4505_v2 }
 0x1b5   :  { %3510 = vmatprep.subr.bf16.mxu0 %v4508_v4  ;;  %3558 = vmatpush3.bf16.msra.mxu1 %v4593_v62 }
 0x1b6   :  { %3559 = vmatprep.subr.bf16.mxu1 %v4331_v40 }
 0x1b8   :  { %3512 = vmatpush1.bf16.msra.mxu0 %v4516_v13 }
 0x1b9   :  { %3514 = vmatprep.subr.bf16.mxu0 %v4519_v15  ;;  %3561 = vmatpush3.bf16.msra.mxu1 %v4596_v1 }
 0x1ba   :  { %3562 = vmatprep.subr.bf16.mxu1 %v4331_v40 }
 0x1bc   :  { %3516 = vmatpush1.bf16.msra.mxu0 %v4529_v23 }
 0x1bd   :  { %3566 = vmatprep.subr.bf16.mxu0 %v4456_v9  ;;  %3564 = vmatpush3.bf16.msra.mxu1 %v4600_v6 }
 0x1be   :  { %3597 = vmatprep.subr.bf16.mxu1 %v4331_v40 }
 0x1bf   :  { %781 = vmatmul.mubr.f32.vlgmr.msra.gmra.mrb[2].mxu0 %v4626_v5 }
 0x1c0   :  { %3568 = vmatpush1.bf16.msra.mxu0 %v4458_v17  ;;  %1019 = vmatprep.mubr.f32.mxu0 %v4330_v0 }
 0x1c1   :  { %3570 = vmatprep.subr.bf16.mxu0 %v4461_v18 }
 0x1c4   :  { %3572 = vmatpush1.bf16.msra.mxu0 %v4466_v25 }
 0x1c5   :  { %3574 = vmatprep.subr.bf16.mxu0 %v4469_v26 }
 0x1c8   :  { %3576 = vmatpush1.bf16.msra.mxu0 %v4473_v34 }
 0x1c9   :  { %3578 = vmatprep.subr.bf16.mxu0 %v4476_v35 }
 0x1cc   :  { %3580 = vmatpush1.bf16.msra.mxu0 %v4483_v45 }
 0x1cd   :  { %3582 = vmatprep.subr.bf16.mxu0 %v4486_v46 }
 0x1d0   :  { %3584 = vmatpush1.bf16.msra.mxu0 %v4494_v55 }
 0x1d1   :  { %3586 = vmatprep.subr.bf16.mxu0 %v4497_v56 }
 0x1d4   :  { %3588 = vmatpush1.bf16.msra.mxu0 %v4505_v2 }
 0x1d5   :  { %3590 = vmatprep.subr.bf16.mxu0 %v4508_v4 }
 0x1d8   :  { %3592 = vmatpush1.bf16.msra.mxu0 %v4516_v13 }
 0x1d9   :  { %3594 = vmatprep.subr.bf16.mxu0 %v4519_v15 }
 0x1dc   :  { %3596 = vmatpush1.bf16.msra.mxu0 %v4529_v23 }
 0x1dd   :  { %3621 = vmatprep.subr.bf16.mxu0 %v4331_v40 }
 0x272   :  { %v711_v8 = vpop.f32.mrb[16].mxu0  ;;  %v853_v22 = vpop.f32.mrb[10].mxu1 }
 0x273   :  { %v712_v27 = vadd.f32 %v4686_v29, %v711_v8  ;;  %v2850_v28 = vpop.f32.mrb[17].mxu0  ;;  %v2885_v31 = vpop.f32.mrb[11].mxu1  ;;  %v875_v53 = vadd.f32 %v4622_v44, %v853_v22 }
 0x275   :  { %715 = vst [vmem:[#allocation12] sm:$0xff] %v712_v27 }
 0x292   :  { %v782_v32 = vpop.f32.mrb[2].mxu0 }
 0x293   :  { %v2427_v36 = vmul.f32 -1.442695, %v782_v32  ;;  %v784_v37 = vpop.f32.mrb[3].mxu0 }
 0x294   :  { %v2428_v39 = vmul.f32 -1.442695, %v784_v37 }
 0x295   :  { %4085 = vpow2.f32 %v2427_v36 }
 0x296   :  { %4087 = vpow2.f32 %v2428_v39 }
 0x29f   :  { %v4086_v42 = vpop.eup %4085 }
 0x2a0   :  { %v865_v47 = vadd.f32 1.0, %v4086_v42  ;;  %v4088_v49 = vpop.eup %4087 }
 0x2a1   :  { %v872_v50 = vadd.f32 1.0, %v4088_v49 }
 0x2a2   :  { %4089 = vrcp.f32 %v865_v47 }
 0x2a3   :  { %4091 = vrcp.f32 %v872_v50 }
 0x2ac   :  { %v4090_v54 = vpop.eup %4089 }
 0x2ad   :  { %v876_v58 = vmul.f32 %v4090_v54, %v875_v53  ;;  %v4092_v60 = vpop.eup %4091 }
 0x2ae   :  { %v879_v63 = vsub.f32 1.0, %v4092_v60  ;;  %v881_v27 = vmul.f32 %v4092_v60, %v4626_v5 }
 0x2af   :  { %v877_v59 = vadd.f32 %v4605_v7, %v876_v58 }
 0x2b1   :  { %4093 = vtanh.f32 %v877_v59 }
 0x2bb   :  { %v4094_v3 = vpop.eup %4093 }
 0x2bc   :  { %v880_v8 = vmul.f32 %v4094_v3, %v879_v63 }
 0x2be   :  { %v4692_v28 = vadd.f32 %v881_v27, %v880_v8 }
 0x2c0   :  { %2919 = vmatmul.mubr.f32.vlgmr.msra.gmra.mrb[12].mxu1 %v4692_v28  ;;  %1020 = vmatmul.mubr.f32.vlgmr.msra.gmra.mrb[4].mxu0 %v4692_v28 }
 0x2c1   :  { %3599 = vmatpush3.bf16.msra.mxu1 %v4479_v41  ;;  %2953 = vmatprep.mubr.msk.f32.mxu1 %vm4332_vm0, %v4330_v0 }
 0x2c2   :  { %3600 = vmatprep.subr.bf16.mxu1 %v4331_v40  ;;  %3623 = vmatpush3.bf16.msra.mxu0 %v4573_v38 }
 0x2c3   :  { %3624 = vmatprep.subr.bf16.mxu0 %v4331_v40  ;;  %2988 = vmatprep.mubr.msk.f32.mxu0 %vm4332_vm0, %v4330_v0 }
 0x2c5   :  { %3602 = vmatpush3.bf16.msra.mxu1 %v4489_v51 }
 0x2c6   :  { %3603 = vmatprep.subr.bf16.mxu1 %v4331_v40  ;;  %3626 = vmatpush3.bf16.msra.mxu0 %v4577_v43 }
 0x2c7   :  { %3627 = vmatprep.subr.bf16.mxu0 %v4331_v40 }
 0x2c9   :  { %3605 = vmatpush3.bf16.msra.mxu1 %v4500_v61 }
 0x2ca   :  { %3606 = vmatprep.subr.bf16.mxu1 %v4331_v40  ;;  %3629 = vmatpush3.bf16.msra.mxu0 %v4580_v48 }
 0x2cb   :  { %3630 = vmatprep.subr.bf16.mxu0 %v4331_v40 }
 0x2cd   :  { %3608 = vmatpush3.bf16.msra.mxu1 %v4511_v10 }
 0x2ce   :  { %3609 = vmatprep.subr.bf16.mxu1 %v4331_v40  ;;  %3632 = vmatpush3.bf16.msra.mxu0 %v4585_v52 }
 0x2cf   :  { %3633 = vmatprep.subr.bf16.mxu0 %v4331_v40 }
 0x2d1   :  { %3611 = vmatpush3.bf16.msra.mxu1 %v4522_v20 }
 0x2d2   :  { %3612 = vmatprep.subr.bf16.mxu1 %v4331_v40  ;;  %3635 = vmatpush3.bf16.msra.mxu0 %v4589_v57 }
 0x2d3   :  { %3636 = vmatprep.subr.bf16.mxu0 %v4331_v40 }
 0x2d5   :  { %3614 = vmatpush3.bf16.msra.mxu1 %v4533_v24 }
 0x2d6   :  { %3615 = vmatprep.subr.bf16.mxu1 %v4331_v40  ;;  %3638 = vmatpush3.bf16.msra.mxu0 %v4593_v62 }
 0x2d7   :  { %3639 = vmatprep.subr.bf16.mxu0 %v4331_v40 }
 0x2d9   :  { %3617 = vmatpush3.bf16.msra.mxu1 %v4542_v30 }
 0x2da   :  { %3618 = vmatprep.subr.bf16.mxu1 %v4331_v40  ;;  %3641 = vmatpush3.bf16.msra.mxu0 %v4596_v1 }
 0x2db   :  { %3642 = vmatprep.subr.bf16.mxu0 %v4331_v40 }
 0x2dd   :  { %3620 = vmatpush3.bf16.msra.mxu1 %v4549_v33 }
 0x2de   :  { %3677 = vmatprep.subr.bf16.mxu1 %v4331_v40  ;;  %3644 = vmatpush3.bf16.msra.mxu0 %v4600_v6 }
 0x2df   :  { %3646 = vmatprep.subr.bf16.mxu0 %v4456_v9 }
 0x2e0   :  { %2954 = vmatmul.mubr.f32.vlgmr.msra.gmra.mrb[14].mxu1 %v4692_v28 }
 0x2e1   :  { %3679 = vmatpush3.bf16.msra.mxu1 %v4479_v41  ;;  %3023 = vmatprep.mubr.msk.f32.mxu1 %vm4332_vm0, %v4330_v0 }
 0x2e2   :  { %3680 = vmatprep.subr.bf16.mxu1 %v4331_v40 }
 0x2e5   :  { %3682 = vmatpush3.bf16.msra.mxu1 %v4489_v51 }
 0x2e6   :  { %3683 = vmatprep.subr.bf16.mxu1 %v4331_v40 }
 0x2e9   :  { %3685 = vmatpush3.bf16.msra.mxu1 %v4500_v61 }
 0x2ea   :  { %3686 = vmatprep.subr.bf16.mxu1 %v4331_v40 }
 0x2ed   :  { %3688 = vmatpush3.bf16.msra.mxu1 %v4511_v10 }
 0x2ee   :  { %3689 = vmatprep.subr.bf16.mxu1 %v4331_v40 }
 0x2f1   :  { %3691 = vmatpush3.bf16.msra.mxu1 %v4522_v20 }
 0x2f2   :  { %3692 = vmatprep.subr.bf16.mxu1 %v4331_v40 }
 0x2f5   :  { %3694 = vmatpush3.bf16.msra.mxu1 %v4533_v24 }
 0x2f6   :  { %3695 = vmatprep.subr.bf16.mxu1 %v4331_v40 }
 0x2f9   :  { %3697 = vmatpush3.bf16.msra.mxu1 %v4542_v30 }
 0x2fa   :  { %3698 = vmatprep.subr.bf16.mxu1 %v4331_v40 }
 0x2fd   :  { %3700 = vmatpush3.bf16.msra.mxu1 %v4549_v33 }
 0x2fe   :  { %3701 = vmatprep.subr.bf16.mxu1 %v4331_v40 }
 0x393   :  { %v949_v7 = vpop.f32.mrb[12].mxu1  ;;  %v1021_v5 = vpop.f32.mrb[4].mxu0 }
 0x394   :  { %v950_v22 = vadd.f32 %v4686_v29, %v949_v7  ;;  %v2920_v31 = vpop.f32.mrb[13].mxu1  ;;  %v1023_v32 = vpop.f32.mrb[5].mxu0  ;;  %v2429_v36 = vmul.f32 -1.442695, %v1021_v5 }
 0x395   :  { %v2430_v37 = vmul.f32 -1.442695, %v1023_v32 }
 0x396   :  { %954 = vst [vmem:[#allocation12 + $0x8] sm:$0xff] %v950_v22  ;;  %4095 = vpow2.f32 %v2429_v36 }
 0x397   :  { %4097 = vpow2.f32 %v2430_v37 }
 0x3a0   :  { %v4096_v39 = vpop.eup %4095 }
 0x3a1   :  { %v1104_v42 = vadd.f32 1.0, %v4096_v39  ;;  %v4098_v47 = vpop.eup %4097 }
 0x3a2   :  { %v1111_v49 = vadd.f32 1.0, %v4098_v47 }
 0x3a3   :  { %4099 = vrcp.f32 %v1104_v42 }
 0x3a4   :  { %4101 = vrcp.f32 %v1111_v49 }
 0x3ad   :  { %v4100_v58 = vpop.eup %4099 }
 0x3ae   :  { %v4102_v63 = vpop.eup %4101 }
 0x3af   :  { %v1118_v3 = vsub.f32 1.0, %v4102_v63  ;;  %v1120_v7 = vmul.f32 %v4102_v63, %v4692_v28 }
 0x3b3   :  { %v1092_v50 = vpop.f32.mrb[14].mxu1 }
 0x3b4   :  { %v1114_v53 = vadd.f32 %v4622_v44, %v1092_v50  ;;  %v2955_v54 = vpop.f32.mrb[15].mxu1 }
 0x3b6   :  { %v1115_v59 = vmul.f32 %v4100_v58, %v1114_v53 }
 0x3b8   :  { %v1116_v60 = vadd.f32 %v1115_v59, %v4609_v12 }
 0x3ba   :  { %4103 = vtanh.f32 %v1116_v60 }
 0x3c4   :  { %v4104_v8 = vpop.eup %4103 }
 0x3c5   :  { %v1119_v27 = vmul.f32 %v4104_v8, %v1118_v3 }
 0x3c7   :  { %v4755_v5 = vadd.f32 %v1120_v7, %v1119_v27 }
 0x3c9   :  { %2989 = vmatmul.mubr.f32.vlgmr.msra.gmra.mrb[18].mxu0 %v4755_v5  ;;  %3024 = vmatmul.mubr.f32.vlgmr.msra.gmra.mrb[16].mxu1 %v4755_v5 }
 0x3ca   :  { %3648 = vmatpush1.bf16.msra.mxu0 %v4458_v17  ;;  %1258 = vmatprep.mubr.f32.mxu0 %v4330_v0 }
 0x3cb   :  { %3650 = vmatprep.subr.bf16.mxu0 %v4461_v18  ;;  %3703 = vmatpush3.bf16.msra.mxu1 %v4573_v38 }
 0x3cc   :  { %3704 = vmatprep.subr.bf16.mxu1 %v4331_v40  ;;  %3058 = vmatprep.mubr.msk.f32.mxu1 %vm4332_vm0, %v4330_v0 }
 0x3ce   :  { %3652 = vmatpush1.bf16.msra.mxu0 %v4466_v25 }
 0x3cf   :  { %3654 = vmatprep.subr.bf16.mxu0 %v4469_v26  ;;  %3706 = vmatpush3.bf16.msra.mxu1 %v4577_v43 }
 0x3d0   :  { %3707 = vmatprep.subr.bf16.mxu1 %v4331_v40 }
 0x3d2   :  { %3656 = vmatpush1.bf16.msra.mxu0 %v4473_v34 }
 0x3d3   :  { %3658 = vmatprep.subr.bf16.mxu0 %v4476_v35  ;;  %3709 = vmatpush3.bf16.msra.mxu1 %v4580_v48 }
 0x3d4   :  { %3710 = vmatprep.subr.bf16.mxu1 %v4331_v40 }
 0x3d6   :  { %3660 = vmatpush1.bf16.msra.mxu0 %v4483_v45 }
 0x3d7   :  { %3662 = vmatprep.subr.bf16.mxu0 %v4486_v46  ;;  %3712 = vmatpush3.bf16.msra.mxu1 %v4585_v52 }
 0x3d8   :  { %3713 = vmatprep.subr.bf16.mxu1 %v4331_v40 }
 0x3da   :  { %3664 = vmatpush1.bf16.msra.mxu0 %v4494_v55 }
 0x3db   :  { %3666 = vmatprep.subr.bf16.mxu0 %v4497_v56  ;;  %3715 = vmatpush3.bf16.msra.mxu1 %v4589_v57 }
 0x3dc   :  { %3716 = vmatprep.subr.bf16.mxu1 %v4331_v40 }
 0x3de   :  { %3668 = vmatpush1.bf16.msra.mxu0 %v4505_v2 }
 0x3df   :  { %3670 = vmatprep.subr.bf16.mxu0 %v4508_v4  ;;  %3718 = vmatpush3.bf16.msra.mxu1 %v4593_v62 }
 0x3e0   :  { %3719 = vmatprep.subr.bf16.mxu1 %v4331_v40 }
 0x3e2   :  { %3672 = vmatpush1.bf16.msra.mxu0 %v4516_v13 }
 0x3e3   :  { %3674 = vmatprep.subr.bf16.mxu0 %v4519_v15  ;;  %3721 = vmatpush3.bf16.msra.mxu1 %v4596_v1 }
 0x3e4   :  { %3722 = vmatprep.subr.bf16.mxu1 %v4331_v40 }
 0x3e6   :  { %3676 = vmatpush1.bf16.msra.mxu0 %v4529_v23 }
 0x3e7   :  { %3726 = vmatprep.subr.bf16.mxu0 %v4456_v9  ;;  %3724 = vmatpush3.bf16.msra.mxu1 %v4600_v6 }
 0x3e8   :  { %3757 = vmatprep.subr.bf16.mxu1 %v4331_v40 }
 0x3e9   :  { %1259 = vmatmul.mubr.f32.vlgmr.msra.gmra.mrb[6].mxu0 %v4755_v5 }
 0x3ea   :  { %3728 = vmatpush1.bf16.msra.mxu0 %v4458_v17  ;;  %1497 = vmatprep.mubr.f32.mxu0 %v4330_v0 }
 0x3eb   :  { %3730 = vmatprep.subr.bf16.mxu0 %v4461_v18 }
 0x3ee   :  { %3732 = vmatpush1.bf16.msra.mxu0 %v4466_v25 }
 0x3ef   :  { %3734 = vmatprep.subr.bf16.mxu0 %v4469_v26 }
 0x3f2   :  { %3736 = vmatpush1.bf16.msra.mxu0 %v4473_v34 }
 0x3f3   :  { %3738 = vmatprep.subr.bf16.mxu0 %v4476_v35 }
 0x3f6   :  { %3740 = vmatpush1.bf16.msra.mxu0 %v4483_v45 }
 0x3f7   :  { %3742 = vmatprep.subr.bf16.mxu0 %v4486_v46 }
 0x3fa   :  { %3744 = vmatpush1.bf16.msra.mxu0 %v4494_v55 }
 0x3fb   :  { %3746 = vmatprep.subr.bf16.mxu0 %v4497_v56 }
 0x3fe   :  { %3748 = vmatpush1.bf16.msra.mxu0 %v4505_v2 }
 0x3ff   :  { %3750 = vmatprep.subr.bf16.mxu0 %v4508_v4 }
 0x402   :  { %3752 = vmatpush1.bf16.msra.mxu0 %v4516_v13 }
 0x403   :  { %3754 = vmatprep.subr.bf16.mxu0 %v4519_v15 }
 0x406   :  { %3756 = vmatpush1.bf16.msra.mxu0 %v4529_v23 }
 0x407   :  { %3781 = vmatprep.subr.bf16.mxu0 %v4331_v40 }
 0x49c   :  { %v1188_v12 = vpop.f32.mrb[18].mxu0  ;;  %v1331_v28 = vpop.f32.mrb[16].mxu1 }
 0x49d   :  { %v1189_v22 = vadd.f32 %v4686_v29, %v1188_v12  ;;  %v2990_v31 = vpop.f32.mrb[19].mxu0  ;;  %v3025_v32 = vpop.f32.mrb[17].mxu1  ;;  %v1353_v54 = vadd.f32 %v4622_v44, %v1331_v28 }
 0x49f   :  { %1193 = vst [vmem:[#allocation12 + $0x10] sm:$0xff] %v1189_v22 }
 0x4bc   :  { %v1260_v36 = vpop.f32.mrb[6].mxu0 }
 0x4bd   :  { %v2431_v37 = vmul.f32 -1.442695, %v1260_v36  ;;  %v1262_v39 = vpop.f32.mrb[7].mxu0 }
 0x4be   :  { %v2432_v42 = vmul.f32 -1.442695, %v1262_v39 }
 0x4bf   :  { %4105 = vpow2.f32 %v2431_v37 }
 0x4c0   :  { %4107 = vpow2.f32 %v2432_v42 }
 0x4c9   :  { %v4106_v47 = vpop.eup %4105 }
 0x4ca   :  { %v1343_v49 = vadd.f32 1.0, %v4106_v47  ;;  %v4108_v50 = vpop.eup %4107 }
 0x4cb   :  { %v1350_v53 = vadd.f32 1.0, %v4108_v50 }
 0x4cc   :  { %4109 = vrcp.f32 %v1343_v49 }
 0x4cd   :  { %4111 = vrcp.f32 %v1350_v53 }
 0x4d6   :  { %v4110_v58 = vpop.eup %4109 }
 0x4d7   :  { %v1354_v59 = vmul.f32 %v4110_v58, %v1353_v54  ;;  %v4112_v63 = vpop.eup %4111 }
 0x4d8   :  { %v1357_v3 = vsub.f32 1.0, %v4112_v63  ;;  %v1359_v7 = vmul.f32 %v4112_v63, %v4755_v5 }
 0x4d9   :  { %v1355_v60 = vadd.f32 %v4607_v11, %v1354_v59 }
 0x4db   :  { %4113 = vtanh.f32 %v1355_v60 }
 0x4e5   :  { %v4114_v8 = vpop.eup %4113 }
 0x4e6   :  { %v1358_v27 = vmul.f32 %v4114_v8, %v1357_v3 }
 0x4e8   :  { %v4816_v12 = vadd.f32 %v1359_v7, %v1358_v27 }
 0x4ea   :  { %3059 = vmatmul.mubr.f32.vlgmr.msra.gmra.mrb[18].mxu1 %v4816_v12  ;;  %1498 = vmatmul.mubr.f32.vlgmr.msra.gmra.mrb[8].mxu0 %v4816_v12 }
 0x4eb   :  { %3759 = vmatpush3.bf16.msra.mxu1 %v4479_v41  ;;  %3093 = vmatprep.mubr.msk.f32.mxu1 %vm4332_vm0, %v4330_v0 }
 0x4ec   :  { %3760 = vmatprep.subr.bf16.mxu1 %v4331_v40  ;;  %3783 = vmatpush3.bf16.msra.mxu0 %v4573_v38 }
 0x4ed   :  { %3784 = vmatprep.subr.bf16.mxu0 %v4331_v40  ;;  %3128 = vmatprep.mubr.msk.f32.mxu0 %vm4332_vm0, %v4330_v0 }
 0x4ef   :  { %3762 = vmatpush3.bf16.msra.mxu1 %v4489_v51 }
 0x4f0   :  { %3763 = vmatprep.subr.bf16.mxu1 %v4331_v40  ;;  %3786 = vmatpush3.bf16.msra.mxu0 %v4577_v43 }
 0x4f1   :  { %3787 = vmatprep.subr.bf16.mxu0 %v4331_v40 }
 0x4f3   :  { %3765 = vmatpush3.bf16.msra.mxu1 %v4500_v61 }
 0x4f4   :  { %3766 = vmatprep.subr.bf16.mxu1 %v4331_v40  ;;  %3789 = vmatpush3.bf16.msra.mxu0 %v4580_v48 }
 0x4f5   :  { %3790 = vmatprep.subr.bf16.mxu0 %v4331_v40 }
 0x4f7   :  { %3768 = vmatpush3.bf16.msra.mxu1 %v4511_v10 }
 0x4f8   :  { %3769 = vmatprep.subr.bf16.mxu1 %v4331_v40  ;;  %3792 = vmatpush3.bf16.msra.mxu0 %v4585_v52 }
 0x4f9   :  { %3793 = vmatprep.subr.bf16.mxu0 %v4331_v40 }
 0x4fb   :  { %3771 = vmatpush3.bf16.msra.mxu1 %v4522_v20 }
 0x4fc   :  { %3772 = vmatprep.subr.bf16.mxu1 %v4331_v40  ;;  %3795 = vmatpush3.bf16.msra.mxu0 %v4589_v57 }
 0x4fd   :  { %3796 = vmatprep.subr.bf16.mxu0 %v4331_v40 }
 0x4ff   :  { %3774 = vmatpush3.bf16.msra.mxu1 %v4533_v24 }
 0x500   :  { %3775 = vmatprep.subr.bf16.mxu1 %v4331_v40  ;;  %3798 = vmatpush3.bf16.msra.mxu0 %v4593_v62 }
 0x501   :  { %3799 = vmatprep.subr.bf16.mxu0 %v4331_v40 }
 0x503   :  { %3777 = vmatpush3.bf16.msra.mxu1 %v4542_v30 }
 0x504   :  { %3778 = vmatprep.subr.bf16.mxu1 %v4331_v40  ;;  %3801 = vmatpush3.bf16.msra.mxu0 %v4596_v1 }
 0x505   :  { %3802 = vmatprep.subr.bf16.mxu0 %v4331_v40 }
 0x507   :  { %3780 = vmatpush3.bf16.msra.mxu1 %v4549_v33 }
 0x508   :  { %3837 = vmatprep.subr.bf16.mxu1 %v4331_v40  ;;  %3804 = vmatpush3.bf16.msra.mxu0 %v4600_v6 }
 0x509   :  { %3806 = vmatprep.subr.bf16.mxu0 %v4456_v9 }
 0x50a   :  { %3094 = vmatmul.mubr.f32.vlgmr.msra.gmra.mrb[20].mxu1 %v4816_v12 }
 0x50b   :  { %3839 = vmatpush3.bf16.msra.mxu1 %v4479_v41  ;;  %3163 = vmatprep.mubr.msk.f32.mxu1 %vm4332_vm0, %v4330_v0 }
 0x50c   :  { %3840 = vmatprep.subr.bf16.mxu1 %v4331_v40 }
 0x50f   :  { %3842 = vmatpush3.bf16.msra.mxu1 %v4489_v51 }
 0x510   :  { %3843 = vmatprep.subr.bf16.mxu1 %v4331_v40 }
 0x513   :  { %3845 = vmatpush3.bf16.msra.mxu1 %v4500_v61 }
 0x514   :  { %3846 = vmatprep.subr.bf16.mxu1 %v4331_v40 }
 0x517   :  { %3848 = vmatpush3.bf16.msra.mxu1 %v4511_v10 }
 0x518   :  { %3849 = vmatprep.subr.bf16.mxu1 %v4331_v40 }
 0x51b   :  { %3851 = vmatpush3.bf16.msra.mxu1 %v4522_v20 }
 0x51c   :  { %3852 = vmatprep.subr.bf16.mxu1 %v4331_v40 }
 0x51f   :  { %3854 = vmatpush3.bf16.msra.mxu1 %v4533_v24 }
 0x520   :  { %3855 = vmatprep.subr.bf16.mxu1 %v4331_v40 }
 0x523   :  { %3857 = vmatpush3.bf16.msra.mxu1 %v4542_v30 }
 0x524   :  { %3858 = vmatprep.subr.bf16.mxu1 %v4331_v40 }
 0x527   :  { %3860 = vmatpush3.bf16.msra.mxu1 %v4549_v33 }
 0x528   :  { %3861 = vmatprep.subr.bf16.mxu1 %v4331_v40 }
 0x5bd   :  { %v1427_v11 = vpop.f32.mrb[18].mxu1  ;;  %v1499_v5 = vpop.f32.mrb[8].mxu0 }
 0x5be   :  { %v1428_v28 = vadd.f32 %v4686_v29, %v1427_v11  ;;  %v3060_v22 = vpop.f32.mrb[19].mxu1  ;;  %v1501_v31 = vpop.f32.mrb[9].mxu0  ;;  %v2433_v32 = vmul.f32 -1.442695, %v1499_v5 }
 0x5bf   :  { %v2434_v36 = vmul.f32 -1.442695, %v1501_v31 }
 0x5c0   :  { %1432 = vst [vmem:[#allocation12 + $0x18] sm:$0xff] %v1428_v28  ;;  %4115 = vpow2.f32 %v2433_v32 }
 0x5c1   :  { %4117 = vpow2.f32 %v2434_v36 }
 0x5ca   :  { %v4116_v37 = vpop.eup %4115 }
 0x5cb   :  { %v1582_v39 = vadd.f32 1.0, %v4116_v37  ;;  %v4118_v42 = vpop.eup %4117 }
 0x5cc   :  { %v1589_v47 = vadd.f32 1.0, %v4118_v42 }
 0x5cd   :  { %4119 = vrcp.f32 %v1582_v39 }
 0x5ce   :  { %4121 = vrcp.f32 %v1589_v47 }
 0x5d7   :  { %v4120_v54 = vpop.eup %4119 }
 0x5d8   :  { %v4122_v60 = vpop.eup %4121 }
 0x5d9   :  { %v1596_v63 = vsub.f32 1.0, %v4122_v60  ;;  %v1598_v27 = vmul.f32 %v4122_v60, %v4816_v12 }
 0x5dd   :  { %v1570_v49 = vpop.f32.mrb[20].mxu1 }
 0x5de   :  { %v1592_v50 = vadd.f32 %v4622_v44, %v1570_v49  ;;  %v3095_v53 = vpop.f32.mrb[21].mxu1 }
 0x5e0   :  { %v1593_v58 = vmul.f32 %v4120_v54, %v1592_v50 }
 0x5e2   :  { %v1594_v59 = vadd.f32 %v1593_v58, %v4613_v16 }
 0x5e4   :  { %4123 = vtanh.f32 %v1594_v59 }
 0x5ee   :  { %v4124_v3 = vpop.eup %4123 }
 0x5ef   :  { %v1597_v8 = vmul.f32 %v4124_v3, %v1596_v63 }
 0x5f1   :  { %v4879_v7 = vadd.f32 %v1598_v27, %v1597_v8 }
 0x5f3   :  { %3129 = vmatmul.mubr.f32.vlgmr.msra.gmra.mrb[20].mxu0 %v4879_v7  ;;  %3164 = vmatmul.mubr.f32.vlgmr.msra.gmra.mrb[22].mxu1 %v4879_v7 }
 0x5f4   :  { %3808 = vmatpush1.bf16.msra.mxu0 %v4458_v17  ;;  %1736 = vmatprep.mubr.f32.mxu0 %v4330_v0 }
 0x5f5   :  { %3810 = vmatprep.subr.bf16.mxu0 %v4461_v18  ;;  %3863 = vmatpush3.bf16.msra.mxu1 %v4573_v38 }
 0x5f6   :  { %3864 = vmatprep.subr.bf16.mxu1 %v4331_v40  ;;  %3198 = vmatprep.mubr.msk.f32.mxu1 %vm4332_vm0, %v4330_v0 }
 0x5f8   :  { %3812 = vmatpush1.bf16.msra.mxu0 %v4466_v25 }
 0x5f9   :  { %3814 = vmatprep.subr.bf16.mxu0 %v4469_v26  ;;  %3866 = vmatpush3.bf16.msra.mxu1 %v4577_v43 }
 0x5fa   :  { %3867 = vmatprep.subr.bf16.mxu1 %v4331_v40 }
 0x5fc   :  { %3816 = vmatpush1.bf16.msra.mxu0 %v4473_v34 }
 0x5fd   :  { %3818 = vmatprep.subr.bf16.mxu0 %v4476_v35  ;;  %3869 = vmatpush3.bf16.msra.mxu1 %v4580_v48 }
 0x5fe   :  { %3870 = vmatprep.subr.bf16.mxu1 %v4331_v40 }
 0x600   :  { %3820 = vmatpush1.bf16.msra.mxu0 %v4483_v45 }
 0x601   :  { %3822 = vmatprep.subr.bf16.mxu0 %v4486_v46  ;;  %3872 = vmatpush3.bf16.msra.mxu1 %v4585_v52 }
 0x602   :  { %3873 = vmatprep.subr.bf16.mxu1 %v4331_v40 }
 0x604   :  { %3824 = vmatpush1.bf16.msra.mxu0 %v4494_v55 }
 0x605   :  { %3826 = vmatprep.subr.bf16.mxu0 %v4497_v56  ;;  %3875 = vmatpush3.bf16.msra.mxu1 %v4589_v57 }
 0x606   :  { %3876 = vmatprep.subr.bf16.mxu1 %v4331_v40 }
 0x608   :  { %3828 = vmatpush1.bf16.msra.mxu0 %v4505_v2 }
 0x609   :  { %3830 = vmatprep.subr.bf16.mxu0 %v4508_v4  ;;  %3878 = vmatpush3.bf16.msra.mxu1 %v4593_v62 }
 0x60a   :  { %3879 = vmatprep.subr.bf16.mxu1 %v4331_v40 }
 0x60c   :  { %3832 = vmatpush1.bf16.msra.mxu0 %v4516_v13 }
 0x60d   :  { %3834 = vmatprep.subr.bf16.mxu0 %v4519_v15  ;;  %3881 = vmatpush3.bf16.msra.mxu1 %v4596_v1 }
 0x60e   :  { %3882 = vmatprep.subr.bf16.mxu1 %v4331_v40 }
 0x610   :  { %3836 = vmatpush1.bf16.msra.mxu0 %v4529_v23 }
 0x611   :  { %3886 = vmatprep.subr.bf16.mxu0 %v4456_v9  ;;  %3884 = vmatpush3.bf16.msra.mxu1 %v4600_v6 }
 0x612   :  { %3917 = vmatprep.subr.bf16.mxu1 %v4331_v40 }
 0x613   :  { %1737 = vmatmul.mubr.f32.vlgmr.msra.gmra.mrb[10].mxu0 %v4879_v7 }
 0x614   :  { %3888 = vmatpush1.bf16.msra.mxu0 %v4458_v17  ;;  %1975 = vmatprep.mubr.f32.mxu0 %v4330_v0 }
 0x615   :  { %3890 = vmatprep.subr.bf16.mxu0 %v4461_v18 }
 0x618   :  { %3892 = vmatpush1.bf16.msra.mxu0 %v4466_v25 }
 0x619   :  { %3894 = vmatprep.subr.bf16.mxu0 %v4469_v26 }
 0x61c   :  { %3896 = vmatpush1.bf16.msra.mxu0 %v4473_v34 }
 0x61d   :  { %3898 = vmatprep.subr.bf16.mxu0 %v4476_v35 }
 0x620   :  { %3900 = vmatpush1.bf16.msra.mxu0 %v4483_v45 }
 0x621   :  { %3902 = vmatprep.subr.bf16.mxu0 %v4486_v46 }
 0x624   :  { %3904 = vmatpush1.bf16.msra.mxu0 %v4494_v55 }
 0x625   :  { %3906 = vmatprep.subr.bf16.mxu0 %v4497_v56 }
 0x628   :  { %3908 = vmatpush1.bf16.msra.mxu0 %v4505_v2 }
 0x629   :  { %3910 = vmatprep.subr.bf16.mxu0 %v4508_v4 }
 0x62c   :  { %3912 = vmatpush1.bf16.msra.mxu0 %v4516_v13 }
 0x62d   :  { %3914 = vmatprep.subr.bf16.mxu0 %v4519_v15 }
 0x630   :  { %3916 = vmatpush1.bf16.msra.mxu0 %v4529_v23 }
 0x631   :  { %3941 = vmatprep.subr.bf16.mxu0 %v4331_v40 }
 0x6c6   :  { %v1666_v16 = vpop.f32.mrb[20].mxu0  ;;  %v1809_v12 = vpop.f32.mrb[22].mxu1 }
 0x6c7   :  { %v1667_v11 = vadd.f32 %v4686_v29, %v1666_v16  ;;  %v3130_v5 = vpop.f32.mrb[21].mxu0  ;;  %v3165_v28 = vpop.f32.mrb[23].mxu1  ;;  %v1831_v49 = vadd.f32 %v4622_v44, %v1809_v12 }
 0x6c9   :  { %1671 = vst [vmem:[#allocation12 + $0x20] sm:$0xff] %v1667_v11 }
 0x6e6   :  { %v1738_v22 = vpop.f32.mrb[10].mxu0 }
 0x6e7   :  { %v2435_v31 = vmul.f32 -1.442695, %v1738_v22  ;;  %v1740_v32 = vpop.f32.mrb[11].mxu0 }
 0x6e8   :  { %v2436_v36 = vmul.f32 -1.442695, %v1740_v32 }
 0x6e9   :  { %4125 = vpow2.f32 %v2435_v31 }
 0x6ea   :  { %4127 = vpow2.f32 %v2436_v36 }
 0x6f3   :  { %v4126_v37 = vpop.eup %4125 }
 0x6f4   :  { %v1821_v39 = vadd.f32 1.0, %v4126_v37  ;;  %v4128_v42 = vpop.eup %4127 }
 0x6f5   :  { %v1828_v47 = vadd.f32 1.0, %v4128_v42 }
 0x6f6   :  { %4129 = vrcp.f32 %v1821_v39 }
 0x6f7   :  { %4131 = vrcp.f32 %v1828_v47 }
 0x700   :  { %v4130_v50 = vpop.eup %4129 }
 0x701   :  { %v1832_v53 = vmul.f32 %v4130_v50, %v1831_v49  ;;  %v4132_v58 = vpop.eup %4131 }
 0x702   :  { %v1835_v59 = vsub.f32 1.0, %v4132_v58  ;;  %v1837_v3 = vmul.f32 %v4132_v58, %v4879_v7 }
 0x703   :  { %v1833_v54 = vadd.f32 %v4611_v14, %v1832_v53 }
 0x705   :  { %4133 = vtanh.f32 %v1833_v54 }
 0x70f   :  { %v4134_v60 = vpop.eup %4133 }
 0x710   :  { %v1836_v63 = vmul.f32 %v4134_v60, %v1835_v59 }
 0x712   :  { %v4940_v8 = vadd.f32 %v1837_v3, %v1836_v63 }
 0x714   :  { %3199 = vmatmul.mubr.f32.vlgmr.msra.gmra.mrb[24].mxu1 %v4940_v8  ;;  %1976 = vmatmul.mubr.f32.vlgmr.msra.gmra.mrb[12].mxu0 %v4940_v8 }
 0x715   :  { %3919 = vmatpush3.bf16.msra.mxu1 %v4479_v41  ;;  %3233 = vmatprep.mubr.msk.f32.mxu1 %vm4332_vm0, %v4330_v0 }
 0x716   :  { %3920 = vmatprep.subr.bf16.mxu1 %v4331_v40  ;;  %3943 = vmatpush3.bf16.msra.mxu0 %v4573_v38 }
 0x717   :  { %3944 = vmatprep.subr.bf16.mxu0 %v4331_v40  ;;  %3268 = vmatprep.mubr.msk.f32.mxu0 %vm4332_vm0, %v4330_v0 }
 0x719   :  { %3922 = vmatpush3.bf16.msra.mxu1 %v4489_v51 }
 0x71a   :  { %3923 = vmatprep.subr.bf16.mxu1 %v4331_v40  ;;  %3946 = vmatpush3.bf16.msra.mxu0 %v4577_v43 }
 0x71b   :  { %3947 = vmatprep.subr.bf16.mxu0 %v4331_v40 }
 0x71d   :  { %3925 = vmatpush3.bf16.msra.mxu1 %v4500_v61 }
 0x71e   :  { %3926 = vmatprep.subr.bf16.mxu1 %v4331_v40  ;;  %3949 = vmatpush3.bf16.msra.mxu0 %v4580_v48 }
 0x71f   :  { %3950 = vmatprep.subr.bf16.mxu0 %v4331_v40 }
 0x721   :  { %3928 = vmatpush3.bf16.msra.mxu1 %v4511_v10 }
 0x722   :  { %3929 = vmatprep.subr.bf16.mxu1 %v4331_v40  ;;  %3952 = vmatpush3.bf16.msra.mxu0 %v4585_v52 }
 0x723   :  { %3953 = vmatprep.subr.bf16.mxu0 %v4331_v40 }
 0x725   :  { %3931 = vmatpush3.bf16.msra.mxu1 %v4522_v20 }
 0x726   :  { %3932 = vmatprep.subr.bf16.mxu1 %v4331_v40  ;;  %3955 = vmatpush3.bf16.msra.mxu0 %v4589_v57 }
 0x727   :  { %3956 = vmatprep.subr.bf16.mxu0 %v4331_v40 }
 0x729   :  { %3934 = vmatpush3.bf16.msra.mxu1 %v4533_v24 }
 0x72a   :  { %3935 = vmatprep.subr.bf16.mxu1 %v4331_v40  ;;  %3958 = vmatpush3.bf16.msra.mxu0 %v4593_v62 }
 0x72b   :  { %3959 = vmatprep.subr.bf16.mxu0 %v4331_v40 }
 0x72d   :  { %3937 = vmatpush3.bf16.msra.mxu1 %v4542_v30 }
 0x72e   :  { %3938 = vmatprep.subr.bf16.mxu1 %v4331_v40  ;;  %3961 = vmatpush3.bf16.msra.mxu0 %v4596_v1 }
 0x72f   :  { %3962 = vmatprep.subr.bf16.mxu0 %v4331_v40 }
 0x731   :  { %3940 = vmatpush3.bf16.msra.mxu1 %v4549_v33 }
 0x732   :  { %3997 = vmatprep.subr.bf16.mxu1 %v4331_v40  ;;  %3964 = vmatpush3.bf16.msra.mxu0 %v4600_v6 }
 0x733   :  { %3966 = vmatprep.subr.bf16.mxu0 %v4456_v9 }
 0x734   :  { %3234 = vmatmul.mubr.f32.vlgmr.msra.gmra.mrb[26].mxu1 %v4940_v8 }
 0x735   :  { %3999 = vmatpush3.bf16.msra.mxu1 %v4479_v41  ;;  %3303 = vmatprep.mubr.msk.f32.mxu1 %vm4332_vm0, %v4330_v0 }
 0x736   :  { %4000 = vmatprep.subr.bf16.mxu1 %v4331_v40 }
 0x739   :  { %4002 = vmatpush3.bf16.msra.mxu1 %v4489_v51 }
 0x73a   :  { %4003 = vmatprep.subr.bf16.mxu1 %v4331_v40 }
 0x73d   :  { %4005 = vmatpush3.bf16.msra.mxu1 %v4500_v61 }
 0x73e   :  { %4006 = vmatprep.subr.bf16.mxu1 %v4331_v40 }
 0x741   :  { %4008 = vmatpush3.bf16.msra.mxu1 %v4511_v10 }
 0x742   :  { %4009 = vmatprep.subr.bf16.mxu1 %v4331_v40 }
 0x745   :  { %4011 = vmatpush3.bf16.msra.mxu1 %v4522_v20 }
 0x746   :  { %4012 = vmatprep.subr.bf16.mxu1 %v4331_v40 }
 0x749   :  { %4014 = vmatpush3.bf16.msra.mxu1 %v4533_v24 }
 0x74a   :  { %4015 = vmatprep.subr.bf16.mxu1 %v4331_v40 }
 0x74d   :  { %4017 = vmatpush3.bf16.msra.mxu1 %v4542_v30 }
 0x74e   :  { %4018 = vmatprep.subr.bf16.mxu1 %v4331_v40 }
 0x751   :  { %4020 = vmatpush3.bf16.msra.mxu1 %v4549_v33 }
 0x752   :  { %4021 = vmatprep.subr.bf16.mxu1 %v4331_v40 }
 0x7e7   :  { %v1905_v9 = vpop.f32.mrb[24].mxu1  ;;  %v1977_v41 = vpop.f32.mrb[12].mxu0 }
 0x7e8   :  { %v1906_v51 = vadd.f32 %v4686_v29, %v1905_v9  ;;  %v3200_v61 = vpop.f32.mrb[25].mxu1  ;;  %v1979_v10 = vpop.f32.mrb[13].mxu0  ;;  %v2437_v20 = vmul.f32 -1.442695, %v1977_v41 }
 0x7e9   :  { %v2438_v24 = vmul.f32 -1.442695, %v1979_v10 }
 0x7ea   :  { %1910 = vst [vmem:[#allocation12 + $0x28] sm:$0xff] %v1906_v51  ;;  %4135 = vpow2.f32 %v2437_v20 }
 0x7eb   :  { %4137 = vpow2.f32 %v2438_v24 }
 0x7f4   :  { %v4136_v14 = vpop.eup %4135 }
 0x7f5   :  { %v2060_v27 = vadd.f32 1.0, %v4136_v14  ;;  %v4138_v30 = vpop.eup %4137 }
 0x7f6   :  { %v2067_v7 = vadd.f32 1.0, %v4138_v30 }
 0x7f7   :  { %4139 = vrcp.f32 %v2060_v27 }
 0x7f8   :  { %4141 = vrcp.f32 %v2067_v7 }
 0x801   :  { %v4140_v11 = vpop.eup %4139 }
 0x802   :  { %v4142_v22 = vpop.eup %4141 }
 0x803   :  { %v2074_v31 = vsub.f32 1.0, %v4142_v22  ;;  %v2076_v37 = vmul.f32 %v4142_v22, %v4940_v8 }
 0x807   :  { %v2048_v16 = vpop.f32.mrb[26].mxu1 }
 0x808   :  { %v2070_v33 = vadd.f32 %v4622_v44, %v2048_v16  ;;  %v3235_v12 = vpop.f32.mrb[27].mxu1 }
 0x80a   :  { %v2071_v5 = vmul.f32 %v4140_v11, %v2070_v33 }
 0x80c   :  { %v2072_v28 = vadd.f32 %v2071_v5, %v4617_v21 }
 0x80e   :  { %4143 = vtanh.f32 %v2072_v28 }
 0x818   :  { %v4144_v32 = vpop.eup %4143 }
 0x819   :  { %v2075_v36 = vmul.f32 %v4144_v32, %v2074_v31 }
 0x81b   :  { %v5003_v39 = vadd.f32 %v2076_v37, %v2075_v36 }
 0x81d   :  { %3269 = vmatmul.mubr.f32.vlgmr.msra.gmra.mrb[22].mxu0 %v5003_v39  ;;  %3304 = vmatmul.mubr.f32.vlgmr.msra.gmra.mrb[28].mxu1 %v5003_v39 }
 0x81e   :  { %3968 = vmatpush1.bf16.msra.mxu0 %v4458_v17  ;;  %2214 = vmatprep.mubr.f32.mxu0 %v4330_v0 }
 0x81f   :  { %3970 = vmatprep.subr.bf16.mxu0 %v4461_v18  ;;  %4023 = vmatpush3.bf16.msra.mxu1 %v4573_v38 }
 0x820   :  { %4024 = vmatprep.subr.bf16.mxu1 %v4331_v40  ;;  %3338 = vmatprep.mubr.msk.f32.mxu1 %vm4332_vm0, %v4330_v0 }
 0x822   :  { %3972 = vmatpush1.bf16.msra.mxu0 %v4466_v25 }
 0x823   :  { %3974 = vmatprep.subr.bf16.mxu0 %v4469_v26  ;;  %4026 = vmatpush3.bf16.msra.mxu1 %v4577_v43 }
 0x824   :  { %4027 = vmatprep.subr.bf16.mxu1 %v4331_v40 }
 0x826   :  { %3976 = vmatpush1.bf16.msra.mxu0 %v4473_v34 }
 0x827   :  { %3978 = vmatprep.subr.bf16.mxu0 %v4476_v35  ;;  %4029 = vmatpush3.bf16.msra.mxu1 %v4580_v48 }
 0x828   :  { %4030 = vmatprep.subr.bf16.mxu1 %v4331_v40 }
 0x82a   :  { %3980 = vmatpush1.bf16.msra.mxu0 %v4483_v45 }
 0x82b   :  { %3982 = vmatprep.subr.bf16.mxu0 %v4486_v46  ;;  %4032 = vmatpush3.bf16.msra.mxu1 %v4585_v52 }
 0x82c   :  { %4033 = vmatprep.subr.bf16.mxu1 %v4331_v40 }
 0x82e   :  { %3984 = vmatpush1.bf16.msra.mxu0 %v4494_v55 }
 0x82f   :  { %3986 = vmatprep.subr.bf16.mxu0 %v4497_v56  ;;  %4035 = vmatpush3.bf16.msra.mxu1 %v4589_v57 }
 0x830   :  { %4036 = vmatprep.subr.bf16.mxu1 %v4331_v40 }
 0x832   :  { %3988 = vmatpush1.bf16.msra.mxu0 %v4505_v2 }
 0x833   :  { %3990 = vmatprep.subr.bf16.mxu0 %v4508_v4  ;;  %4038 = vmatpush3.bf16.msra.mxu1 %v4593_v62  ;;  %v4155_v4 = vld [vmem:[%s5081_s4] ss:$0 sm:$0xff]  ;;  %s4267_s4 = scalar_lea.vmem %s2409_s1, 128 }
 0x834   :  { %4039 = vmatprep.subr.bf16.mxu1 %v4331_v40  ;;  %p4268_p12 = scmp.ne.s32.totalorder %s2409_s1, %s4267_s4  ;;  %p4273_p0 = scmp.lt.s32.totalorder %s4267_s4, %s4267_s4 }
 0x836   :  { %3992 = vmatpush1.bf16.msra.mxu0 %v4516_v13  ;;  %p4274_p1 = por %p4273_p0, %p4272_p13 }
 0x837   :  { %3994 = vmatprep.subr.bf16.mxu0 %v4519_v15  ;;  %4041 = vmatpush3.bf16.msra.mxu1 %v4596_v1 }
 0x838   :  { %4042 = vmatprep.subr.bf16.mxu1 %v4331_v40  ;;  %p4275_p2 = pnand %p4274_p1, %p4268_p12 }
 0x83a   :  { %3996 = vmatpush1.bf16.msra.mxu0 %v4529_v23 }
 0x83b   :  { %4044 = vmatpush3.bf16.msra.mxu1 %v4600_v6 }
 0x83d   :  { %2215 = vmatmul.mubr.f32.vlgmr.msra.gmra.mrb[14].mxu0 %v5003_v39 }
 0x8f0   :  { %v2144_v0 = vpop.f32.mrb[22].mxu0  ;;  %v2287_v17 = vpop.f32.mrb[28].mxu1 }
 0x8f1   :  { %v2145_v18 = vadd.f32 %v4686_v29, %v2144_v0  ;;  %v3270_v25 = vpop.f32.mrb[23].mxu0  ;;  %v3305_v26 = vpop.f32.mrb[29].mxu1  ;;  %v2309_v13 = vadd.f32 %v4155_v4, %v2287_v17 }
 0x8f3   :  { %2149 = vst [vmem:[#allocation12 + $0x30] sm:$0xff] %v2145_v18 }
 0x910   :  { %v2216_v34 = vpop.f32.mrb[14].mxu0 }
 0x911   :  { %v2439_v35 = vmul.f32 -1.442695, %v2216_v34  ;;  %v2218_v45 = vpop.f32.mrb[15].mxu0 }
 0x912   :  { %v2440_v46 = vmul.f32 -1.442695, %v2218_v45 }
 0x913   :  { %4145 = vpow2.f32 %v2439_v35 }
 0x914   :  { %4147 = vpow2.f32 %v2440_v46 }
 0x91d   :  { %v4146_v40 = vpop.eup %4145 }
 0x91e   :  { %v2299_v55 = vadd.f32 1.0, %v4146_v40  ;;  %v4148_v56 = vpop.eup %4147 }
 0x91f   :  { %v2306_v2 = vadd.f32 1.0, %v4148_v56 }
 0x920   :  { %4149 = vrcp.f32 %v2299_v55 }
 0x921   :  { %4151 = vrcp.f32 %v2306_v2 }
 0x92a   :  { %v4150_v15 = vpop.eup %4149 }
 0x92b   :  { %v2310_v23 = vmul.f32 %v4150_v15, %v2309_v13  ;;  %v4152_v43 = vpop.eup %4151 }
 0x92c   :  { %v2313_v48 = vsub.f32 1.0, %v4152_v43  ;;  %v2315_v62 = vmul.f32 %v4152_v43, %v5003_v39 }
 0x92d   :  { %v2311_v38 = vadd.f32 %v4615_v19, %v2310_v23 }
 0x92f   :  { %4153 = vtanh.f32 %v2311_v38 }
 0x939   :  { %v4154_v52 = vpop.eup %4153 }
 0x93a   :  { %v2314_v57 = vmul.f32 %v4154_v52, %v2313_v48 }
 0x93c   :  { %v2316_v1 = vadd.f32 %v2315_v62, %v2314_v57 }
 0x93e   :  { %3339 = vmatmul.mubr.f32.vlgmr.msra.gmra.mrb[30].mxu1 %v2316_v1  ;;  %2389 = vst [vmem:[#allocation13] sm:$0xff] %v2316_v1 }
 0x93f   :  { %4278 = shalt.err (!%p4275_p2)
}
 0x940   :  { %s4279_s10 = scalar_lea.hbm %s5085_s8, 128 }
 0x941   :  { %p4280_p3 = scmp.ne.s32.totalorder %s5085_s8, %s4279_s10  ;;  %p4283_p4 = scmp.lt.u32.totalorder %s4279_s10, %s5085_s8 }
 0x943   :  { %p4285_p5 = pnand %p4283_p4, %p4280_p3 }
 0x945   :  { %4288 = shalt.err (!%p4285_p5)
}
 0x946   :  { %2411 = dma.vmem_to_hbm [thread:$0]  %s2409_s1, 128, %s5085_s8, [#allocation14]   ;;  %v4156_v19 = vld [vmem:[%s5083_s6] ss:$0 sm:$0xff] }
 0x947   :  { %s4334_s15 = smov [#allocation12]  }
 0x948   :  { %s2395_s16 = sshll.u32 %s4334_s15, 4  ;;  %s2396_s16 = int_to_ptr.vmem [resolvable:$true] %s2395_s16 }
 0x949   :  { %s4289_s21 = scalar_lea.vmem %s2396_s16, 1024  ;;  %p4294_p7 = scmp.lt.s32.totalorder %s2396_s16, %s2396_s16 }
 0x94a   :  { %p4290_p6 = scmp.ne.s32.totalorder %s2396_s16, %s4289_s21  ;;  %p4295_p8 = scmp.lt.s32.totalorder %s4289_s21, %s4289_s21 }
 0x94c   :  { %p4296_p9 = por %p4295_p8, %p4294_p7 }
 0x94e   :  { %p4297_p10 = pnand %p4296_p9, %p4290_p6 }
 0xa11   :  { %v2383_v6 = vpop.f32.mrb[30].mxu1 }
 0xa12   :  { %v2384_v21 = vadd.f32 %v4156_v19, %v2383_v6  ;;  %v3340_v44 = vpop.f32.mrb[31].mxu1 }
 0xa14   :  { %2388 = vst [vmem:[#allocation12 + $0x38] sm:$0xff] %v2384_v21 }
 0xa15   :  { %4300 = shalt.err (!%p4297_p10)
}
 0xa16   :  { %s4301_s2 = scalar_lea.hbm %s5084_s7, 1024 }
 0xa17   :  { %p4302_p11 = scmp.ne.s32.totalorder %s5084_s7, %s4301_s2  ;;  %p4305_p12 = scmp.lt.u32.totalorder %s4301_s2, %s5084_s7 }
 0xa19   :  { %p4307_p13 = pnand %p4305_p12, %p4302_p11 }
 0xa1b   :  { %4310 = shalt.err (!%p4307_p13)
}
 0xa1c   :  { %2401 = dma.vmem_to_hbm [thread:$0]  %s2396_s16, 1024, %s5084_s7, [#allocation5], %s4326_s3, %s4326_s3, %s4327_s18  }
 0xa1d   :  { %4317 = dma.done.wait [#allocation5], 1024  }
 0xa1e   :  { %4318 = vsyncadd [#allocation5], 4294966272 }
 0xa1f   :  { %4319 = dma.done.wait [#allocation14], 128  }
 0xa20   :  { %4320 = vsyncadd [#allocation14], 4294967168 }
 0xa21   :  { %2418 = vsyncpa [#allocation4], 1 }
 0xa22   :  { %2419 = vsyncpa [#allocation7], 1 }
 0xa23   :  { %2420 = vsyncpa [#allocation10], 1 }
 0xa24   :  { %2421 = vsyncpa [#allocation5], 1 }
 0xa25   :  { %2422 = vsyncpa [#allocation14], 1 }

// kernel: tpu_custom_call.1
= control target key start
LH: loop header
LB: loop body
LE: loop exit
PB: predicated region body
PF: predicated region fallthrough
CT: control target
= control target key end

     0   :  { %14 = vsyncpa [#allocation4], 0  ;;  %s5077_s0 = inlined_call_operand.hbm [shape: f32[8,8,128], index: 0, kind: input, shape index: {}]   ;;  %s5078_s1 = inlined_call_operand.hbm [shape: f32[8,128], index: 1, kind: input, shape index: {}]   ;;  %s5079_s2 = inlined_call_operand.hbm [shape: f32[128,384], index: 2, kind: input, shape index: {}]   ;;  %s5080_s3 = inlined_call_operand.hbm [shape: f32[128,384], index: 3, kind: input, shape index: {}]   ;;  %s5081_s4 = inlined_call_operand.vmem [shape: f32[1,128], index: 4, kind: input, shape index: {}]   ;;  %s5082_s5 = inlined_call_operand.hbm [shape: f32[128,128], index: 5, kind: input, shape index: {}]   ;;  %s5083_s6 = inlined_call_operand.vmem [shape: f32[1,128], index: 6, kind: input, shape index: {}]   ;;  %s5084_s7 = inlined_call_operand.hbm [shape: f32[8,8,128], index: 7, kind: output, shape index: {0}]   ;;  %s5085_s8 = inlined_call_operand.hbm [shape: f32[8,128], index: 8, kind: output, shape index: {1}]  }
   0x1   :  { %15 = vsyncpa [#allocation7], 0 }
   0x2   :  { %16 = vsyncpa [#allocation10], 0 }
   0x3   :  { %17 = vsyncpa [#allocation5], 0 }
   0x4   :  { %18 = vsyncpa [#allocation14], 0  ;;  %s4321_s27 = smov [#allocation6]   ;;  %s4157_s9 = scalar_lea.hbm %s5078_s1, 128 }
   0x5   :  { %s37_s28 = sshll.u32 %s4321_s27, 4  ;;  %p4158_p0 = scmp.ne.s32.totalorder %s5078_s1, %s4157_s9  ;;  %s38_s28 = int_to_ptr.vmem [resolvable:$true] %s37_s28 }
   0x6   :  { %p4161_p1 = scmp.lt.u32.totalorder %s4157_s9, %s5078_s1 }
   0x8   :  { %p4163_p2 = pnand %p4161_p1, %p4158_p0 }
   0xa   :  { %4166 = shalt.err (!%p4163_p2)
}
   0xb   :  { %s4167_s14 = scalar_lea.vmem %s38_s28, 128  ;;  %p4172_p4 = scmp.lt.s32.totalorder %s38_s28, %s38_s28 }
   0xc   :  { %p4168_p3 = scmp.ne.s32.totalorder %s38_s28, %s4167_s14  ;;  %p4173_p5 = scmp.lt.s32.totalorder %s4167_s14, %s4167_s14 }
   0xe   :  { %p4174_p6 = por %p4173_p5, %p4172_p4 }
  0x10   :  { %p4175_p7 = pnand %p4174_p6, %p4168_p3 }
  0x12   :  { %4178 = shalt.err (!%p4175_p7)
}
  0x13   :  { %40 = dma.hbm_to_vmem [thread:$0]  %s5078_s1, 128, %s38_s28, [#allocation7]  }
  0x14   :  { %s4322_s17 = smov [#allocation9]   ;;  %s4323_s19 = smov [#allocation3]  }
  0x15   :  { %s58_s18 = sshll.u32 %s4322_s17, 4  ;;  %s24_s20 = sshll.u32 %s4323_s19, 4  ;;  %s59_s18 = int_to_ptr.vmem [resolvable:$true] %s58_s18  ;;  %s25_s20 = int_to_ptr.vmem [resolvable:$true] %s24_s20 }
  0x16   :  { %s4179_s23 = scalar_lea.hbm %s5080_s3, 6144 }
  0x17   :  { %p4180_p8 = scmp.ne.s32.totalorder %s5080_s3, %s4179_s23  ;;  %p4183_p9 = scmp.lt.u32.totalorder %s4179_s23, %s5080_s3 }
  0x19   :  { %p4185_p10 = pnand %p4183_p9, %p4180_p8 }
  0x1b   :  { %4188 = shalt.err (!%p4185_p10)
}
  0x1c   :  { %s4189_s1 = scalar_lea.vmem %s59_s18, 6144  ;;  %p4194_p12 = scmp.lt.s32.totalorder %s59_s18, %s59_s18 }
  0x1d   :  { %p4190_p11 = scmp.ne.s32.totalorder %s59_s18, %s4189_s1  ;;  %p4195_p13 = scmp.lt.s32.totalorder %s4189_s1, %s4189_s1 }
  0x1f   :  { %p4196_p0 = por %p4195_p13, %p4194_p12 }
  0x21   :  { %p4197_p1 = pnand %p4196_p0, %p4190_p11 }
  0x23   :  { %4200 = shalt.err (!%p4197_p1)
}
  0x24   :  { %s4324_s28 = smov 384   ;;  %s4325_s29 = smov 24  }
  0x25   :  { %64 = dma.hbm_to_vmem [thread:$0]  %s5080_s3, 6144, %s59_s18, [#allocation10], %s4324_s28, %s4324_s28, %s4325_s29  }
  0x26   :  { %s4201_s12 = scalar_lea.hbm %s5077_s0, 1024 }
  0x27   :  { %p4202_p2 = scmp.ne.s32.totalorder %s5077_s0, %s4201_s12  ;;  %p4205_p3 = scmp.lt.u32.totalorder %s4201_s12, %s5077_s0 }
  0x29   :  { %p4207_p4 = pnand %p4205_p3, %p4202_p2 }
  0x2b   :  { %4210 = shalt.err (!%p4207_p4)
}
  0x2c   :  { %s4211_s17 = scalar_lea.vmem %s25_s20, 1024  ;;  %p4216_p6 = scmp.lt.s32.totalorder %s25_s20, %s25_s20 }
  0x2d   :  { %p4212_p5 = scmp.ne.s32.totalorder %s25_s20, %s4211_s17  ;;  %p4217_p7 = scmp.lt.s32.totalorder %s4211_s17, %s4211_s17 }
  0x2f   :  { %p4218_p8 = por %p4217_p7, %p4216_p6 }
  0x31   :  { %p4219_p9 = pnand %p4218_p8, %p4212_p5 }
  0x33   :  { %4222 = shalt.err (!%p4219_p9)
}
  0x34   :  { %s4326_s3 = smov 128   ;;  %s4327_s18 = smov 8  }
  0x35   :  { %30 = dma.hbm_to_vmem [thread:$0]  %s5077_s0, 1024, %s25_s20, [#allocation4], %s4326_s3, %s4326_s3, %s4327_s18  }
  0x36   :  { %s4328_s22 = smov [#allocation8]   ;;  %s4329_s24 = smov [#allocation11]  }
  0x37   :  { %s46_s23 = sshll.u32 %s4328_s22, 4  ;;  %s72_s25 = sshll.u32 %s4329_s24, 4  ;;  %s47_s23 = int_to_ptr.vmem [resolvable:$true] %s46_s23  ;;  %s73_s25 = int_to_ptr.vmem [resolvable:$true] %s72_s25 }
  0x38   :  { %s4223_s1 = scalar_lea.hbm %s5079_s2, 6144 }
  0x39   :  { %p4224_p10 = scmp.ne.s32.totalorder %s5079_s2, %s4223_s1  ;;  %p4227_p11 = scmp.lt.u32.totalorder %s4223_s1, %s5079_s2 }
  0x3b   :  { %p4229_p12 = pnand %p4227_p11, %p4224_p10 }
  0x3d   :  { %4232 = shalt.err (!%p4229_p12)
}
  0x3e   :  { %s4233_s0 = scalar_lea.vmem %s47_s23, 6144  ;;  %p4238_p0 = scmp.lt.s32.totalorder %s47_s23, %s47_s23 }
  0x3f   :  { %p4234_p13 = scmp.ne.s32.totalorder %s47_s23, %s4233_s0  ;;  %p4239_p1 = scmp.lt.s32.totalorder %s4233_s0, %s4233_s0 }
  0x41   :  { %p4240_p2 = por %p4239_p1, %p4238_p0 }
  0x43   :  { %p4241_p3 = pnand %p4240_p2, %p4234_p13 }
  0x45   :  { %4244 = shalt.err (!%p4241_p3)
}
  0x46   :  { %52 = dma.hbm_to_vmem [thread:$0]  %s5079_s2, 6144, %s47_s23, [#allocation7], %s4324_s28, %s4324_s28, %s4325_s29  }
  0x47   :  { %s4245_s15 = scalar_lea.hbm %s5082_s5, 2048 }
  0x48   :  { %p4246_p4 = scmp.ne.s32.totalorder %s5082_s5, %s4245_s15  ;;  %p4249_p5 = scmp.lt.u32.totalorder %s4245_s15, %s5082_s5 }
  0x4a   :  { %p4251_p6 = pnand %p4249_p5, %p4246_p4 }
  0x4c   :  { %4254 = shalt.err (!%p4251_p6)
}
  0x4d   :  { %s4255_s22 = scalar_lea.vmem %s73_s25, 2048  ;;  %p4260_p8 = scmp.lt.s32.totalorder %s73_s25, %s73_s25 }
  0x4e   :  { %p4256_p7 = scmp.ne.s32.totalorder %s73_s25, %s4255_s22  ;;  %p4261_p9 = scmp.lt.s32.totalorder %s4255_s22, %s4255_s22 }
  0x50   :  { %p4262_p10 = por %p4261_p9, %p4260_p8 }
  0x52   :  { %p4263_p11 = pnand %p4262_p10, %p4256_p7 }
  0x54   :  { %4266 = shalt.err (!%p4263_p11)
}
  0x55   :  { %78 = dma.hbm_to_vmem [thread:$0]  %s5082_s5, 2048, %s73_s25, [#allocation10], %s4326_s3, %s4326_s3, %s4327_s18  }
  0x56   :  { %4311 = dma.done.wait [#allocation4], 1024  }
  0x57   :  { %4312 = vsyncadd [#allocation4], 4294966272 }
  0x58   :  { %4313 = dma.done.wait [#allocation7], 6272  }
  0x59   :  { %4314 = vsyncadd [#allocation7], 4294961024 }
  0x5a   :  { %4315 = dma.done.wait [#allocation10], 8192  }
  0x5b   :  { %4316 = vsyncadd [#allocation10], 4294959104  ;;  %v4330_v0 = vmov 0.0   ;;  %v111_v1 = vld [vmem:[#allocation8 + $0x8] sm:$0xff]  ;;  %v114_v2 = vld [vmem:[#allocation8 + $0x20] sm:$0xff]  ;;  %vm4332_vm0 = vmmov 0  }
  0x5c   :  { %222 = vmatprep.mubr.f32.mxu0 %v4330_v0  ;;  %v110_v3 = vld [vmem:[#allocation8] sm:$0xff]  ;;  %v3341_v4 = vpack.c.bf16 %v114_v2, %v111_v1  ;;  %v113_v5 = vld [vmem:[#allocation8 + $0x18] sm:$0xff]  ;;  %v120_v7 = vld [vmem:[#allocation8 + $0x50] sm:$0xff]  ;;  %s4333_s27 = smov [#allocation13]  }
  0x5d   :  { %v117_v6 = vld [vmem:[#allocation8 + $0x38] sm:$0xff]  ;;  %v3343_v8 = vpack.c.bf16 %v113_v5, %v110_v3  ;;  %v116_v10 = vld [vmem:[#allocation8 + $0x30] sm:$0xff]  ;;  %v119_v11 = vld [vmem:[#allocation8 + $0x48] sm:$0xff]  ;;  %s2408_s1 = sshll.u32 %s4333_s27, 4  ;;  %s2409_s1 = int_to_ptr.vmem [resolvable:$true] %s2408_s1 }
  0x5e   :  { %v3345_v9 = vpack.c.bf16 %v120_v7, %v117_v6  ;;  %v123_v12 = vld [vmem:[#allocation8 + $0x68] sm:$0xff]  ;;  %3342 = vmatprep.subr.bf16.mxu0 %v3341_v4  ;;  %v126_v13 = vld [vmem:[#allocation8 + $0x80] sm:$0xff]  ;;  %v3347_v14 = vpack.c.bf16 %v119_v11, %v116_v10  ;;  %v125_v17 = vld [vmem:[#allocation8 + $0x78] sm:$0xff]  ;;  %p4272_p13 = scmp.lt.s32.totalorder %s2409_s1, %s2409_s1 }
  0x5f   :  { %3344 = vmatpush1.bf16.msra.mxu0 %v3343_v8  ;;  %v3349_v15 = vpack.c.bf16 %v126_v13, %v123_v12  ;;  %v122_v16 = vld [vmem:[#allocation8 + $0x60] sm:$0xff]  ;;  %v129_v18 = vld [vmem:[#allocation8 + $0x98] sm:$0xff]  ;;  %v132_v19 = vld [vmem:[#allocation8 + $0xb0] sm:$0xff] }
  0x60   :  { %3346 = vmatprep.subr.bf16.mxu0 %v3345_v9  ;;  %v3351_v20 = vpack.c.bf16 %v125_v17, %v122_v16  ;;  %v112_v21 = vld [vmem:[#allocation8 + $0x10] sm:$0xff]  ;;  %v3353_v22 = vpack.c.bf16 %v132_v19, %v129_v18  ;;  %v131_v24 = vld [vmem:[#allocation8 + $0xa8] sm:$0xff]  ;;  %v138_v27 = vld [vmem:[#allocation8 + $0xe0] sm:$0xff] }
  0x61   :  { %v128_v23 = vld [vmem:[#allocation8 + $0x90] sm:$0xff]  ;;  %v115_v25 = vld [vmem:[#allocation8 + $0x28] sm:$0xff]  ;;  %v118_v29 = vld [vmem:[#allocation8 + $0x40] sm:$0xff] }
  0x62   :  { %v135_v26 = vld [vmem:[#allocation8 + $0xc8] sm:$0xff]  ;;  %v3373_v28 = vpack.c.bf16 %v115_v25, %v112_v21  ;;  %v121_v30 = vld [vmem:[#allocation8 + $0x58] sm:$0xff]  ;;  %v3355_v31 = vpack.c.bf16 %v131_v24, %v128_v23  ;;  %v124_v33 = vld [vmem:[#allocation8 + $0x70] sm:$0xff] }
  0x63   :  { %3348 = vmatpush1.bf16.msra.mxu0 %v3347_v14  ;;  %v3377_v32 = vpack.c.bf16 %v121_v30, %v118_v29  ;;  %v127_v34 = vld [vmem:[#allocation8 + $0x88] sm:$0xff]  ;;  %v3357_v35 = vpack.c.bf16 %v138_v27, %v135_v26  ;;  %v134_v36 = vld [vmem:[#allocation8 + $0xc0] sm:$0xff]  ;;  %v137_v37 = vld [vmem:[#allocation8 + $0xd8] sm:$0xff] }
  0x64   :  { %3350 = vmatprep.subr.bf16.mxu0 %v3349_v15  ;;  %3374 = vmatprep.subr.bf16.mxu1 %v3373_v28  ;;  %v4453_v38 = vld [vmem:[#allocation3] sm:$0xff]  ;;  %v144_v40 = vld [vmem:[#allocation8 + $0x110] sm:$0xff]  ;;  %v3381_v41 = vpack.c.bf16 %v127_v34, %v124_v33  ;;  %v130_v42 = vld [vmem:[#allocation8 + $0xa0] sm:$0xff]  ;;  %v3359_v44 = vpack.c.bf16 %v137_v37, %v134_v36 }
  0x65   :  { %3376 = vmatpush3.bf16.msra.mxu1 %v3373_v28  ;;  %v141_v39 = vld [vmem:[#allocation8 + $0xf8] sm:$0xff]  ;;  %2769 = vmatprep.mubr.f32.mxu1 %v4453_v38  ;;  %v140_v46 = vld [vmem:[#allocation8 + $0xf0] sm:$0xff]  ;;  %v143_v47 = vld [vmem:[#allocation8 + $0x108] sm:$0xff] }
  0x66   :  { %3378 = vmatprep.subr.bf16.mxu1 %v3377_v32  ;;  %v133_v43 = vld [vmem:[#allocation8 + $0xb8] sm:$0xff]  ;;  %v3361_v45 = vpack.c.bf16 %v144_v40, %v141_v39  ;;  %v147_v48 = vld [vmem:[#allocation8 + $0x128] sm:$0xff]  ;;  %v150_v49 = vld [vmem:[#allocation8 + $0x140] sm:$0xff]  ;;  %v3363_v53 = vpack.c.bf16 %v143_v47, %v140_v46  ;;  %v4331_v40 = vmov 0.0|0.0  }
  0x67   :  { %3352 = vmatpush1.bf16.msra.mxu0 %v3351_v20  ;;  %v3385_v50 = vpack.c.bf16 %v133_v43, %v130_v42  ;;  %v136_v51 = vld [vmem:[#allocation8 + $0xd0] sm:$0xff]  ;;  %v139_v52 = vld [vmem:[#allocation8 + $0xe8] sm:$0xff]  ;;  %v3365_v54 = vpack.c.bf16 %v150_v49, %v147_v48  ;;  %v146_v55 = vld [vmem:[#allocation8 + $0x120] sm:$0xff] }
  0x68   :  { %3354 = vmatprep.subr.bf16.mxu0 %v3353_v22  ;;  %v149_v56 = vld [vmem:[#allocation8 + $0x138] sm:$0xff]  ;;  %v156_v58 = vld [vmem:[#allocation8 + $0x170] sm:$0xff]  ;;  %v3389_v59 = vpack.c.bf16 %v139_v52, %v136_v51  ;;  %v142_v60 = vld [vmem:[#allocation8 + $0x100] sm:$0xff] }
  0x69   :  { %3380 = vmatpush3.bf16.msra.mxu1 %v3377_v32  ;;  %v153_v57 = vld [vmem:[#allocation8 + $0x158] sm:$0xff]  ;;  %v3367_v62 = vpack.c.bf16 %v149_v56, %v146_v55  ;;  %v152_v1 = vld [vmem:[#allocation8 + $0x150] sm:$0xff]  ;;  %v155_v2 = vld [vmem:[#allocation8 + $0x168] sm:$0xff] }
  0x6a   :  { %3382 = vmatprep.subr.bf16.mxu1 %v3381_v41  ;;  %v145_v61 = vld [vmem:[#allocation8 + $0x118] sm:$0xff]  ;;  %v3369_v63 = vpack.c.bf16 %v156_v58, %v153_v57  ;;  %v401_v3 = vld [vmem:[#allocation9 + $0x8] sm:$0xff]  ;;  %v404_v4 = vld [vmem:[#allocation9 + $0x20] sm:$0xff]  ;;  %v3371_v8 = vpack.c.bf16 %v155_v2, %v152_v1 }
  0x6b   :  { %3356 = vmatpush1.bf16.msra.mxu0 %v3355_v31  ;;  %v3393_v5 = vpack.c.bf16 %v145_v61, %v142_v60  ;;  %v148_v6 = vld [vmem:[#allocation8 + $0x130] sm:$0xff]  ;;  %v151_v7 = vld [vmem:[#allocation8 + $0x148] sm:$0xff]  ;;  %v4456_v9 = vpack.c.bf16 %v404_v4, %v401_v3  ;;  %v400_v10 = vld [vmem:[#allocation9] sm:$0xff] }
  0x6c   :  { %3358 = vmatprep.subr.bf16.mxu0 %v3357_v35  ;;  %v403_v11 = vld [vmem:[#allocation9 + $0x18] sm:$0xff]  ;;  %v410_v13 = vld [vmem:[#allocation9 + $0x50] sm:$0xff]  ;;  %v3397_v14 = vpack.c.bf16 %v151_v7, %v148_v6  ;;  %v154_v15 = vld [vmem:[#allocation8 + $0x160] sm:$0xff] }
  0x6d   :  { %3384 = vmatpush3.bf16.msra.mxu1 %v3381_v41  ;;  %v407_v12 = vld [vmem:[#allocation9 + $0x38] sm:$0xff]  ;;  %v4458_v17 = vpack.c.bf16 %v403_v11, %v400_v10  ;;  %v406_v19 = vld [vmem:[#allocation9 + $0x30] sm:$0xff]  ;;  %v409_v20 = vld [vmem:[#allocation9 + $0x48] sm:$0xff] }
  0x6e   :  { %3386 = vmatprep.subr.bf16.mxu1 %v3385_v50  ;;  %v157_v16 = vld [vmem:[#allocation8 + $0x178] sm:$0xff]  ;;  %v4461_v18 = vpack.c.bf16 %v410_v13, %v407_v12  ;;  %v413_v21 = vld [vmem:[#allocation9 + $0x68] sm:$0xff]  ;;  %v416_v22 = vld [vmem:[#allocation9 + $0x80] sm:$0xff]  ;;  %v4466_v25 = vpack.c.bf16 %v409_v20, %v406_v19 }
  0x6f   :  { %3360 = vmatpush1.bf16.msra.mxu0 %v3359_v44  ;;  %v3401_v23 = vpack.c.bf16 %v157_v16, %v154_v15  ;;  %v103_v24 = vld [vmem:[#allocation3 + $0x8] sm:$0xff]  ;;  %v4469_v26 = vpack.c.bf16 %v416_v22, %v413_v21  ;;  %v415_v28 = vld [vmem:[#allocation9 + $0x78] sm:$0xff]  ;;  %v422_v30 = vld [vmem:[#allocation9 + $0xb0] sm:$0xff] }
  0x70   :  { %3362 = vmatprep.subr.bf16.mxu0 %v3361_v45  ;;  %v412_v27 = vld [vmem:[#allocation9 + $0x60] sm:$0xff]  ;;  %v419_v29 = vld [vmem:[#allocation9 + $0x98] sm:$0xff]  ;;  %v402_v31 = vld [vmem:[#allocation9 + $0x10] sm:$0xff] }
  0x71   :  { %3388 = vmatpush3.bf16.msra.mxu1 %v3385_v50  ;;  %v405_v32 = vld [vmem:[#allocation9 + $0x28] sm:$0xff]  ;;  %v4473_v34 = vpack.c.bf16 %v415_v28, %v412_v27  ;;  %v4476_v35 = vpack.c.bf16 %v422_v30, %v419_v29  ;;  %v418_v36 = vld [vmem:[#allocation9 + $0x90] sm:$0xff]  ;;  %v428_v39 = vld [vmem:[#allocation9 + $0xe0] sm:$0xff] }
  0x72   :  { %3390 = vmatprep.subr.bf16.mxu1 %v3389_v59  ;;  %v104_v33 = vld [vmem:[#allocation3 + $0x10] sm:$0xff]  ;;  %v4479_v41 = vpack.c.bf16 %v405_v32, %v402_v31  ;;  %v408_v42 = vld [vmem:[#allocation9 + $0x40] sm:$0xff]  ;;  %v411_v43 = vld [vmem:[#allocation9 + $0x58] sm:$0xff] }
  0x73   :  { %3364 = vmatpush1.bf16.msra.mxu0 %v3363_v53  ;;  %v421_v37 = vld [vmem:[#allocation9 + $0xa8] sm:$0xff]  ;;  %v105_v44 = vld [vmem:[#allocation3 + $0x18] sm:$0xff]  ;;  %v424_v47 = vld [vmem:[#allocation9 + $0xc0] sm:$0xff]  ;;  %v4489_v51 = vpack.c.bf16 %v411_v43, %v408_v42 }
  0x74   :  { %3366 = vmatprep.subr.bf16.mxu0 %v3365_v54  ;;  %v4483_v45 = vpack.c.bf16 %v421_v37, %v418_v36  ;;  %v427_v48 = vld [vmem:[#allocation9 + $0xd8] sm:$0xff]  ;;  %v434_v50 = vld [vmem:[#allocation9 + $0x110] sm:$0xff]  ;;  %v417_v53 = vld [vmem:[#allocation9 + $0x88] sm:$0xff] }
  0x75   :  { %3392 = vmatpush3.bf16.msra.mxu1 %v3389_v59  ;;  %v431_v49 = vld [vmem:[#allocation9 + $0xf8] sm:$0xff]  ;;  %v414_v52 = vld [vmem:[#allocation9 + $0x70] sm:$0xff]  ;;  %v4494_v55 = vpack.c.bf16 %v427_v48, %v424_v47  ;;  %v433_v58 = vld [vmem:[#allocation9 + $0x108] sm:$0xff] }
  0x76   :  { %3394 = vmatprep.subr.bf16.mxu1 %v3393_v5  ;;  %v106_v54 = vld [vmem:[#allocation3 + $0x20] sm:$0xff]  ;;  %v4497_v56 = vpack.c.bf16 %v434_v50, %v431_v49  ;;  %v430_v57 = vld [vmem:[#allocation9 + $0xf0] sm:$0xff]  ;;  %v437_v59 = vld [vmem:[#allocation9 + $0x128] sm:$0xff]  ;;  %v4500_v61 = vpack.c.bf16 %v417_v53, %v414_v52 }
  0x77   :  { %3368 = vmatpush1.bf16.msra.mxu0 %v3367_v62  ;;  %v440_v60 = vld [vmem:[#allocation9 + $0x140] sm:$0xff]  ;;  %v4505_v2 = vpack.c.bf16 %v433_v58, %v430_v57  ;;  %v108_v3 = vld [vmem:[#allocation3 + $0x30] sm:$0xff]  ;;  %v439_v6 = vld [vmem:[#allocation9 + $0x138] sm:$0xff] }
  0x78   :  { %3370 = vmatprep.subr.bf16.mxu0 %v3369_v63  ;;  %v420_v62 = vld [vmem:[#allocation9 + $0xa0] sm:$0xff]  ;;  %v423_v63 = vld [vmem:[#allocation9 + $0xb8] sm:$0xff]  ;;  %v4508_v4 = vpack.c.bf16 %v440_v60, %v437_v59  ;;  %v426_v11 = vld [vmem:[#allocation9 + $0xd0] sm:$0xff] }
  0x79   :  { %3396 = vmatpush3.bf16.msra.mxu1 %v3393_v5  ;;  %v107_v1 = vld [vmem:[#allocation3 + $0x28] sm:$0xff]  ;;  %v443_v7 = vld [vmem:[#allocation9 + $0x158] sm:$0xff]  ;;  %v4511_v10 = vpack.c.bf16 %v423_v63, %v420_v62  ;;  %v429_v12 = vld [vmem:[#allocation9 + $0xe8] sm:$0xff] }
  0x7a   :  { %3398 = vmatprep.subr.bf16.mxu1 %v3397_v14  ;;  %v436_v5 = vld [vmem:[#allocation9 + $0x120] sm:$0xff]  ;;  %v442_v16 = vld [vmem:[#allocation9 + $0x150] sm:$0xff]  ;;  %v445_v19 = vld [vmem:[#allocation9 + $0x168] sm:$0xff]  ;;  %v4522_v20 = vpack.c.bf16 %v429_v12, %v426_v11 }
  0x7b   :  { %3372 = vmatpush1.bf16.msra.mxu0 %v3371_v8  ;;  %v446_v8 = vld [vmem:[#allocation9 + $0x170] sm:$0xff]  ;;  %v4516_v13 = vpack.c.bf16 %v439_v6, %v436_v5  ;;  %v432_v21 = vld [vmem:[#allocation9 + $0x100] sm:$0xff]  ;;  %v435_v22 = vld [vmem:[#allocation9 + $0x118] sm:$0xff] }
  0x7c   :  { %3406 = vmatprep.subr.bf16.mxu0 %v4456_v9  ;;  %v4519_v15 = vpack.c.bf16 %v446_v8, %v443_v7  ;;  %v438_v27 = vld [vmem:[#allocation9 + $0x130] sm:$0xff]  ;;  %v441_v28 = vld [vmem:[#allocation9 + $0x148] sm:$0xff]  ;;  %v4538_v29 = vld [vmem:[#allocation6] sm:$0xff] }
  0x7d   :  { %3400 = vmatpush3.bf16.msra.mxu1 %v3397_v14  ;;  %v109_v14 = vld [vmem:[#allocation3 + $0x38] sm:$0xff]  ;;  %v4542_v30 = vpack.c.bf16 %v441_v28, %v438_v27  ;;  %v444_v31 = vld [vmem:[#allocation9 + $0x160] sm:$0xff]  ;;  %v447_v32 = vld [vmem:[#allocation9 + $0x178] sm:$0xff] }
  0x7e   :  { %223 = vmatmul.mubr.f32.vlgmr.msra.gmra.mrb[0].mxu0 %v4453_v38  ;;  %3402 = vmatprep.subr.bf16.mxu1 %v3401_v23  ;;  %v425_v38 = vld [vmem:[#allocation9 + $0xc8] sm:$0xff]  ;;  %v448_v36 = vld [vmem:[#allocation11] sm:$0xff]  ;;  %v451_v42 = vld [vmem:[#allocation11 + $0x18] sm:$0xff] }
  0x7f   :  { %3408 = vmatpush1.bf16.msra.mxu0 %v4458_v17  ;;  %228 = vmatprep.mubr.f32.mxu0 %v4330_v0  ;;  %v4486_v46 = vpack.c.bf16 %v428_v39, %v425_v38  ;;  %v449_v37 = vld [vmem:[#allocation11 + $0x8] sm:$0xff]  ;;  %v450_v39 = vld [vmem:[#allocation11 + $0x10] sm:$0xff]  ;;  %v455_v50 = vld [vmem:[#allocation11 + $0x38] sm:$0xff] }
  0x80   :  { %3410 = vmatprep.subr.bf16.mxu0 %v4461_v18  ;;  %v4573_v38 = vpack.c.bf16 %v449_v37, %v448_v36  ;;  %v4577_v43 = vpack.c.bf16 %v451_v42, %v450_v39  ;;  %v453_v47 = vld [vmem:[#allocation11 + $0x28] sm:$0xff]  ;;  %v454_v49 = vld [vmem:[#allocation11 + $0x30] sm:$0xff]  ;;  %v456_v53 = vld [vmem:[#allocation11 + $0x40] sm:$0xff] }
  0x81   :  { %3404 = vmatpush3.bf16.msra.mxu1 %v3401_v23  ;;  %v4529_v23 = vpack.c.bf16 %v445_v19, %v442_v16  ;;  %v4585_v52 = vpack.c.bf16 %v455_v50, %v454_v49  ;;  %v458_v58 = vld [vmem:[#allocation11 + $0x50] sm:$0xff]  ;;  %v459_v59 = vld [vmem:[#allocation11 + $0x58] sm:$0xff]  ;;  %v460_v60 = vld [vmem:[#allocation11 + $0x60] sm:$0xff] }
  0x82   :  { %229 = vmatmul.mubr.f32.gmra.mrb[2].mxu0 %v103_v24  ;;  %3437 = vmatprep.subr.bf16.mxu1 %v4331_v40  ;;  %v4593_v62 = vpack.c.bf16 %v459_v59, %v458_v58  ;;  %v461_v63 = vld [vmem:[#allocation11 + $0x68] sm:$0xff]  ;;  %v463_v5 = vld [vmem:[#allocation11 + $0x78] sm:$0xff] }
  0x83   :  { %3412 = vmatpush1.bf16.msra.mxu0 %v4466_v25  ;;  %234 = vmatprep.mubr.f32.mxu0 %v4330_v0 }
  0x84   :  { %3414 = vmatprep.subr.bf16.mxu0 %v4469_v26  ;;  %2770 = vmatmul.mubr.f32.vlgmr.msra.gmra.mrb[0].mxu1 %v103_v24  ;;  %v4533_v24 = vpack.c.bf16 %v435_v22, %v432_v21 }
  0x85   :  { %3439 = vmatpush3.bf16.msra.mxu1 %v4479_v41  ;;  %2772 = vmatprep.mubr.f32.mxu1 %v104_v33 }
  0x86   :  { %235 = vmatmul.mubr.f32.gmra.mrb[4].mxu0 %v104_v33  ;;  %3440 = vmatprep.subr.bf16.mxu1 %v4331_v40  ;;  %v4549_v33 = vpack.c.bf16 %v447_v32, %v444_v31 }
  0x87   :  { %3416 = vmatpush1.bf16.msra.mxu0 %v4473_v34  ;;  %240 = vmatprep.mubr.f32.mxu0 %v4330_v0 }
  0x88   :  { %3418 = vmatprep.subr.bf16.mxu0 %v4476_v35  ;;  %2773 = vmatmul.mubr.f32.gmra.mrb[2].mxu1 %v105_v44 }
  0x89   :  { %3442 = vmatpush3.bf16.msra.mxu1 %v4489_v51  ;;  %2775 = vmatprep.mubr.f32.mxu1 %v106_v54 }
  0x8a   :  { %241 = vmatmul.mubr.f32.gmra.mrb[6].mxu0 %v105_v44  ;;  %3443 = vmatprep.subr.bf16.mxu1 %v4331_v40  ;;  %v452_v44 = vld [vmem:[#allocation11 + $0x20] sm:$0xff] }
  0x8b   :  { %3420 = vmatpush1.bf16.msra.mxu0 %v4483_v45  ;;  %246 = vmatprep.mubr.f32.mxu0 %v4330_v0  ;;  %v4580_v48 = vpack.c.bf16 %v453_v47, %v452_v44  ;;  %v4622_v44 = vld [vmem:[%s5081_s4] ss:$0 sm:$0xff] }
  0x8c   :  { %3422 = vmatprep.subr.bf16.mxu0 %v4486_v46  ;;  %2776 = vmatmul.mubr.f32.gmra.mrb[4].mxu1 %v107_v1 }
  0x8d   :  { %3445 = vmatpush3.bf16.msra.mxu1 %v4500_v61  ;;  %2778 = vmatprep.mubr.f32.mxu1 %v108_v3 }
  0x8e   :  { %247 = vmatmul.mubr.f32.gmra.mrb[8].mxu0 %v106_v54  ;;  %3446 = vmatprep.subr.bf16.mxu1 %v4331_v40  ;;  %v457_v54 = vld [vmem:[#allocation11 + $0x48] sm:$0xff] }
  0x8f   :  { %3424 = vmatpush1.bf16.msra.mxu0 %v4494_v55  ;;  %252 = vmatprep.mubr.f32.mxu0 %v4330_v0  ;;  %v4589_v57 = vpack.c.bf16 %v457_v54, %v456_v53 }
  0x90   :  { %3426 = vmatprep.subr.bf16.mxu0 %v4497_v56  ;;  %2779 = vmatmul.mubr.f32.gmra.mrb[6].mxu1 %v109_v14 }
  0x91   :  { %3448 = vmatpush3.bf16.msra.mxu1 %v4511_v10  ;;  %2813 = vmatprep.mubr.msk.f32.mxu1 %vm4332_vm0, %v4330_v0 }
  0x92   :  { %253 = vmatmul.mubr.f32.gmra.mrb[10].mxu0 %v107_v1  ;;  %3449 = vmatprep.subr.bf16.mxu1 %v4331_v40  ;;  %v4596_v1 = vpack.c.bf16 %v461_v63, %v460_v60 }
  0x93   :  { %3428 = vmatpush1.bf16.msra.mxu0 %v4505_v2  ;;  %258 = vmatprep.mubr.f32.mxu0 %v4330_v0 }
  0x94   :  { %3430 = vmatprep.subr.bf16.mxu0 %v4508_v4 }
  0x95   :  { %3451 = vmatpush3.bf16.msra.mxu1 %v4522_v20 }
  0x96   :  { %259 = vmatmul.mubr.f32.gmra.mrb[12].mxu0 %v108_v3  ;;  %3452 = vmatprep.subr.bf16.mxu1 %v4331_v40  ;;  %v462_v3 = vld [vmem:[#allocation11 + $0x70] sm:$0xff] }
  0x97   :  { %3432 = vmatpush1.bf16.msra.mxu0 %v4516_v13  ;;  %264 = vmatprep.mubr.f32.mxu0 %v4330_v0  ;;  %v4600_v6 = vpack.c.bf16 %v463_v5, %v462_v3 }
  0x98   :  { %3434 = vmatprep.subr.bf16.mxu0 %v4519_v15 }
  0x99   :  { %3454 = vmatpush3.bf16.msra.mxu1 %v4533_v24 }
  0x9a   :  { %265 = vmatmul.mubr.f32.gmra.mrb[14].mxu0 %v109_v14  ;;  %3455 = vmatprep.subr.bf16.mxu1 %v4331_v40 }
  0x9b   :  { %3436 = vmatpush1.bf16.msra.mxu0 %v4529_v23  ;;  %543 = vmatprep.mubr.f32.mxu0 %v4330_v0 }
  0x9c   :  { %3461 = vmatprep.subr.bf16.mxu0 %v4331_v40 }
  0x9d   :  { %3457 = vmatpush3.bf16.msra.mxu1 %v4542_v30 }
  0x9e   :  { %544 = vmatmul.mubr.f32.vlgmr.msra.gmra.mrb[0].mxu0 %v4538_v29  ;;  %3458 = vmatprep.subr.bf16.mxu1 %v4331_v40 }
  0x9f   :  { %2848 = vmatprep.mubr.msk.f32.mxu0 %vm4332_vm0, %v4330_v0  ;;  %3463 = vmatpush3.bf16.msra.mxu0 %v4573_v38 }
  0xa0   :  { %3464 = vmatprep.subr.bf16.mxu0 %v4331_v40 }
  0xa1   :  { %3460 = vmatpush3.bf16.msra.mxu1 %v4549_v33 }
  0xa2   :  { %3517 = vmatprep.subr.bf16.mxu1 %v4331_v40 }
  0xa3   :  { %3466 = vmatpush3.bf16.msra.mxu0 %v4577_v43 }
  0xa4   :  { %2814 = vmatmul.mubr.f32.vlgmr.msra.gmra.mrb[8].mxu1 %v4538_v29  ;;  %3467 = vmatprep.subr.bf16.mxu0 %v4331_v40 }
  0xa5   :  { %3519 = vmatpush3.bf16.msra.mxu1 %v4479_v41  ;;  %2883 = vmatprep.mubr.msk.f32.mxu1 %vm4332_vm0, %v4330_v0 }
  0xa6   :  { %3520 = vmatprep.subr.bf16.mxu1 %v4331_v40 }
  0xa7   :  { %3469 = vmatpush3.bf16.msra.mxu0 %v4580_v48 }
  0xa8   :  { %3470 = vmatprep.subr.bf16.mxu0 %v4331_v40 }
  0xa9   :  { %3522 = vmatpush3.bf16.msra.mxu1 %v4489_v51 }
  0xaa   :  { %3523 = vmatprep.subr.bf16.mxu1 %v4331_v40 }
  0xab   :  { %3472 = vmatpush3.bf16.msra.mxu0 %v4585_v52 }
  0xac   :  { %3473 = vmatprep.subr.bf16.mxu0 %v4331_v40 }
  0xad   :  { %3525 = vmatpush3.bf16.msra.mxu1 %v4500_v61 }
  0xae   :  { %3526 = vmatprep.subr.bf16.mxu1 %v4331_v40 }
  0xaf   :  { %3475 = vmatpush3.bf16.msra.mxu0 %v4589_v57 }
  0xb0   :  { %3476 = vmatprep.subr.bf16.mxu0 %v4331_v40 }
  0xb1   :  { %3528 = vmatpush3.bf16.msra.mxu1 %v4511_v10 }
  0xb2   :  { %3529 = vmatprep.subr.bf16.mxu1 %v4331_v40 }
  0xb3   :  { %3478 = vmatpush3.bf16.msra.mxu0 %v4593_v62 }
  0xb4   :  { %3479 = vmatprep.subr.bf16.mxu0 %v4331_v40 }
  0xb5   :  { %3531 = vmatpush3.bf16.msra.mxu1 %v4522_v20 }
  0xb6   :  { %3532 = vmatprep.subr.bf16.mxu1 %v4331_v40 }
  0xb7   :  { %3481 = vmatpush3.bf16.msra.mxu0 %v4596_v1 }
  0xb8   :  { %3482 = vmatprep.subr.bf16.mxu0 %v4331_v40 }
  0xb9   :  { %3534 = vmatpush3.bf16.msra.mxu1 %v4533_v24 }
  0xba   :  { %3535 = vmatprep.subr.bf16.mxu1 %v4331_v40 }
  0xbb   :  { %3484 = vmatpush3.bf16.msra.mxu0 %v4600_v6 }
  0xbc   :  { %3486 = vmatprep.subr.bf16.mxu0 %v4456_v9 }
  0xbd   :  { %3537 = vmatpush3.bf16.msra.mxu1 %v4542_v30 }
  0xbe   :  { %3538 = vmatprep.subr.bf16.mxu1 %v4331_v40 }
  0xc1   :  { %3540 = vmatpush3.bf16.msra.mxu1 %v4549_v33 }
  0xc2   :  { %3541 = vmatprep.subr.bf16.mxu1 %v4331_v40 }
 0x157   :  { %v4605_v7 = vpop.f32.mrb[0].mxu1 }
 0x158   :  { %v337_v8 = vpop.f32.mrb[1].mxu1 }
 0x15b   :  { %v4607_v11 = vpop.f32.mrb[2].mxu1 }
 0x15c   :  { %v4609_v12 = vpop.f32.mrb[3].mxu1 }
 0x15f   :  { %v4611_v14 = vpop.f32.mrb[4].mxu1 }
 0x160   :  { %v4613_v16 = vpop.f32.mrb[5].mxu1 }
 0x163   :  { %v4615_v19 = vpop.f32.mrb[6].mxu1 }
 0x164   :  { %v4617_v21 = vpop.f32.mrb[7].mxu1 }
 0x171   :  { %v545_v22 = vpop.f32.mrb[0].mxu0 }
 0x172   :  { %v2425_v27 = vmul.f32 -1.442695, %v545_v22  ;;  %v547_v28 = vpop.f32.mrb[1].mxu0 }
 0x173   :  { %v2426_v31 = vmul.f32 -1.442695, %v547_v28 }
 0x174   :  { %4075 = vpow2.f32 %v2425_v27 }
 0x175   :  { %4077 = vpow2.f32 %v2426_v31 }
 0x177   :  { %v616_v32 = vpop.f32.mrb[8].mxu1 }
 0x178   :  { %v2815_v36 = vpop.f32.mrb[9].mxu1  ;;  %v637_v49 = vadd.f32 %v4622_v44, %v616_v32 }
 0x17e   :  { %v4076_v37 = vpop.eup %4075 }
 0x17f   :  { %v627_v39 = vadd.f32 1.0, %v4076_v37  ;;  %v4078_v42 = vpop.eup %4077 }
 0x180   :  { %v634_v47 = vadd.f32 1.0, %v4078_v42 }
 0x181   :  { %4079 = vrcp.f32 %v627_v39 }
 0x182   :  { %4081 = vrcp.f32 %v634_v47 }
 0x18b   :  { %v4080_v50 = vpop.eup %4079 }
 0x18c   :  { %v638_v53 = vmul.f32 %v4080_v50, %v637_v49  ;;  %v4082_v58 = vpop.eup %4081 }
 0x18d   :  { %v641_v59 = vsub.f32 1.0, %v4082_v58  ;;  %v643_v3 = vmul.f32 %v4082_v58, %v4538_v29  ;;  %v4686_v29 = vld [vmem:[%s5083_s6] ss:$0 sm:$0xff] }
 0x18e   :  { %v639_v54 = vadd.f32 %v638_v53, %v337_v8 }
 0x190   :  { %4083 = vtanh.f32 %v639_v54 }
 0x19a   :  { %v4084_v60 = vpop.eup %4083 }
 0x19b   :  { %v642_v63 = vmul.f32 %v4084_v60, %v641_v59 }
 0x19d   :  { %v4626_v5 = vadd.f32 %v643_v3, %v642_v63 }
 0x19f   :  { %2849 = vmatmul.mubr.f32.vlgmr.msra.gmra.mrb[16].mxu0 %v4626_v5  ;;  %2884 = vmatmul.mubr.f32.vlgmr.msra.gmra.mrb[10].mxu1 %v4626_v5 }
 0x1a0   :  { %3488 = vmatpush1.bf16.msra.mxu0 %v4458_v17  ;;  %780 = vmatprep.mubr.f32.mxu0 %v4330_v0 }
 0x1a1   :  { %3490 = vmatprep.subr.bf16.mxu0 %v4461_v18  ;;  %3543 = vmatpush3.bf16.msra.mxu1 %v4573_v38 }
 0x1a2   :  { %3544 = vmatprep.subr.bf16.mxu1 %v4331_v40  ;;  %2918 = vmatprep.mubr.msk.f32.mxu1 %vm4332_vm0, %v4330_v0 }
 0x1a4   :  { %3492 = vmatpush1.bf16.msra.mxu0 %v4466_v25 }
 0x1a5   :  { %3494 = vmatprep.subr.bf16.mxu0 %v4469_v26  ;;  %3546 = vmatpush3.bf16.msra.mxu1 %v4577_v43 }
 0x1a6   :  { %3547 = vmatprep.subr.bf16.mxu1 %v4331_v40 }
 0x1a8   :  { %3496 = vmatpush1.bf16.msra.mxu0 %v4473_v34 }
 0x1a9   :  { %3498 = vmatprep.subr.bf16.mxu0 %v4476_v35  ;;  %3549 = vmatpush3.bf16.msra.mxu1 %v4580_v48 }
 0x1aa   :  { %3550 = vmatprep.subr.bf16.mxu1 %v4331_v40 }
 0x1ac   :  { %3500 = vmatpush1.bf16.msra.mxu0 %v4483_v45 }
 0x1ad   :  { %3502 = vmatprep.subr.bf16.mxu0 %v4486_v46  ;;  %3552 = vmatpush3.bf16.msra.mxu1 %v4585_v52 }
 0x1ae   :  { %3553 = vmatprep.subr.bf16.mxu1 %v4331_v40 }
 0x1b0   :  { %3504 = vmatpush1.bf16.msra.mxu0 %v4494_v55 }
 0x1b1   :  { %3506 = vmatprep.subr.bf16.mxu0 %v4497_v56  ;;  %3555 = vmatpush3.bf16.msra.mxu1 %v4589_v57 }
 0x1b2   :  { %3556 = vmatprep.subr.bf16.mxu1 %v4331_v40 }
 0x1b4   :  { %3508 = vmatpush1.bf16.msra.mxu0 %v4505_v2 }
 0x1b5   :  { %3510 = vmatprep.subr.bf16.mxu0 %v4508_v4  ;;  %3558 = vmatpush3.bf16.msra.mxu1 %v4593_v62 }
 0x1b6   :  { %3559 = vmatprep.subr.bf16.mxu1 %v4331_v40 }
 0x1b8   :  { %3512 = vmatpush1.bf16.msra.mxu0 %v4516_v13 }
 0x1b9   :  { %3514 = vmatprep.subr.bf16.mxu0 %v4519_v15  ;;  %3561 = vmatpush3.bf16.msra.mxu1 %v4596_v1 }
 0x1ba   :  { %3562 = vmatprep.subr.bf16.mxu1 %v4331_v40 }
 0x1bc   :  { %3516 = vmatpush1.bf16.msra.mxu0 %v4529_v23 }
 0x1bd   :  { %3566 = vmatprep.subr.bf16.mxu0 %v4456_v9  ;;  %3564 = vmatpush3.bf16.msra.mxu1 %v4600_v6 }
 0x1be   :  { %3597 = vmatprep.subr.bf16.mxu1 %v4331_v40 }
 0x1bf   :  { %781 = vmatmul.mubr.f32.vlgmr.msra.gmra.mrb[2].mxu0 %v4626_v5 }
 0x1c0   :  { %3568 = vmatpush1.bf16.msra.mxu0 %v4458_v17  ;;  %1019 = vmatprep.mubr.f32.mxu0 %v4330_v0 }
 0x1c1   :  { %3570 = vmatprep.subr.bf16.mxu0 %v4461_v18 }
 0x1c4   :  { %3572 = vmatpush1.bf16.msra.mxu0 %v4466_v25 }
 0x1c5   :  { %3574 = vmatprep.subr.bf16.mxu0 %v4469_v26 }
 0x1c8   :  { %3576 = vmatpush1.bf16.msra.mxu0 %v4473_v34 }
 0x1c9   :  { %3578 = vmatprep.subr.bf16.mxu0 %v4476_v35 }
 0x1cc   :  { %3580 = vmatpush1.bf16.msra.mxu0 %v4483_v45 }
 0x1cd   :  { %3582 = vmatprep.subr.bf16.mxu0 %v4486_v46 }
 0x1d0   :  { %3584 = vmatpush1.bf16.msra.mxu0 %v4494_v55 }
 0x1d1   :  { %3586 = vmatprep.subr.bf16.mxu0 %v4497_v56 }
 0x1d4   :  { %3588 = vmatpush1.bf16.msra.mxu0 %v4505_v2 }
 0x1d5   :  { %3590 = vmatprep.subr.bf16.mxu0 %v4508_v4 }
 0x1d8   :  { %3592 = vmatpush1.bf16.msra.mxu0 %v4516_v13 }
 0x1d9   :  { %3594 = vmatprep.subr.bf16.mxu0 %v4519_v15 }
 0x1dc   :  { %3596 = vmatpush1.bf16.msra.mxu0 %v4529_v23 }
 0x1dd   :  { %3621 = vmatprep.subr.bf16.mxu0 %v4331_v40 }
 0x272   :  { %v711_v8 = vpop.f32.mrb[16].mxu0  ;;  %v853_v22 = vpop.f32.mrb[10].mxu1 }
 0x273   :  { %v712_v27 = vadd.f32 %v4686_v29, %v711_v8  ;;  %v2850_v28 = vpop.f32.mrb[17].mxu0  ;;  %v2885_v31 = vpop.f32.mrb[11].mxu1  ;;  %v875_v53 = vadd.f32 %v4622_v44, %v853_v22 }
 0x275   :  { %715 = vst [vmem:[#allocation12] sm:$0xff] %v712_v27 }
 0x292   :  { %v782_v32 = vpop.f32.mrb[2].mxu0 }
 0x293   :  { %v2427_v36 = vmul.f32 -1.442695, %v782_v32  ;;  %v784_v37 = vpop.f32.mrb[3].mxu0 }
 0x294   :  { %v2428_v39 = vmul.f32 -1.442695, %v784_v37 }
 0x295   :  { %4085 = vpow2.f32 %v2427_v36 }
 0x296   :  { %4087 = vpow2.f32 %v2428_v39 }
 0x29f   :  { %v4086_v42 = vpop.eup %4085 }
 0x2a0   :  { %v865_v47 = vadd.f32 1.0, %v4086_v42  ;;  %v4088_v49 = vpop.eup %4087 }
 0x2a1   :  { %v872_v50 = vadd.f32 1.0, %v4088_v49 }
 0x2a2   :  { %4089 = vrcp.f32 %v865_v47 }
 0x2a3   :  { %4091 = vrcp.f32 %v872_v50 }
 0x2ac   :  { %v4090_v54 = vpop.eup %4089 }
 0x2ad   :  { %v876_v58 = vmul.f32 %v4090_v54, %v875_v53  ;;  %v4092_v60 = vpop.eup %4091 }
 0x2ae   :  { %v879_v63 = vsub.f32 1.0, %v4092_v60  ;;  %v881_v27 = vmul.f32 %v4092_v60, %v4626_v5 }
 0x2af   :  { %v877_v59 = vadd.f32 %v4605_v7, %v876_v58 }
 0x2b1   :  { %4093 = vtanh.f32 %v877_v59 }
 0x2bb   :  { %v4094_v3 = vpop.eup %4093 }
 0x2bc   :  { %v880_v8 = vmul.f32 %v4094_v3, %v879_v63 }
 0x2be   :  { %v4692_v28 = vadd.f32 %v881_v27, %v880_v8 }
 0x2c0   :  { %2919 = vmatmul.mubr.f32.vlgmr.msra.gmra.mrb[12].mxu1 %v4692_v28  ;;  %1020 = vmatmul.mubr.f32.vlgmr.msra.gmra.mrb[4].mxu0 %v4692_v28 }
 0x2c1   :  { %3599 = vmatpush3.bf16.msra.mxu1 %v4479_v41  ;;  %2953 = vmatprep.mubr.msk.f32.mxu1 %vm4332_vm0, %v4330_v0 }
 0x2c2   :  { %3600 = vmatprep.subr.bf16.mxu1 %v4331_v40  ;;  %3623 = vmatpush3.bf16.msra.mxu0 %v4573_v38 }
 0x2c3   :  { %3624 = vmatprep.subr.bf16.mxu0 %v4331_v40  ;;  %2988 = vmatprep.mubr.msk.f32.mxu0 %vm4332_vm0, %v4330_v0 }
 0x2c5   :  { %3602 = vmatpush3.bf16.msra.mxu1 %v4489_v51 }
 0x2c6   :  { %3603 = vmatprep.subr.bf16.mxu1 %v4331_v40  ;;  %3626 = vmatpush3.bf16.msra.mxu0 %v4577_v43 }
 0x2c7   :  { %3627 = vmatprep.subr.bf16.mxu0 %v4331_v40 }
 0x2c9   :  { %3605 = vmatpush3.bf16.msra.mxu1 %v4500_v61 }
 0x2ca   :  { %3606 = vmatprep.subr.bf16.mxu1 %v4331_v40  ;;  %3629 = vmatpush3.bf16.msra.mxu0 %v4580_v48 }
 0x2cb   :  { %3630 = vmatprep.subr.bf16.mxu0 %v4331_v40 }
 0x2cd   :  { %3608 = vmatpush3.bf16.msra.mxu1 %v4511_v10 }
 0x2ce   :  { %3609 = vmatprep.subr.bf16.mxu1 %v4331_v40  ;;  %3632 = vmatpush3.bf16.msra.mxu0 %v4585_v52 }
 0x2cf   :  { %3633 = vmatprep.subr.bf16.mxu0 %v4331_v40 }
 0x2d1   :  { %3611 = vmatpush3.bf16.msra.mxu1 %v4522_v20 }
 0x2d2   :  { %3612 = vmatprep.subr.bf16.mxu1 %v4331_v40  ;;  %3635 = vmatpush3.bf16.msra.mxu0 %v4589_v57 }
 0x2d3   :  { %3636 = vmatprep.subr.bf16.mxu0 %v4331_v40 }
 0x2d5   :  { %3614 = vmatpush3.bf16.msra.mxu1 %v4533_v24 }
 0x2d6   :  { %3615 = vmatprep.subr.bf16.mxu1 %v4331_v40  ;;  %3638 = vmatpush3.bf16.msra.mxu0 %v4593_v62 }
 0x2d7   :  { %3639 = vmatprep.subr.bf16.mxu0 %v4331_v40 }
 0x2d9   :  { %3617 = vmatpush3.bf16.msra.mxu1 %v4542_v30 }
 0x2da   :  { %3618 = vmatprep.subr.bf16.mxu1 %v4331_v40  ;;  %3641 = vmatpush3.bf16.msra.mxu0 %v4596_v1 }
 0x2db   :  { %3642 = vmatprep.subr.bf16.mxu0 %v4331_v40 }
 0x2dd   :  { %3620 = vmatpush3.bf16.msra.mxu1 %v4549_v33 }
 0x2de   :  { %3677 = vmatprep.subr.bf16.mxu1 %v4331_v40  ;;  %3644 = vmatpush3.bf16.msra.mxu0 %v4600_v6 }
 0x2df   :  { %3646 = vmatprep.subr.bf16.mxu0 %v4456_v9 }
 0x2e0   :  { %2954 = vmatmul.mubr.f32.vlgmr.msra.gmra.mrb[14].mxu1 %v4692_v28 }
 0x2e1   :  { %3679 = vmatpush3.bf16.msra.mxu1 %v4479_v41  ;;  %3023 = vmatprep.mubr.msk.f32.mxu1 %vm4332_vm0, %v4330_v0 }
 0x2e2   :  { %3680 = vmatprep.subr.bf16.mxu1 %v4331_v40 }
 0x2e5   :  { %3682 = vmatpush3.bf16.msra.mxu1 %v4489_v51 }
 0x2e6   :  { %3683 = vmatprep.subr.bf16.mxu1 %v4331_v40 }
 0x2e9   :  { %3685 = vmatpush3.bf16.msra.mxu1 %v4500_v61 }
 0x2ea   :  { %3686 = vmatprep.subr.bf16.mxu1 %v4331_v40 }
 0x2ed   :  { %3688 = vmatpush3.bf16.msra.mxu1 %v4511_v10 }
 0x2ee   :  { %3689 = vmatprep.subr.bf16.mxu1 %v4331_v40 }
 0x2f1   :  { %3691 = vmatpush3.bf16.msra.mxu1 %v4522_v20 }
 0x2f2   :  { %3692 = vmatprep.subr.bf16.mxu1 %v4331_v40 }
 0x2f5   :  { %3694 = vmatpush3.bf16.msra.mxu1 %v4533_v24 }
 0x2f6   :  { %3695 = vmatprep.subr.bf16.mxu1 %v4331_v40 }
 0x2f9   :  { %3697 = vmatpush3.bf16.msra.mxu1 %v4542_v30 }
 0x2fa   :  { %3698 = vmatprep.subr.bf16.mxu1 %v4331_v40 }
 0x2fd   :  { %3700 = vmatpush3.bf16.msra.mxu1 %v4549_v33 }
 0x2fe   :  { %3701 = vmatprep.subr.bf16.mxu1 %v4331_v40 }
 0x393   :  { %v949_v7 = vpop.f32.mrb[12].mxu1  ;;  %v1021_v5 = vpop.f32.mrb[4].mxu0 }
 0x394   :  { %v950_v22 = vadd.f32 %v4686_v29, %v949_v7  ;;  %v2920_v31 = vpop.f32.mrb[13].mxu1  ;;  %v1023_v32 = vpop.f32.mrb[5].mxu0  ;;  %v2429_v36 = vmul.f32 -1.442695, %v1021_v5 }
 0x395   :  { %v2430_v37 = vmul.f32 -1.442695, %v1023_v32 }
 0x396   :  { %954 = vst [vmem:[#allocation12 + $0x8] sm:$0xff] %v950_v22  ;;  %4095 = vpow2.f32 %v2429_v36 }
 0x397   :  { %4097 = vpow2.f32 %v2430_v37 }
 0x3a0   :  { %v4096_v39 = vpop.eup %4095 }
 0x3a1   :  { %v1104_v42 = vadd.f32 1.0, %v4096_v39  ;;  %v4098_v47 = vpop.eup %4097 }
 0x3a2   :  { %v1111_v49 = vadd.f32 1.0, %v4098_v47 }
 0x3a3   :  { %4099 = vrcp.f32 %v1104_v42 }
 0x3a4   :  { %4101 = vrcp.f32 %v1111_v49 }
 0x3ad   :  { %v4100_v58 = vpop.eup %4099 }
 0x3ae   :  { %v4102_v63 = vpop.eup %4101 }
 0x3af   :  { %v1118_v3 = vsub.f32 1.0, %v4102_v63  ;;  %v1120_v7 = vmul.f32 %v4102_v63, %v4692_v28 }
 0x3b3   :  { %v1092_v50 = vpop.f32.mrb[14].mxu1 }
 0x3b4   :  { %v1114_v53 = vadd.f32 %v4622_v44, %v1092_v50  ;;  %v2955_v54 = vpop.f32.mrb[15].mxu1 }
 0x3b6   :  { %v1115_v59 = vmul.f32 %v4100_v58, %v1114_v53 }
 0x3b8   :  { %v1116_v60 = vadd.f32 %v1115_v59, %v4609_v12 }
 0x3ba   :  { %4103 = vtanh.f32 %v1116_v60 }
 0x3c4   :  { %v4104_v8 = vpop.eup %4103 }
 0x3c5   :  { %v1119_v27 = vmul.f32 %v4104_v8, %v1118_v3 }
 0x3c7   :  { %v4755_v5 = vadd.f32 %v1120_v7, %v1119_v27 }
 0x3c9   :  { %2989 = vmatmul.mubr.f32.vlgmr.msra.gmra.mrb[18].mxu0 %v4755_v5  ;;  %3024 = vmatmul.mubr.f32.vlgmr.msra.gmra.mrb[16].mxu1 %v4755_v5 }
 0x3ca   :  { %3648 = vmatpush1.bf16.msra.mxu0 %v4458_v17  ;;  %1258 = vmatprep.mubr.f32.mxu0 %v4330_v0 }
 0x3cb   :  { %3650 = vmatprep.subr.bf16.mxu0 %v4461_v18  ;;  %3703 = vmatpush3.bf16.msra.mxu1 %v4573_v38 }
 0x3cc   :  { %3704 = vmatprep.subr.bf16.mxu1 %v4331_v40  ;;  %3058 = vmatprep.mubr.msk.f32.mxu1 %vm4332_vm0, %v4330_v0 }
 0x3ce   :  { %3652 = vmatpush1.bf16.msra.mxu0 %v4466_v25 }
 0x3cf   :  { %3654 = vmatprep.subr.bf16.mxu0 %v4469_v26  ;;  %3706 = vmatpush3.bf16.msra.mxu1 %v4577_v43 }
 0x3d0   :  { %3707 = vmatprep.subr.bf16.mxu1 %v4331_v40 }
 0x3d2   :  { %3656 = vmatpush1.bf16.msra.mxu0 %v4473_v34 }
 0x3d3   :  { %3658 = vmatprep.subr.bf16.mxu0 %v4476_v35  ;;  %3709 = vmatpush3.bf16.msra.mxu1 %v4580_v48 }
 0x3d4   :  { %3710 = vmatprep.subr.bf16.mxu1 %v4331_v40 }
 0x3d6   :  { %3660 = vmatpush1.bf16.msra.mxu0 %v4483_v45 }
 0x3d7   :  { %3662 = vmatprep.subr.bf16.mxu0 %v4486_v46  ;;  %3712 = vmatpush3.bf16.msra.mxu1 %v4585_v52 }
 0x3d8   :  { %3713 = vmatprep.subr.bf16.mxu1 %v4331_v40 }
 0x3da   :  { %3664 = vmatpush1.bf16.msra.mxu0 %v4494_v55 }
 0x3db   :  { %3666 = vmatprep.subr.bf16.mxu0 %v4497_v56  ;;  %3715 = vmatpush3.bf16.msra.mxu1 %v4589_v57 }
 0x3dc   :  { %3716 = vmatprep.subr.bf16.mxu1 %v4331_v40 }
 0x3de   :  { %3668 = vmatpush1.bf16.msra.mxu0 %v4505_v2 }
 0x3df   :  { %3670 = vmatprep.subr.bf16.mxu0 %v4508_v4  ;;  %3718 = vmatpush3.bf16.msra.mxu1 %v4593_v62 }
 0x3e0   :  { %3719 = vmatprep.subr.bf16.mxu1 %v4331_v40 }
 0x3e2   :  { %3672 = vmatpush1.bf16.msra.mxu0 %v4516_v13 }
 0x3e3   :  { %3674 = vmatprep.subr.bf16.mxu0 %v4519_v15  ;;  %3721 = vmatpush3.bf16.msra.mxu1 %v4596_v1 }
 0x3e4   :  { %3722 = vmatprep.subr.bf16.mxu1 %v4331_v40 }
 0x3e6   :  { %3676 = vmatpush1.bf16.msra.mxu0 %v4529_v23 }
 0x3e7   :  { %3726 = vmatprep.subr.bf16.mxu0 %v4456_v9  ;;  %3724 = vmatpush3.bf16.msra.mxu1 %v4600_v6 }
 0x3e8   :  { %3757 = vmatprep.subr.bf16.mxu1 %v4331_v40 }
 0x3e9   :  { %1259 = vmatmul.mubr.f32.vlgmr.msra.gmra.mrb[6].mxu0 %v4755_v5 }
 0x3ea   :  { %3728 = vmatpush1.bf16.msra.mxu0 %v4458_v17  ;;  %1497 = vmatprep.mubr.f32.mxu0 %v4330_v0 }
 0x3eb   :  { %3730 = vmatprep.subr.bf16.mxu0 %v4461_v18 }
 0x3ee   :  { %3732 = vmatpush1.bf16.msra.mxu0 %v4466_v25 }
 0x3ef   :  { %3734 = vmatprep.subr.bf16.mxu0 %v4469_v26 }
 0x3f2   :  { %3736 = vmatpush1.bf16.msra.mxu0 %v4473_v34 }
 0x3f3   :  { %3738 = vmatprep.subr.bf16.mxu0 %v4476_v35 }
 0x3f6   :  { %3740 = vmatpush1.bf16.msra.mxu0 %v4483_v45 }
 0x3f7   :  { %3742 = vmatprep.subr.bf16.mxu0 %v4486_v46 }
 0x3fa   :  { %3744 = vmatpush1.bf16.msra.mxu0 %v4494_v55 }
 0x3fb   :  { %3746 = vmatprep.subr.bf16.mxu0 %v4497_v56 }
 0x3fe   :  { %3748 = vmatpush1.bf16.msra.mxu0 %v4505_v2 }
 0x3ff   :  { %3750 = vmatprep.subr.bf16.mxu0 %v4508_v4 }
 0x402   :  { %3752 = vmatpush1.bf16.msra.mxu0 %v4516_v13 }
 0x403   :  { %3754 = vmatprep.subr.bf16.mxu0 %v4519_v15 }
 0x406   :  { %3756 = vmatpush1.bf16.msra.mxu0 %v4529_v23 }
 0x407   :  { %3781 = vmatprep.subr.bf16.mxu0 %v4331_v40 }
 0x49c   :  { %v1188_v12 = vpop.f32.mrb[18].mxu0  ;;  %v1331_v28 = vpop.f32.mrb[16].mxu1 }
 0x49d   :  { %v1189_v22 = vadd.f32 %v4686_v29, %v1188_v12  ;;  %v2990_v31 = vpop.f32.mrb[19].mxu0  ;;  %v3025_v32 = vpop.f32.mrb[17].mxu1  ;;  %v1353_v54 = vadd.f32 %v4622_v44, %v1331_v28 }
 0x49f   :  { %1193 = vst [vmem:[#allocation12 + $0x10] sm:$0xff] %v1189_v22 }
 0x4bc   :  { %v1260_v36 = vpop.f32.mrb[6].mxu0 }
 0x4bd   :  { %v2431_v37 = vmul.f32 -1.442695, %v1260_v36  ;;  %v1262_v39 = vpop.f32.mrb[7].mxu0 }
 0x4be   :  { %v2432_v42 = vmul.f32 -1.442695, %v1262_v39 }
 0x4bf   :  { %4105 = vpow2.f32 %v2431_v37 }
 0x4c0   :  { %4107 = vpow2.f32 %v2432_v42 }
 0x4c9   :  { %v4106_v47 = vpop.eup %4105 }
 0x4ca   :  { %v1343_v49 = vadd.f32 1.0, %v4106_v47  ;;  %v4108_v50 = vpop.eup %4107 }
 0x4cb   :  { %v1350_v53 = vadd.f32 1.0, %v4108_v50 }
 0x4cc   :  { %4109 = vrcp.f32 %v1343_v49 }
 0x4cd   :  { %4111 = vrcp.f32 %v1350_v53 }
 0x4d6   :  { %v4110_v58 = vpop.eup %4109 }
 0x4d7   :  { %v1354_v59 = vmul.f32 %v4110_v58, %v1353_v54  ;;  %v4112_v63 = vpop.eup %4111 }
 0x4d8   :  { %v1357_v3 = vsub.f32 1.0, %v4112_v63  ;;  %v1359_v7 = vmul.f32 %v4112_v63, %v4755_v5 }
 0x4d9   :  { %v1355_v60 = vadd.f32 %v4607_v11, %v1354_v59 }
 0x4db   :  { %4113 = vtanh.f32 %v1355_v60 }
 0x4e5   :  { %v4114_v8 = vpop.eup %4113 }
 0x4e6   :  { %v1358_v27 = vmul.f32 %v4114_v8, %v1357_v3 }
 0x4e8   :  { %v4816_v12 = vadd.f32 %v1359_v7, %v1358_v27 }
 0x4ea   :  { %3059 = vmatmul.mubr.f32.vlgmr.msra.gmra.mrb[18].mxu1 %v4816_v12  ;;  %1498 = vmatmul.mubr.f32.vlgmr.msra.gmra.mrb[8].mxu0 %v4816_v12 }
 0x4eb   :  { %3759 = vmatpush3.bf16.msra.mxu1 %v4479_v41  ;;  %3093 = vmatprep.mubr.msk.f32.mxu1 %vm4332_vm0, %v4330_v0 }
 0x4ec   :  { %3760 = vmatprep.subr.bf16.mxu1 %v4331_v40  ;;  %3783 = vmatpush3.bf16.msra.mxu0 %v4573_v38 }
 0x4ed   :  { %3784 = vmatprep.subr.bf16.mxu0 %v4331_v40  ;;  %3128 = vmatprep.mubr.msk.f32.mxu0 %vm4332_vm0, %v4330_v0 }
 0x4ef   :  { %3762 = vmatpush3.bf16.msra.mxu1 %v4489_v51 }
 0x4f0   :  { %3763 = vmatprep.subr.bf16.mxu1 %v4331_v40  ;;  %3786 = vmatpush3.bf16.msra.mxu0 %v4577_v43 }
 0x4f1   :  { %3787 = vmatprep.subr.bf16.mxu0 %v4331_v40 }
 0x4f3   :  { %3765 = vmatpush3.bf16.msra.mxu1 %v4500_v61 }
 0x4f4   :  { %3766 = vmatprep.subr.bf16.mxu1 %v4331_v40  ;;  %3789 = vmatpush3.bf16.msra.mxu0 %v4580_v48 }
 0x4f5   :  { %3790 = vmatprep.subr.bf16.mxu0 %v4331_v40 }
 0x4f7   :  { %3768 = vmatpush3.bf16.msra.mxu1 %v4511_v10 }
 0x4f8   :  { %3769 = vmatprep.subr.bf16.mxu1 %v4331_v40  ;;  %3792 = vmatpush3.bf16.msra.mxu0 %v4585_v52 }
 0x4f9   :  { %3793 = vmatprep.subr.bf16.mxu0 %v4331_v40 }
 0x4fb   :  { %3771 = vmatpush3.bf16.msra.mxu1 %v4522_v20 }
 0x4fc   :  { %3772 = vmatprep.subr.bf16.mxu1 %v4331_v40  ;;  %3795 = vmatpush3.bf16.msra.mxu0 %v4589_v57 }
 0x4fd   :  { %3796 = vmatprep.subr.bf16.mxu0 %v4331_v40 }
 0x4ff   :  { %3774 = vmatpush3.bf16.msra.mxu1 %v4533_v24 }
 0x500   :  { %3775 = vmatprep.subr.bf16.mxu1 %v4331_v40  ;;  %3798 = vmatpush3.bf16.msra.mxu0 %v4593_v62 }
 0x501   :  { %3799 = vmatprep.subr.bf16.mxu0 %v4331_v40 }
 0x503   :  { %3777 = vmatpush3.bf16.msra.mxu1 %v4542_v30 }
 0x504   :  { %3778 = vmatprep.subr.bf16.mxu1 %v4331_v40  ;;  %3801 = vmatpush3.bf16.msra.mxu0 %v4596_v1 }
 0x505   :  { %3802 = vmatprep.subr.bf16.mxu0 %v4331_v40 }
 0x507   :  { %3780 = vmatpush3.bf16.msra.mxu1 %v4549_v33 }
 0x508   :  { %3837 = vmatprep.subr.bf16.mxu1 %v4331_v40  ;;  %3804 = vmatpush3.bf16.msra.mxu0 %v4600_v6 }
 0x509   :  { %3806 = vmatprep.subr.bf16.mxu0 %v4456_v9 }
 0x50a   :  { %3094 = vmatmul.mubr.f32.vlgmr.msra.gmra.mrb[20].mxu1 %v4816_v12 }
 0x50b   :  { %3839 = vmatpush3.bf16.msra.mxu1 %v4479_v41  ;;  %3163 = vmatprep.mubr.msk.f32.mxu1 %vm4332_vm0, %v4330_v0 }
 0x50c   :  { %3840 = vmatprep.subr.bf16.mxu1 %v4331_v40 }
 0x50f   :  { %3842 = vmatpush3.bf16.msra.mxu1 %v4489_v51 }
 0x510   :  { %3843 = vmatprep.subr.bf16.mxu1 %v4331_v40 }
 0x513   :  { %3845 = vmatpush3.bf16.msra.mxu1 %v4500_v61 }
 0x514   :  { %3846 = vmatprep.subr.bf16.mxu1 %v4331_v40 }
 0x517   :  { %3848 = vmatpush3.bf16.msra.mxu1 %v4511_v10 }
 0x518   :  { %3849 = vmatprep.subr.bf16.mxu1 %v4331_v40 }
 0x51b   :  { %3851 = vmatpush3.bf16.msra.mxu1 %v4522_v20 }
 0x51c   :  { %3852 = vmatprep.subr.bf16.mxu1 %v4331_v40 }
 0x51f   :  { %3854 = vmatpush3.bf16.msra.mxu1 %v4533_v24 }
 0x520   :  { %3855 = vmatprep.subr.bf16.mxu1 %v4331_v40 }
 0x523   :  { %3857 = vmatpush3.bf16.msra.mxu1 %v4542_v30 }
 0x524   :  { %3858 = vmatprep.subr.bf16.mxu1 %v4331_v40 }
 0x527   :  { %3860 = vmatpush3.bf16.msra.mxu1 %v4549_v33 }
 0x528   :  { %3861 = vmatprep.subr.bf16.mxu1 %v4331_v40 }
 0x5bd   :  { %v1427_v11 = vpop.f32.mrb[18].mxu1  ;;  %v1499_v5 = vpop.f32.mrb[8].mxu0 }
 0x5be   :  { %v1428_v28 = vadd.f32 %v4686_v29, %v1427_v11  ;;  %v3060_v22 = vpop.f32.mrb[19].mxu1  ;;  %v1501_v31 = vpop.f32.mrb[9].mxu0  ;;  %v2433_v32 = vmul.f32 -1.442695, %v1499_v5 }
 0x5bf   :  { %v2434_v36 = vmul.f32 -1.442695, %v1501_v31 }
 0x5c0   :  { %1432 = vst [vmem:[#allocation12 + $0x18] sm:$0xff] %v1428_v28  ;;  %4115 = vpow2.f32 %v2433_v32 }
 0x5c1   :  { %4117 = vpow2.f32 %v2434_v36 }
 0x5ca   :  { %v4116_v37 = vpop.eup %4115 }
 0x5cb   :  { %v1582_v39 = vadd.f32 1.0, %v4116_v37  ;;  %v4118_v42 = vpop.eup %4117 }
 0x5cc   :  { %v1589_v47 = vadd.f32 1.0, %v4118_v42 }
 0x5cd   :  { %4119 = vrcp.f32 %v1582_v39 }
 0x5ce   :  { %4121 = vrcp.f32 %v1589_v47 }
 0x5d7   :  { %v4120_v54 = vpop.eup %4119 }
 0x5d8   :  { %v4122_v60 = vpop.eup %4121 }
 0x5d9   :  { %v1596_v63 = vsub.f32 1.0, %v4122_v60  ;;  %v1598_v27 = vmul.f32 %v4122_v60, %v4816_v12 }
 0x5dd   :  { %v1570_v49 = vpop.f32.mrb[20].mxu1 }
 0x5de   :  { %v1592_v50 = vadd.f32 %v4622_v44, %v1570_v49  ;;  %v3095_v53 = vpop.f32.mrb[21].mxu1 }
 0x5e0   :  { %v1593_v58 = vmul.f32 %v4120_v54, %v1592_v50 }
 0x5e2   :  { %v1594_v59 = vadd.f32 %v1593_v58, %v4613_v16 }
 0x5e4   :  { %4123 = vtanh.f32 %v1594_v59 }
 0x5ee   :  { %v4124_v3 = vpop.eup %4123 }
 0x5ef   :  { %v1597_v8 = vmul.f32 %v4124_v3, %v1596_v63 }
 0x5f1   :  { %v4879_v7 = vadd.f32 %v1598_v27, %v1597_v8 }
 0x5f3   :  { %3129 = vmatmul.mubr.f32.vlgmr.msra.gmra.mrb[20].mxu0 %v4879_v7  ;;  %3164 = vmatmul.mubr.f32.vlgmr.msra.gmra.mrb[22].mxu1 %v4879_v7 }
 0x5f4   :  { %3808 = vmatpush1.bf16.msra.mxu0 %v4458_v17  ;;  %1736 = vmatprep.mubr.f32.mxu0 %v4330_v0 }
 0x5f5   :  { %3810 = vmatprep.subr.bf16.mxu0 %v4461_v18  ;;  %3863 = vmatpush3.bf16.msra.mxu1 %v4573_v38 }
 0x5f6   :  { %3864 = vmatprep.subr.bf16.mxu1 %v4331_v40  ;;  %3198 = vmatprep.mubr.msk.f32.mxu1 %vm4332_vm0, %v4330_v0 }
 0x5f8   :  { %3812 = vmatpush1.bf16.msra.mxu0 %v4466_v25 }
 0x5f9   :  { %3814 = vmatprep.subr.bf16.mxu0 %v4469_v26  ;;  %3866 = vmatpush3.bf16.msra.mxu1 %v4577_v43 }
 0x5fa   :  { %3867 = vmatprep.subr.bf16.mxu1 %v4331_v40 }
 0x5fc   :  { %3816 = vmatpush1.bf16.msra.mxu0 %v4473_v34 }
 0x5fd   :  { %3818 = vmatprep.subr.bf16.mxu0 %v4476_v35  ;;  %3869 = vmatpush3.bf16.msra.mxu1 %v4580_v48 }
 0x5fe   :  { %3870 = vmatprep.subr.bf16.mxu1 %v4331_v40 }
 0x600   :  { %3820 = vmatpush1.bf16.msra.mxu0 %v4483_v45 }
 0x601   :  { %3822 = vmatprep.subr.bf16.mxu0 %v4486_v46  ;;  %3872 = vmatpush3.bf16.msra.mxu1 %v4585_v52 }
 0x602   :  { %3873 = vmatprep.subr.bf16.mxu1 %v4331_v40 }
 0x604   :  { %3824 = vmatpush1.bf16.msra.mxu0 %v4494_v55 }
 0x605   :  { %3826 = vmatprep.subr.bf16.mxu0 %v4497_v56  ;;  %3875 = vmatpush3.bf16.msra.mxu1 %v4589_v57 }
 0x606   :  { %3876 = vmatprep.subr.bf16.mxu1 %v4331_v40 }
 0x608   :  { %3828 = vmatpush1.bf16.msra.mxu0 %v4505_v2 }
 0x609   :  { %3830 = vmatprep.subr.bf16.mxu0 %v4508_v4  ;;  %3878 = vmatpush3.bf16.msra.mxu1 %v4593_v62 }
 0x60a   :  { %3879 = vmatprep.subr.bf16.mxu1 %v4331_v40 }
 0x60c   :  { %3832 = vmatpush1.bf16.msra.mxu0 %v4516_v13 }
 0x60d   :  { %3834 = vmatprep.subr.bf16.mxu0 %v4519_v15  ;;  %3881 = vmatpush3.bf16.msra.mxu1 %v4596_v1 }
 0x60e   :  { %3882 = vmatprep.subr.bf16.mxu1 %v4331_v40 }
 0x610   :  { %3836 = vmatpush1.bf16.msra.mxu0 %v4529_v23 }
 0x611   :  { %3886 = vmatprep.subr.bf16.mxu0 %v4456_v9  ;;  %3884 = vmatpush3.bf16.msra.mxu1 %v4600_v6 }
 0x612   :  { %3917 = vmatprep.subr.bf16.mxu1 %v4331_v40 }
 0x613   :  { %1737 = vmatmul.mubr.f32.vlgmr.msra.gmra.mrb[10].mxu0 %v4879_v7 }
 0x614   :  { %3888 = vmatpush1.bf16.msra.mxu0 %v4458_v17  ;;  %1975 = vmatprep.mubr.f32.mxu0 %v4330_v0 }
 0x615   :  { %3890 = vmatprep.subr.bf16.mxu0 %v4461_v18 }
 0x618   :  { %3892 = vmatpush1.bf16.msra.mxu0 %v4466_v25 }
 0x619   :  { %3894 = vmatprep.subr.bf16.mxu0 %v4469_v26 }
 0x61c   :  { %3896 = vmatpush1.bf16.msra.mxu0 %v4473_v34 }
 0x61d   :  { %3898 = vmatprep.subr.bf16.mxu0 %v4476_v35 }
 0x620   :  { %3900 = vmatpush1.bf16.msra.mxu0 %v4483_v45 }
 0x621   :  { %3902 = vmatprep.subr.bf16.mxu0 %v4486_v46 }
 0x624   :  { %3904 = vmatpush1.bf16.msra.mxu0 %v4494_v55 }
 0x625   :  { %3906 = vmatprep.subr.bf16.mxu0 %v4497_v56 }
 0x628   :  { %3908 = vmatpush1.bf16.msra.mxu0 %v4505_v2 }
 0x629   :  { %3910 = vmatprep.subr.bf16.mxu0 %v4508_v4 }
 0x62c   :  { %3912 = vmatpush1.bf16.msra.mxu0 %v4516_v13 }
 0x62d   :  { %3914 = vmatprep.subr.bf16.mxu0 %v4519_v15 }
 0x630   :  { %3916 = vmatpush1.bf16.msra.mxu0 %v4529_v23 }
 0x631   :  { %3941 = vmatprep.subr.bf16.mxu0 %v4331_v40 }
 0x6c6   :  { %v1666_v16 = vpop.f32.mrb[20].mxu0  ;;  %v1809_v12 = vpop.f32.mrb[22].mxu1 }
 0x6c7   :  { %v1667_v11 = vadd.f32 %v4686_v29, %v1666_v16  ;;  %v3130_v5 = vpop.f32.mrb[21].mxu0  ;;  %v3165_v28 = vpop.f32.mrb[23].mxu1  ;;  %v1831_v49 = vadd.f32 %v4622_v44, %v1809_v12 }
 0x6c9   :  { %1671 = vst [vmem:[#allocation12 + $0x20] sm:$0xff] %v1667_v11 }
 0x6e6   :  { %v1738_v22 = vpop.f32.mrb[10].mxu0 }
 0x6e7   :  { %v2435_v31 = vmul.f32 -1.442695, %v1738_v22  ;;  %v1740_v32 = vpop.f32.mrb[11].mxu0 }
 0x6e8   :  { %v2436_v36 = vmul.f32 -1.442695, %v1740_v32 }
 0x6e9   :  { %4125 = vpow2.f32 %v2435_v31 }
 0x6ea   :  { %4127 = vpow2.f32 %v2436_v36 }
 0x6f3   :  { %v4126_v37 = vpop.eup %4125 }
 0x6f4   :  { %v1821_v39 = vadd.f32 1.0, %v4126_v37  ;;  %v4128_v42 = vpop.eup %4127 }
 0x6f5   :  { %v1828_v47 = vadd.f32 1.0, %v4128_v42 }
 0x6f6   :  { %4129 = vrcp.f32 %v1821_v39 }
 0x6f7   :  { %4131 = vrcp.f32 %v1828_v47 }
 0x700   :  { %v4130_v50 = vpop.eup %4129 }
 0x701   :  { %v1832_v53 = vmul.f32 %v4130_v50, %v1831_v49  ;;  %v4132_v58 = vpop.eup %4131 }
 0x702   :  { %v1835_v59 = vsub.f32 1.0, %v4132_v58  ;;  %v1837_v3 = vmul.f32 %v4132_v58, %v4879_v7 }
 0x703   :  { %v1833_v54 = vadd.f32 %v4611_v14, %v1832_v53 }
 0x705   :  { %4133 = vtanh.f32 %v1833_v54 }
 0x70f   :  { %v4134_v60 = vpop.eup %4133 }
 0x710   :  { %v1836_v63 = vmul.f32 %v4134_v60, %v1835_v59 }
 0x712   :  { %v4940_v8 = vadd.f32 %v1837_v3, %v1836_v63 }
 0x714   :  { %3199 = vmatmul.mubr.f32.vlgmr.msra.gmra.mrb[24].mxu1 %v4940_v8  ;;  %1976 = vmatmul.mubr.f32.vlgmr.msra.gmra.mrb[12].mxu0 %v4940_v8 }
 0x715   :  { %3919 = vmatpush3.bf16.msra.mxu1 %v4479_v41  ;;  %3233 = vmatprep.mubr.msk.f32.mxu1 %vm4332_vm0, %v4330_v0 }
 0x716   :  { %3920 = vmatprep.subr.bf16.mxu1 %v4331_v40  ;;  %3943 = vmatpush3.bf16.msra.mxu0 %v4573_v38 }
 0x717   :  { %3944 = vmatprep.subr.bf16.mxu0 %v4331_v40  ;;  %3268 = vmatprep.mubr.msk.f32.mxu0 %vm4332_vm0, %v4330_v0 }
 0x719   :  { %3922 = vmatpush3.bf16.msra.mxu1 %v4489_v51 }
 0x71a   :  { %3923 = vmatprep.subr.bf16.mxu1 %v4331_v40  ;;  %3946 = vmatpush3.bf16.msra.mxu0 %v4577_v43 }
 0x71b   :  { %3947 = vmatprep.subr.bf16.mxu0 %v4331_v40 }
 0x71d   :  { %3925 = vmatpush3.bf16.msra.mxu1 %v4500_v61 }
 0x71e   :  { %3926 = vmatprep.subr.bf16.mxu1 %v4331_v40  ;;  %3949 = vmatpush3.bf16.msra.mxu0 %v4580_v48 }
 0x71f   :  { %3950 = vmatprep.subr.bf16.mxu0 %v4331_v40 }
 0x721   :  { %3928 = vmatpush3.bf16.msra.mxu1 %v4511_v10 }
 0x722   :  { %3929 = vmatprep.subr.bf16.mxu1 %v4331_v40  ;;  %3952 = vmatpush3.bf16.msra.mxu0 %v4585_v52 }
 0x723   :  { %3953 = vmatprep.subr.bf16.mxu0 %v4331_v40 }
 0x725   :  { %3931 = vmatpush3.bf16.msra.mxu1 %v4522_v20 }
 0x726   :  { %3932 = vmatprep.subr.bf16.mxu1 %v4331_v40  ;;  %3955 = vmatpush3.bf16.msra.mxu0 %v4589_v57 }
 0x727   :  { %3956 = vmatprep.subr.bf16.mxu0 %v4331_v40 }
 0x729   :  { %3934 = vmatpush3.bf16.msra.mxu1 %v4533_v24 }
 0x72a   :  { %3935 = vmatprep.subr.bf16.mxu1 %v4331_v40  ;;  %3958 = vmatpush3.bf16.msra.mxu0 %v4593_v62 }
 0x72b   :  { %3959 = vmatprep.subr.bf16.mxu0 %v4331_v40 }
 0x72d   :  { %3937 = vmatpush3.bf16.msra.mxu1 %v4542_v30 }
 0x72e   :  { %3938 = vmatprep.subr.bf16.mxu1 %v4331_v40  ;;  %3961 = vmatpush3.bf16.msra.mxu0 %v4596_v1 }
 0x72f   :  { %3962 = vmatprep.subr.bf16.mxu0 %v4331_v40 }
 0x731   :  { %3940 = vmatpush3.bf16.msra.mxu1 %v4549_v33 }
 0x732   :  { %3997 = vmatprep.subr.bf16.mxu1 %v4331_v40  ;;  %3964 = vmatpush3.bf16.msra.mxu0 %v4600_v6 }
 0x733   :  { %3966 = vmatprep.subr.bf16.mxu0 %v4456_v9 }
 0x734   :  { %3234 = vmatmul.mubr.f32.vlgmr.msra.gmra.mrb[26].mxu1 %v4940_v8 }
 0x735   :  { %3999 = vmatpush3.bf16.msra.mxu1 %v4479_v41  ;;  %3303 = vmatprep.mubr.msk.f32.mxu1 %vm4332_vm0, %v4330_v0 }
 0x736   :  { %4000 = vmatprep.subr.bf16.mxu1 %v4331_v40 }
 0x739   :  { %4002 = vmatpush3.bf16.msra.mxu1 %v4489_v51 }
 0x73a   :  { %4003 = vmatprep.subr.bf16.mxu1 %v4331_v40 }
 0x73d   :  { %4005 = vmatpush3.bf16.msra.mxu1 %v4500_v61 }
 0x73e   :  { %4006 = vmatprep.subr.bf16.mxu1 %v4331_v40 }
 0x741   :  { %4008 = vmatpush3.bf16.msra.mxu1 %v4511_v10 }
 0x742   :  { %4009 = vmatprep.subr.bf16.mxu1 %v4331_v40 }
 0x745   :  { %4011 = vmatpush3.bf16.msra.mxu1 %v4522_v20 }
 0x746   :  { %4012 = vmatprep.subr.bf16.mxu1 %v4331_v40 }
 0x749   :  { %4014 = vmatpush3.bf16.msra.mxu1 %v4533_v24 }
 0x74a   :  { %4015 = vmatprep.subr.bf16.mxu1 %v4331_v40 }
 0x74d   :  { %4017 = vmatpush3.bf16.msra.mxu1 %v4542_v30 }
 0x74e   :  { %4018 = vmatprep.subr.bf16.mxu1 %v4331_v40 }
 0x751   :  { %4020 = vmatpush3.bf16.msra.mxu1 %v4549_v33 }
 0x752   :  { %4021 = vmatprep.subr.bf16.mxu1 %v4331_v40 }
 0x7e7   :  { %v1905_v9 = vpop.f32.mrb[24].mxu1  ;;  %v1977_v41 = vpop.f32.mrb[12].mxu0 }
 0x7e8   :  { %v1906_v51 = vadd.f32 %v4686_v29, %v1905_v9  ;;  %v3200_v61 = vpop.f32.mrb[25].mxu1  ;;  %v1979_v10 = vpop.f32.mrb[13].mxu0  ;;  %v2437_v20 = vmul.f32 -1.442695, %v1977_v41 }
 0x7e9   :  { %v2438_v24 = vmul.f32 -1.442695, %v1979_v10 }
 0x7ea   :  { %1910 = vst [vmem:[#allocation12 + $0x28] sm:$0xff] %v1906_v51  ;;  %4135 = vpow2.f32 %v2437_v20 }
 0x7eb   :  { %4137 = vpow2.f32 %v2438_v24 }
 0x7f4   :  { %v4136_v14 = vpop.eup %4135 }
 0x7f5   :  { %v2060_v27 = vadd.f32 1.0, %v4136_v14  ;;  %v4138_v30 = vpop.eup %4137 }
 0x7f6   :  { %v2067_v7 = vadd.f32 1.0, %v4138_v30 }
 0x7f7   :  { %4139 = vrcp.f32 %v2060_v27 }
 0x7f8   :  { %4141 = vrcp.f32 %v2067_v7 }
 0x801   :  { %v4140_v11 = vpop.eup %4139 }
 0x802   :  { %v4142_v22 = vpop.eup %4141 }
 0x803   :  { %v2074_v31 = vsub.f32 1.0, %v4142_v22  ;;  %v2076_v37 = vmul.f32 %v4142_v22, %v4940_v8 }
 0x807   :  { %v2048_v16 = vpop.f32.mrb[26].mxu1 }
 0x808   :  { %v2070_v33 = vadd.f32 %v4622_v44, %v2048_v16  ;;  %v3235_v12 = vpop.f32.mrb[27].mxu1 }
 0x80a   :  { %v2071_v5 = vmul.f32 %v4140_v11, %v2070_v33 }
 0x80c   :  { %v2072_v28 = vadd.f32 %v2071_v5, %v4617_v21 }
 0x80e   :  { %4143 = vtanh.f32 %v2072_v28 }
 0x818   :  { %v4144_v32 = vpop.eup %4143 }
 0x819   :  { %v2075_v36 = vmul.f32 %v4144_v32, %v2074_v31 }
 0x81b   :  { %v5003_v39 = vadd.f32 %v2076_v37, %v2075_v36 }
 0x81d   :  { %3269 = vmatmul.mubr.f32.vlgmr.msra.gmra.mrb[22].mxu0 %v5003_v39  ;;  %3304 = vmatmul.mubr.f32.vlgmr.msra.gmra.mrb[28].mxu1 %v5003_v39 }
 0x81e   :  { %3968 = vmatpush1.bf16.msra.mxu0 %v4458_v17  ;;  %2214 = vmatprep.mubr.f32.mxu0 %v4330_v0 }
 0x81f   :  { %3970 = vmatprep.subr.bf16.mxu0 %v4461_v18  ;;  %4023 = vmatpush3.bf16.msra.mxu1 %v4573_v38 }
 0x820   :  { %4024 = vmatprep.subr.bf16.mxu1 %v4331_v40  ;;  %3338 = vmatprep.mubr.msk.f32.mxu1 %vm4332_vm0, %v4330_v0 }
 0x822   :  { %3972 = vmatpush1.bf16.msra.mxu0 %v4466_v25 }
 0x823   :  { %3974 = vmatprep.subr.bf16.mxu0 %v4469_v26  ;;  %4026 = vmatpush3.bf16.msra.mxu1 %v4577_v43 }
 0x824   :  { %4027 = vmatprep.subr.bf16.mxu1 %v4331_v40 }
 0x826   :  { %3976 = vmatpush1.bf16.msra.mxu0 %v4473_v34 }
 0x827   :  { %3978 = vmatprep.subr.bf16.mxu0 %v4476_v35  ;;  %4029 = vmatpush3.bf16.msra.mxu1 %v4580_v48 }
 0x828   :  { %4030 = vmatprep.subr.bf16.mxu1 %v4331_v40 }
 0x82a   :  { %3980 = vmatpush1.bf16.msra.mxu0 %v4483_v45 }
 0x82b   :  { %3982 = vmatprep.subr.bf16.mxu0 %v4486_v46  ;;  %4032 = vmatpush3.bf16.msra.mxu1 %v4585_v52 }
 0x82c   :  { %4033 = vmatprep.subr.bf16.mxu1 %v4331_v40 }
 0x82e   :  { %3984 = vmatpush1.bf16.msra.mxu0 %v4494_v55 }
 0x82f   :  { %3986 = vmatprep.subr.bf16.mxu0 %v4497_v56  ;;  %4035 = vmatpush3.bf16.msra.mxu1 %v4589_v57 }
 0x830   :  { %4036 = vmatprep.subr.bf16.mxu1 %v4331_v40 }
 0x832   :  { %3988 = vmatpush1.bf16.msra.mxu0 %v4505_v2 }
 0x833   :  { %3990 = vmatprep.subr.bf16.mxu0 %v4508_v4  ;;  %4038 = vmatpush3.bf16.msra.mxu1 %v4593_v62  ;;  %v4155_v4 = vld [vmem:[%s5081_s4] ss:$0 sm:$0xff]  ;;  %s4267_s4 = scalar_lea.vmem %s2409_s1, 128 }
 0x834   :  { %4039 = vmatprep.subr.bf16.mxu1 %v4331_v40  ;;  %p4268_p12 = scmp.ne.s32.totalorder %s2409_s1, %s4267_s4  ;;  %p4273_p0 = scmp.lt.s32.totalorder %s4267_s4, %s4267_s4 }
 0x836   :  { %3992 = vmatpush1.bf16.msra.mxu0 %v4516_v13  ;;  %p4274_p1 = por %p4273_p0, %p4272_p13 }
 0x837   :  { %3994 = vmatprep.subr.bf16.mxu0 %v4519_v15  ;;  %4041 = vmatpush3.bf16.msra.mxu1 %v4596_v1 }
 0x838   :  { %4042 = vmatprep.subr.bf16.mxu1 %v4331_v40  ;;  %p4275_p2 = pnand %p4274_p1, %p4268_p12 }
 0x83a   :  { %3996 = vmatpush1.bf16.msra.mxu0 %v4529_v23 }
 0x83b   :  { %4044 = vmatpush3.bf16.msra.mxu1 %v4600_v6 }
 0x83d   :  { %2215 = vmatmul.mubr.f32.vlgmr.msra.gmra.mrb[14].mxu0 %v5003_v39 }
 0x8f0   :  { %v2144_v0 = vpop.f32.mrb[22].mxu0  ;;  %v2287_v17 = vpop.f32.mrb[28].mxu1 }
 0x8f1   :  { %v2145_v18 = vadd.f32 %v4686_v29, %v2144_v0  ;;  %v3270_v25 = vpop.f32.mrb[23].mxu0  ;;  %v3305_v26 = vpop.f32.mrb[29].mxu1  ;;  %v2309_v13 = vadd.f32 %v4155_v4, %v2287_v17 }
 0x8f3   :  { %2149 = vst [vmem:[#allocation12 + $0x30] sm:$0xff] %v2145_v18 }
 0x910   :  { %v2216_v34 = vpop.f32.mrb[14].mxu0 }
 0x911   :  { %v2439_v35 = vmul.f32 -1.442695, %v2216_v34  ;;  %v2218_v45 = vpop.f32.mrb[15].mxu0 }
 0x912   :  { %v2440_v46 = vmul.f32 -1.442695, %v2218_v45 }
 0x913   :  { %4145 = vpow2.f32 %v2439_v35 }
 0x914   :  { %4147 = vpow2.f32 %v2440_v46 }
 0x91d   :  { %v4146_v40 = vpop.eup %4145 }
 0x91e   :  { %v2299_v55 = vadd.f32 1.0, %v4146_v40  ;;  %v4148_v56 = vpop.eup %4147 }
 0x91f   :  { %v2306_v2 = vadd.f32 1.0, %v4148_v56 }
 0x920   :  { %4149 = vrcp.f32 %v2299_v55 }
 0x921   :  { %4151 = vrcp.f32 %v2306_v2 }
 0x92a   :  { %v4150_v15 = vpop.eup %4149 }
 0x92b   :  { %v2310_v23 = vmul.f32 %v4150_v15, %v2309_v13  ;;  %v4152_v43 = vpop.eup %4151 }
 0x92c   :  { %v2313_v48 = vsub.f32 1.0, %v4152_v43  ;;  %v2315_v62 = vmul.f32 %v4152_v43, %v5003_v39 }
 0x92d   :  { %v2311_v38 = vadd.f32 %v4615_v19, %v2310_v23 }
 0x92f   :  { %4153 = vtanh.f32 %v2311_v38 }
 0x939   :  { %v4154_v52 = vpop.eup %4153 }
 0x93a   :  { %v2314_v57 = vmul.f32 %v4154_v52, %v2313_v48 }
 0x93c   :  { %v2316_v1 = vadd.f32 %v2315_v62, %v2314_v57 }
 0x93e   :  { %3339 = vmatmul.mubr.f32.vlgmr.msra.gmra.mrb[30].mxu1 %v2316_v1  ;;  %2389 = vst [vmem:[#allocation13] sm:$0xff] %v2316_v1 }
 0x93f   :  { %4278 = shalt.err (!%p4275_p2)
}
 0x940   :  { %s4279_s10 = scalar_lea.hbm %s5085_s8, 128 }
 0x941   :  { %p4280_p3 = scmp.ne.s32.totalorder %s5085_s8, %s4279_s10  ;;  %p4283_p4 = scmp.lt.u32.totalorder %s4279_s10, %s5085_s8 }
 0x943   :  { %p4285_p5 = pnand %p4283_p4, %p4280_p3 }
 0x945   :  { %4288 = shalt.err (!%p4285_p5)
}
 0x946   :  { %2411 = dma.vmem_to_hbm [thread:$0]  %s2409_s1, 128, %s5085_s8, [#allocation14]   ;;  %v4156_v19 = vld [vmem:[%s5083_s6] ss:$0 sm:$0xff] }
 0x947   :  { %s4334_s15 = smov [#allocation12]  }
 0x948   :  { %s2395_s16 = sshll.u32 %s4334_s15, 4  ;;  %s2396_s16 = int_to_ptr.vmem [resolvable:$true] %s2395_s16 }
 0x949   :  { %s4289_s21 = scalar_lea.vmem %s2396_s16, 1024  ;;  %p4294_p7 = scmp.lt.s32.totalorder %s2396_s16, %s2396_s16 }
 0x94a   :  { %p4290_p6 = scmp.ne.s32.totalorder %s2396_s16, %s4289_s21  ;;  %p4295_p8 = scmp.lt.s32.totalorder %s4289_s21, %s4289_s21 }
 0x94c   :  { %p4296_p9 = por %p4295_p8, %p4294_p7 }
 0x94e   :  { %p4297_p10 = pnand %p4296_p9, %p4290_p6 }
 0xa11   :  { %v2383_v6 = vpop.f32.mrb[30].mxu1 }
 0xa12   :  { %v2384_v21 = vadd.f32 %v4156_v19, %v2383_v6  ;;  %v3340_v44 = vpop.f32.mrb[31].mxu1 }
 0xa14   :  { %2388 = vst [vmem:[#allocation12 + $0x38] sm:$0xff] %v2384_v21 }
 0xa15   :  { %4300 = shalt.err (!%p4297_p10)
}
 0xa16   :  { %s4301_s2 = scalar_lea.hbm %s5084_s7, 1024 }
 0xa17   :  { %p4302_p11 = scmp.ne.s32.totalorder %s5084_s7, %s4301_s2  ;;  %p4305_p12 = scmp.lt.u32.totalorder %s4301_s2, %s5084_s7 }
 0xa19   :  { %p4307_p13 = pnand %p4305_p12, %p4302_p11 }
 0xa1b   :  { %4310 = shalt.err (!%p4307_p13)
}
 0xa1c   :  { %2401 = dma.vmem_to_hbm [thread:$0]  %s2396_s16, 1024, %s5084_s7, [#allocation5], %s4326_s3, %s4326_s3, %s4327_s18  }
 0xa1d   :  { %4317 = dma.done.wait [#allocation5], 1024  }
 0xa1e   :  { %4318 = vsyncadd [#allocation5], 4294966272 }
 0xa1f   :  { %4319 = dma.done.wait [#allocation14], 128  }
 0xa20   :  { %4320 = vsyncadd [#allocation14], 4294967168 }
 0xa21   :  { %2418 = vsyncpa [#allocation4], 1 }
 0xa22   :  { %2419 = vsyncpa [#allocation7], 1 }
 0xa23   :  { %2420 = vsyncpa [#allocation10], 1 }
 0xa24   :  { %2421 = vsyncpa [#allocation5], 1 }
 0xa25   :  { %2422 = vsyncpa [#allocation14], 1 }

</bundles_post_ra>
